<compile_context>
chip_gen: v6e
topology: v6e:2x2x1
jax: 0.10.0
libtpu: 0.0.40
codegen_flags: <defaults>
</compile_context>

<pallas_src>
import functools
import numpy as np
import jax
import jax.numpy as jnp
from jax import lax
from jax.experimental import pallas as pl
from jax.experimental.pallas import tpu as pltpu


def _round_up(x, m):
    return ((x + m - 1) // m) * m


def _pad_kc(k_taps, cin):
    """Padded contraction depth K*Cin.

    Prefer a lane multiple (128) when the extra zero columns cost <= ~6% more patch
    bytes; otherwise fall back to the bf16 sublane multiple (16).  The padding must be
    a whole number of dummy kernel taps (multiple of Cin) so it can be generated by
    out-of-bounds gather indices instead of an extra jnp.pad copy of the patch matrix.
    """
    kc = k_taps * cin
    kc128 = _round_up(kc, 128)
    if (kc128 - kc) % cin == 0 and (kc128 - kc) * 16 <= kc:
        return kc128
    kc16 = _round_up(kc, 16)
    if (kc16 - kc) % cin == 0:
        return kc16
    return kc


def _choose_tile(bound):
    """(TN, cap): active sites per grid step and the padded static capacity.

    cap is rounded to an even multiple of TN so the 1-D parallel grid always has an
    even number (>=2) of blocks (keeps both v7x TensorCores busy).
    TN scales with the active-set size (sweepable; 512 for large point clouds).
    """
    if bound >= 4 * 512:
        tn = 512
    elif bound >= 4 * 256:
        tn = 256
    else:
        tn = 128
    cap = _round_up(max(bound, 1), 2 * tn)
    return tn, cap


# ----------------------------------------------------------------------------
# Pallas kernel: fused  relu( patches @ W_folded )  for one tile of active sites
# ----------------------------------------------------------------------------
def _conv_relu_kernel(w_ref, p_ref, o_ref):
    # w_ref: (KC, Cout) bf16  BN-folded conv weights; resident across the whole grid
    #                         -> MXU weight-stationary RHS operand
    # p_ref: (TN, KC)   bf16  one contiguous row-block of im2col patches (streamed)
    # o_ref: (TN, Cout) bf16
    acc = jnp.dot(p_ref[...], w_ref[...], preferred_element_type=jnp.float32)
    o_ref[...] = jnp.maximum(acc, 0.0).astype(o_ref.dtype)   # ReLU on f32 accumulator


@functools.lru_cache(maxsize=None)
def _build_conv_call(kc, cout, cap, tn):
    n_blocks = cap // tn
    cost = pl.CostEstimate(
        flops=2 * cap * kc * cout,
        transcendentals=0,
        bytes_accessed=2 * (cap * kc + cap * cout + kc * cout))
    return pl.pallas_call(
        _conv_relu_kernel,
        out_shape=jax.ShapeDtypeStruct((cap, cout), jnp.bfloat16),
        grid_spec=pltpu.PrefetchScalarGridSpec(
            num_scalar_prefetch=0,
            grid=(n_blocks,),
            in_specs=[
                pl.BlockSpec((kc, cout), lambda n: (0, 0)),   # weights stay resident
                pl.BlockSpec((tn, kc), lambda n: (n, 0)),     # contiguous patch rows
                # NOTE: if profiling shows exposed DMA on the small-Cout layers, add
                # pipeline_mode=pl.Buffered(3) to the patch BlockSpec (fits VMEM).
            ],
            out_specs=pl.BlockSpec((tn, cout), lambda n: (n, 0)),
        ),
        compiler_params=pltpu.CompilerParams(
            dimension_semantics=("parallel",),
            vmem_limit_bytes=32 * 1024 * 1024),
        cost_estimate=cost,
    )


# ----------------------------------------------------------------------------
# One sparse-conv block (subm or strided spconv) + folded BN + ReLU
# ----------------------------------------------------------------------------
def sparse_conv3d_bn_relu(x, w, ksize, stride, padding, out_idx, out_grid, tn):
    """Sparse conv + BN(folded) + ReLU evaluated only at active output sites.

    x:        (B, D, H, W, Cin) bf16 dense zero-filled input volume
    w:        (KCpad, Cout) bf16    weights, taps flattened tap-major, BN-scale folded,
                                    zero rows appended for the KC padding
    out_idx:  (cap,) int32          flat active output-site indices (fill value == N_out)
    out_grid: (Do, Ho, Wo)
    tn:       tile height used by the Pallas grid (cap % (2*tn) == 0)
    returns:  (B, Do, Ho, Wo, Cout) bf16 dense output volume
    """
    B, D, H, W, Cin = x.shape
    kd, kh, kw = ksize
    sd, sh, sw = stride
    pd, ph, pw = padding
    Do, Ho, Wo = out_grid
    kc_pad, cout = w.shape
    K = kd * kh * kw
    cap = out_idx.shape[0]
    n_out = B * Do * Ho * Wo
    n_pad_taps = (kc_pad - K * Cin) // Cin
    assert kc_pad == (K + n_pad_taps) * Cin

    # zero-pad spatially and flatten the gather source
    xp = jnp.pad(x, ((0, 0), (pd, pd), (ph, ph), (pw, pw), (0, 0)))
    Dp, Hp, Wp = D + 2 * pd, H + 2 * ph, W + 2 * pw
    n_flat = B * Dp * Hp * Wp
    flat_x = xp.reshape(n_flat, Cin)

    # decompose active output-site indices (capacity-padding rows are clamped here
    # and dropped at the scatter)
    fo = jnp.minimum(out_idx, n_out - 1)
    b = fo // (Do * Ho * Wo)
    r = fo % (Do * Ho * Wo)
    do = r // (Ho * Wo)
    ho = (r // Wo) % Ho
    wo = r % Wo

    # static per-tap offsets, tap-major order matching the weight reshape
    ka, kb, kcc = np.meshgrid(np.arange(kd), np.arange(kh), np.arange(kw), indexing='ij')
    ka = jnp.asarray(ka.reshape(-1), jnp.int32)
    kb = jnp.asarray(kb.reshape(-1), jnp.int32)
    kcc = jnp.asarray(kcc.reshape(-1), jnp.int32)

    zi = do[:, None] * sd + ka[None, :]                 # indices into the padded volume
    yi = ho[:, None] * sh + kb[None, :]
    xi = wo[:, None] * sw + kcc[None, :]
    g = ((b[:, None] * Dp + zi) * Hp + yi) * Wp + xi    # (cap, K) flat gather indices
    if n_pad_taps:
        # dummy taps point out of bounds -> gathered as zeros (mode='fill'); this pads
        # K*Cin to the lane-aligned depth without an extra copy of the patch matrix.
        g = jnp.concatenate(
            [g, jnp.full((cap, n_pad_taps), n_flat, jnp.int32)], axis=1)

    # im2col gather of ONLY the active sites, produced directly in (cap, KC) layout:
    # no wrapper-side transpose of the dominant patch stream.
    patches = jnp.take(flat_x, g, axis=0, mode='fill', fill_value=0)
    patches = patches.reshape(cap, kc_pad)

    out_t = _build_conv_call(kc_pad, cout, cap, tn)(w, patches)      # (cap, Cout) bf16

    # scatter straight back (no transpose); capacity rows (idx == n_out) are dropped.
    # TODO(synk): with XLA-level buffer donation the fresh dense zero-fill per layer
    #             could be aliased away; left to XLA's scatter/init fusion here.
    out = jnp.zeros((n_out, cout), jnp.bfloat16).at[out_idx].set(out_t, mode='drop')
    return out.reshape(B, Do, Ho, Wo, cout)


# ----------------------------------------------------------------------------
# Active-set bookkeeping (wrapper-side glue)
# ----------------------------------------------------------------------------
def _conv_out_grid(grid, ksize, stride, padding):
    return tuple((g + 2 * p - k) // s + 1
                 for g, k, s, p in zip(grid, ksize, stride, padding))


def _dilate_mask(mask, ksize, stride, padding):
    # Active set of a strided SparseConv3d = kernel-footprint dilation of the input set.
    return lax.reduce_window(
        mask, 0.0, lax.max,
        window_dimensions=(1,) + tuple(ksize),
        window_strides=(1,) + tuple(stride),
        padding=((0, 0),) + tuple((p, p) for p in padding))


def _active_indices(mask, bound):
    n = mask.size
    tn, cap = _choose_tile(min(bound, n))            # static capacity (true upper bound)
    idx = jnp.nonzero(mask.reshape(-1) > 0, size=cap, fill_value=n)[0].astype(jnp.int32)
    return idx, tn


# ----------------------------------------------------------------------------
# VoxelBackBone8x / MVoxelBackBone8x (parameters + forward)
# ----------------------------------------------------------------------------
def make_layers(cin):
    # (name, cin, cout, ksize, stride, padding, downsample)
    return [
        ('conv_input', cin, 16,  (3, 3, 3), (1, 1, 1), (1, 1, 1), False),
        ('conv1_0',    16,  16,  (3, 3, 3), (1, 1, 1), (1, 1, 1), False),
        ('conv2_0',    16,  32,  (3, 3, 3), (2, 2, 2), (1, 1, 1), True),
        ('conv2_1',    32,  32,  (3, 3, 3), (1, 1, 1), (1, 1, 1), False),
        ('conv2_2',    32,  32,  (3, 3, 3), (1, 1, 1), (1, 1, 1), False),
        ('conv3_0',    32,  64,  (3, 3, 3), (2, 2, 2), (1, 1, 1), True),
        ('conv3_1',    64,  64,  (3, 3, 3), (1, 1, 1), (1, 1, 1), False),
        ('conv3_2',    64,  64,  (3, 3, 3), (1, 1, 1), (1, 1, 1), False),
        ('conv4_0',    64,  64,  (3, 3, 3), (2, 2, 2), (0, 1, 1), True),
        ('conv4_1',    64,  64,  (3, 3, 3), (1, 1, 1), (1, 1, 1), False),
        ('conv4_2',    64,  64,  (3, 3, 3), (1, 1, 1), (1, 1, 1), False),
        # TODO(synk): conv_out padding follows model_cfg.last_pad (default 0 modeled).
        ('conv_out',   64, 128,  (3, 1, 1), (2, 1, 1), (0, 0, 0), True),
    ]


def init_backbone_params(key, cin):
    """Conv weights with eval-mode BN scale folded, flattened (K*Cin, Cout) + KC pad."""
    params = {}
    for i, (name, ci, co, ks, st, pad, down) in enumerate(make_layers(cin)):
        k = jax.random.fold_in(key, i)
        K = ks[0] * ks[1] * ks[2]
        fan_in = K * ci
        w = jax.random.normal(k, ks + (ci, co), jnp.float32) / np.sqrt(fan_in)
        gamma = jnp.ones((co,), jnp.float32)                      # BN default weight
        scale = gamma / jnp.sqrt(jnp.float32(1.0 + 1e-3))         # eval BN: mean=0, var=1
        w2 = (w * scale).reshape(K * ci, co)                      # (K*Cin, Cout) tap-major
        kc_pad = _pad_kc(K, ci)
        w2 = jnp.pad(w2, ((0, kc_pad - K * ci), (0, 0))).astype(jnp.bfloat16)
        params[name] = {'w': w2}
    return params


@functools.partial(jax.jit, static_argnames=('batch_size', 'sparse_shape'))
def voxel_backbone8x_forward(params, voxel_features, voxel_coords,
                             batch_size, sparse_shape):
    D, H, W = sparse_shape
    C = voxel_features.shape[1]
    n_vox = voxel_features.shape[0]
    b = voxel_coords[:, 0]
    z = voxel_coords[:, 1]
    y = voxel_coords[:, 2]
    xw = voxel_coords[:, 3]

    feats = jnp.zeros((batch_size, D, H, W, C), jnp.bfloat16)
    feats = feats.at[b, z, y, xw].set(voxel_features.astype(jnp.bfloat16))
    mask = jnp.zeros((batch_size, D, H, W), jnp.float32).at[b, z, y, xw].set(1.0)

    grid = (D, H, W)
    bound = min(n_vox, batch_size * D * H * W)      # static upper bound on active sites
    idx, tn = _active_indices(mask, bound)

    multi_scale = {}
    for (name, ci, co, ks, st, pad, down) in make_layers(C):
        if down:
            grid = _conv_out_grid(grid, ks, st, pad)
            mask = _dilate_mask(mask, ks, st, pad)
            mult = int(np.prod([-(-k // s) for k, s in zip(ks, st)]))  # outputs per input
            bound = min(bound * mult, batch_size * int(np.prod(grid)))
            idx, tn = _active_indices(mask, bound)
        feats = sparse_conv3d_bn_relu(feats, params[name]['w'], ks, st, pad,
                                      idx, grid, tn)
        if name == 'conv1_0':
            multi_scale['x_conv1'] = feats.astype(jnp.float32)
        elif name == 'conv2_2':
            multi_scale['x_conv2'] = feats.astype(jnp.float32)
        elif name == 'conv3_2':
            multi_scale['x_conv3'] = feats.astype(jnp.float32)
        elif name == 'conv4_2':
            multi_scale['x_conv4'] = feats.astype(jnp.float32)

    return feats.astype(jnp.float32), multi_scale


def m_voxel_backbone8x_forward(params_list, sparse_shapes, batch_dict):
    num_views = len([k for k in batch_dict
                     if k.startswith('pview_voxel_features_')])
    for i in range(num_views):
        vf = batch_dict[f'pview_voxel_features_{i}']
        vc = batch_dict[f'pview_voxel_coords_{i}']
        out, ms = voxel_backbone8x_forward(
            params_list[i], vf, vc,
            batch_size=batch_dict['batch_size'],
            sparse_shape=tuple(sparse_shapes[i]))
        batch_dict[f'pview_encoded_spconv_tensor_{i}'] = out
        batch_dict[f'pview_encoded_spconv_tensor_stride_{i}'] = 8
        batch_dict[f'pview_multi_scale_3d_features_{i}'] = ms
    return batch_dict


# ----------------------------------------------------------------------------
if __name__ == "__main__":
    key = jax.random.PRNGKey(0)
    batch_size = 2
    grid_sizes = [[16, 16, 24], [16, 16, 24]]   # [X, Y, Z] per view
    input_channels = [4, 4]
    num_voxels = 256

    params_list = []
    sparse_shapes = []
    batch_dict = {'batch_size': batch_size}
    for i, (gs, cin) in enumerate(zip(grid_sizes, input_channels)):
        sparse_shape = (gs[2] + 1, gs[1], gs[0])   # grid_size[::-1] + [1, 0, 0]
        sparse_shapes.append(sparse_shape)
        params_list.append(init_backbone_params(jax.random.fold_in(key, 100 + i), cin))

        # deterministic unique voxel coords: [batch_idx, z, y, x]
        kc = jax.random.fold_in(key, i)
        total = batch_size * gs[2] * gs[1] * gs[0]
        flat = jax.random.choice(kc, total, shape=(num_voxels,), replace=False)
        bb = flat // (gs[2] * gs[1] * gs[0])
        rem = flat % (gs[2] * gs[1] * gs[0])
        zz = rem // (gs[1] * gs[0])
        yy = (rem // gs[0]) % gs[1]
        xx = rem % gs[0]
        coords = jnp.stack([bb, zz, yy, xx], axis=1).astype(jnp.int32)
        feats = jax.random.normal(jax.random.fold_in(key, 10 + i),
                                  (num_voxels, cin), jnp.float32)
        batch_dict[f'pview_voxel_features_{i}'] = feats
        batch_dict[f'pview_voxel_coords_{i}'] = coords

    batch_dict = m_voxel_backbone8x_forward(params_list, sparse_shapes, batch_dict)

    for i in range(len(grid_sizes)):
        jax.block_until_ready(batch_dict[f'pview_encoded_spconv_tensor_{i}'])
        for v in batch_dict[f'pview_multi_scale_3d_features_{i}'].values():
            jax.block_until_ready(v)

    print("KERNEL_OK")
</pallas_src>

<mosaic_0001>
module attributes {stable_mosaic.version = 11 : i64} {
  func.func private @main(%arg0: i32) attributes {dimension_semantics = [#tpu.dimension_semantics<core_parallel>], iteration_bounds = array<i64: 2>, tpu.core_type = #tpu.core_type<sc_scalar_subcore>, window_params = []} {
    return
  }
}

module attributes {stable_mosaic.version = 11 : i64} {
  func.func private @main(%arg0: i32) attributes {dimension_semantics = [#tpu.dimension_semantics<core_parallel>], iteration_bounds = array<i64: 2>, tpu.core_type = #tpu.core_type<sc_scalar_subcore>, window_params = []} {
    return
  }
}

module attributes {stable_mosaic.version = 11 : i64} {
  func.func @_conv_relu_kernel(%arg0: i32, %arg1: memref<112x16xbf16, #tpu.memory_space<vmem>>, %arg2: memref<128x112xbf16, #tpu.memory_space<vmem>>, %arg3: memref<128x16xbf16, #tpu.memory_space<vmem>>) attributes {dimension_semantics = [#tpu.dimension_semantics<parallel>], iteration_bounds = array<i64: 2>, scalar_prefetch = 0 : i64, scratch_operands = 0 : i64, tpu.core_type = #tpu.core_type<tc>, window_params = [{pipeline_mode = #tpu.pipeline_mode<synchronous>, transform_indices = @transform_0, window_bounds = array<i64: 112, 16>}, {transform_indices = @transform_1, window_bounds = array<i64: 128, 112>}, {transform_indices = @transform_2, window_bounds = array<i64: 128, 16>}]} {
    %c0 = arith.constant 0 : index
    %c0_0 = arith.constant 0 : index
    %0 = vector.load %arg2[%c0, %c0_0] : memref<128x112xbf16, #tpu.memory_space<vmem>>, vector<128x112xbf16>
    %c0_1 = arith.constant 0 : index
    %c0_2 = arith.constant 0 : index
    %1 = vector.load %arg1[%c0_1, %c0_2] : memref<112x16xbf16, #tpu.memory_space<vmem>>, vector<112x16xbf16>
    %cst = arith.constant dense<0.000000e+00> : vector<128x16xf32>
    %2 = tpu.matmul %0, %1, %cst {dimension_numbers = #tpu.dot_dimension_numbers<[1], [0], [0], [1], [0, 0, 1, 1], [], []>} : vector<128x112xbf16>, vector<112x16xbf16>, vector<128x16xf32> -> vector<128x16xf32>
    %cst_3 = arith.constant 0.000000e+00 : f32
    %3 = vector.broadcast %cst_3 : f32 to vector<128x16xf32>
    %4 = arith.maximumf %2, %3 : vector<128x16xf32>
    %5 = arith.truncf %4 : vector<128x16xf32> to vector<128x16xbf16>
    %c0_4 = arith.constant 0 : index
    %c0_5 = arith.constant 0 : index
    %6 = vector.load %arg3[%c0_4, %c0_5] : memref<128x16xbf16, #tpu.memory_space<vmem>>, vector<128x16xbf16>
    tpu.vector_store %arg3[%c0_4, %c0_5], %5 {strides = array<i32>} : memref<128x16xbf16, #tpu.memory_space<vmem>>, vector<128x16xbf16>,
    return
  }
  func.func @transform_0(%arg0: i32) -> (i32, i32) {
    %c0_i32 = arith.constant 0 : i32
    %c0_i32_0 = arith.constant 0 : i32
    %c0_i32_1 = arith.constant 0 : i32
    return %c0_i32, %c0_i32_0 : i32, i32
  }
  func.func @transform_1(%arg0: i32) -> (i32, i32) {
    %c0_i32 = arith.constant 0 : i32
    %c0_i32_0 = arith.constant 0 : i32
    return %arg0, %c0_i32 : i32, i32
  }
  func.func @transform_2(%arg0: i32) -> (i32, i32) {
    %c0_i32 = arith.constant 0 : i32
    %c0_i32_0 = arith.constant 0 : i32
    return %arg0, %c0_i32 : i32, i32
  }
}

module attributes {stable_mosaic.version = 11 : i64} {
  func.func @_conv_relu_kernel(%arg0: i32, %arg1: memref<432x16xbf16, #tpu.memory_space<vmem>>, %arg2: memref<128x432xbf16, #tpu.memory_space<vmem>>, %arg3: memref<128x16xbf16, #tpu.memory_space<vmem>>) attributes {dimension_semantics = [#tpu.dimension_semantics<parallel>], iteration_bounds = array<i64: 2>, scalar_prefetch = 0 : i64, scratch_operands = 0 : i64, tpu.core_type = #tpu.core_type<tc>, window_params = [{pipeline_mode = #tpu.pipeline_mode<synchronous>, transform_indices = @transform_0, window_bounds = array<i64: 432, 16>}, {transform_indices = @transform_1, window_bounds = array<i64: 128, 432>}, {transform_indices = @transform_2, window_bounds = array<i64: 128, 16>}]} {
    %c0 = arith.constant 0 : index
    %c0_0 = arith.constant 0 : index
    %0 = vector.load %arg2[%c0, %c0_0] : memref<128x432xbf16, #tpu.memory_space<vmem>>, vector<128x432xbf16>
    %c0_1 = arith.constant 0 : index
    %c0_2 = arith.constant 0 : index
    %1 = vector.load %arg1[%c0_1, %c0_2] : memref<432x16xbf16, #tpu.memory_space<vmem>>, vector<432x16xbf16>
    %cst = arith.constant dense<0.000000e+00> : vector<128x16xf32>
    %2 = tpu.matmul %0, %1, %cst {dimension_numbers = #tpu.dot_dimension_numbers<[1], [0], [0], [1], [0, 0, 1, 1], [], []>} : vector<128x432xbf16>, vector<432x16xbf16>, vector<128x16xf32> -> vector<128x16xf32>
    %cst_3 = arith.constant 0.000000e+00 : f32
    %3 = vector.broadcast %cst_3 : f32 to vector<128x16xf32>
    %4 = arith.maximumf %2, %3 : vector<128x16xf32>
    %5 = arith.truncf %4 : vector<128x16xf32> to vector<128x16xbf16>
    %c0_4 = arith.constant 0 : index
    %c0_5 = arith.constant 0 : index
    %6 = vector.load %arg3[%c0_4, %c0_5] : memref<128x16xbf16, #tpu.memory_space<vmem>>, vector<128x16xbf16>
    tpu.vector_store %arg3[%c0_4, %c0_5], %5 {strides = array<i32>} : memref<128x16xbf16, #tpu.memory_space<vmem>>, vector<128x16xbf16>,
    return
  }
  func.func @transform_0(%arg0: i32) -> (i32, i32) {
    %c0_i32 = arith.constant 0 : i32
    %c0_i32_0 = arith.constant 0 : i32
    %c0_i32_1 = arith.constant 0 : i32
    return %c0_i32, %c0_i32_0 : i32, i32
  }
  func.func @transform_1(%arg0: i32) -> (i32, i32) {
    %c0_i32 = arith.constant 0 : i32
    %c0_i32_0 = arith.constant 0 : i32
    return %arg0, %c0_i32 : i32, i32
  }
  func.func @transform_2(%arg0: i32) -> (i32, i32) {
    %c0_i32 = arith.constant 0 : i32
    %c0_i32_0 = arith.constant 0 : i32
    return %arg0, %c0_i32 : i32, i32
  }
}

module attributes {stable_mosaic.version = 11 : i64} {
  func.func @_conv_relu_kernel(%arg0: i32, %arg1: memref<432x32xbf16, #tpu.memory_space<vmem>>, %arg2: memref<256x432xbf16, #tpu.memory_space<vmem>>, %arg3: memref<256x32xbf16, #tpu.memory_space<vmem>>) attributes {dimension_semantics = [#tpu.dimension_semantics<parallel>], iteration_bounds = array<i64: 8>, scalar_prefetch = 0 : i64, scratch_operands = 0 : i64, tpu.core_type = #tpu.core_type<tc>, window_params = [{pipeline_mode = #tpu.pipeline_mode<synchronous>, transform_indices = @transform_0, window_bounds = array<i64: 432, 32>}, {transform_indices = @transform_1, window_bounds = array<i64: 256, 432>}, {transform_indices = @transform_2, window_bounds = array<i64: 256, 32>}]} {
    %c0 = arith.constant 0 : index
    %c0_0 = arith.constant 0 : index
    %0 = vector.load %arg2[%c0, %c0_0] : memref<256x432xbf16, #tpu.memory_space<vmem>>, vector<256x432xbf16>
    %c0_1 = arith.constant 0 : index
    %c0_2 = arith.constant 0 : index
    %1 = vector.load %arg1[%c0_1, %c0_2] : memref<432x32xbf16, #tpu.memory_space<vmem>>, vector<432x32xbf16>
    %cst = arith.constant dense<0.000000e+00> : vector<256x32xf32>
    %2 = tpu.matmul %0, %1, %cst {dimension_numbers = #tpu.dot_dimension_numbers<[1], [0], [0], [1], [0, 0, 1, 1], [], []>} : vector<256x432xbf16>, vector<432x32xbf16>, vector<256x32xf32> -> vector<256x32xf32>
    %cst_3 = arith.constant 0.000000e+00 : f32
    %3 = vector.broadcast %cst_3 : f32 to vector<256x32xf32>
    %4 = arith.maximumf %2, %3 : vector<256x32xf32>
    %5 = arith.truncf %4 : vector<256x32xf32> to vector<256x32xbf16>
    %c0_4 = arith.constant 0 : index
    %c0_5 = arith.constant 0 : index
    %6 = vector.load %arg3[%c0_4, %c0_5] : memref<256x32xbf16, #tpu.memory_space<vmem>>, vector<256x32xbf16>
    tpu.vector_store %arg3[%c0_4, %c0_5], %5 {strides = array<i32>} : memref<256x32xbf16, #tpu.memory_space<vmem>>, vector<256x32xbf16>,
    return
  }
  func.func @transform_0(%arg0: i32) -> (i32, i32) {
    %c0_i32 = arith.constant 0 : i32
    %c0_i32_0 = arith.constant 0 : i32
    %c0_i32_1 = arith.constant 0 : i32
    return %c0_i32, %c0_i32_0 : i32, i32
  }
  func.func @transform_1(%arg0: i32) -> (i32, i32) {
    %c0_i32 = arith.constant 0 : i32
    %c0_i32_0 = arith.constant 0 : i32
    return %arg0, %c0_i32 : i32, i32
  }
  func.func @transform_2(%arg0: i32) -> (i32, i32) {
    %c0_i32 = arith.constant 0 : i32
    %c0_i32_0 = arith.constant 0 : i32
    return %arg0, %c0_i32 : i32, i32
  }
}

module attributes {stable_mosaic.version = 11 : i64} {
  func.func @_conv_relu_kernel(%arg0: i32, %arg1: memref<896x32xbf16, #tpu.memory_space<vmem>>, %arg2: memref<256x896xbf16, #tpu.memory_space<vmem>>, %arg3: memref<256x32xbf16, #tpu.memory_space<vmem>>) attributes {dimension_semantics = [#tpu.dimension_semantics<parallel>], iteration_bounds = array<i64: 8>, scalar_prefetch = 0 : i64, scratch_operands = 0 : i64, tpu.core_type = #tpu.core_type<tc>, window_params = [{pipeline_mode = #tpu.pipeline_mode<synchronous>, transform_indices = @transform_0, window_bounds = array<i64: 896, 32>}, {transform_indices = @transform_1, window_bounds = array<i64: 256, 896>}, {transform_indices = @transform_2, window_bounds = array<i64: 256, 32>}]} {
    %c0 = arith.constant 0 : index
    %c0_0 = arith.constant 0 : index
    %0 = vector.load %arg2[%c0, %c0_0] : memref<256x896xbf16, #tpu.memory_space<vmem>>, vector<256x896xbf16>
    %c0_1 = arith.constant 0 : index
    %c0_2 = arith.constant 0 : index
    %1 = vector.load %arg1[%c0_1, %c0_2] : memref<896x32xbf16, #tpu.memory_space<vmem>>, vector<896x32xbf16>
    %cst = arith.constant dense<0.000000e+00> : vector<256x32xf32>
    %2 = tpu.matmul %0, %1, %cst {dimension_numbers = #tpu.dot_dimension_numbers<[1], [0], [0], [1], [0, 0, 1, 1], [], []>} : vector<256x896xbf16>, vector<896x32xbf16>, vector<256x32xf32> -> vector<256x32xf32>
    %cst_3 = arith.constant 0.000000e+00 : f32
    %3 = vector.broadcast %cst_3 : f32 to vector<256x32xf32>
    %4 = arith.maximumf %2, %3 : vector<256x32xf32>
    %5 = arith.truncf %4 : vector<256x32xf32> to vector<256x32xbf16>
    %c0_4 = arith.constant 0 : index
    %c0_5 = arith.constant 0 : index
    %6 = vector.load %arg3[%c0_4, %c0_5] : memref<256x32xbf16, #tpu.memory_space<vmem>>, vector<256x32xbf16>
    tpu.vector_store %arg3[%c0_4, %c0_5], %5 {strides = array<i32>} : memref<256x32xbf16, #tpu.memory_space<vmem>>, vector<256x32xbf16>,
    return
  }
  func.func @transform_0(%arg0: i32) -> (i32, i32) {
    %c0_i32 = arith.constant 0 : i32
    %c0_i32_0 = arith.constant 0 : i32
    %c0_i32_1 = arith.constant 0 : i32
    return %c0_i32, %c0_i32_0 : i32, i32
  }
  func.func @transform_1(%arg0: i32) -> (i32, i32) {
    %c0_i32 = arith.constant 0 : i32
    %c0_i32_0 = arith.constant 0 : i32
    return %arg0, %c0_i32 : i32, i32
  }
  func.func @transform_2(%arg0: i32) -> (i32, i32) {
    %c0_i32 = arith.constant 0 : i32
    %c0_i32_0 = arith.constant 0 : i32
    return %arg0, %c0_i32 : i32, i32
  }
}

module attributes {stable_mosaic.version = 11 : i64} {
  func.func @_conv_relu_kernel(%arg0: i32, %arg1: memref<896x64xbf16, #tpu.memory_space<vmem>>, %arg2: memref<128x896xbf16, #tpu.memory_space<vmem>>, %arg3: memref<128x64xbf16, #tpu.memory_space<vmem>>) attributes {dimension_semantics = [#tpu.dimension_semantics<parallel>], iteration_bounds = array<i64: 2>, scalar_prefetch = 0 : i64, scratch_operands = 0 : i64, tpu.core_type = #tpu.core_type<tc>, window_params = [{pipeline_mode = #tpu.pipeline_mode<synchronous>, transform_indices = @transform_0, window_bounds = array<i64: 896, 64>}, {transform_indices = @transform_1, window_bounds = array<i64: 128, 896>}, {transform_indices = @transform_2, window_bounds = array<i64: 128, 64>}]} {
    %c0 = arith.constant 0 : index
    %c0_0 = arith.constant 0 : index
    %0 = vector.load %arg2[%c0, %c0_0] : memref<128x896xbf16, #tpu.memory_space<vmem>>, vector<128x896xbf16>
    %c0_1 = arith.constant 0 : index
    %c0_2 = arith.constant 0 : index
    %1 = vector.load %arg1[%c0_1, %c0_2] : memref<896x64xbf16, #tpu.memory_space<vmem>>, vector<896x64xbf16>
    %cst = arith.constant dense<0.000000e+00> : vector<128x64xf32>
    %2 = tpu.matmul %0, %1, %cst {dimension_numbers = #tpu.dot_dimension_numbers<[1], [0], [0], [1], [0, 0, 1, 1], [], []>} : vector<128x896xbf16>, vector<896x64xbf16>, vector<128x64xf32> -> vector<128x64xf32>
    %cst_3 = arith.constant 0.000000e+00 : f32
    %3 = vector.broadcast %cst_3 : f32 to vector<128x64xf32>
    %4 = arith.maximumf %2, %3 : vector<128x64xf32>
    %5 = arith.truncf %4 : vector<128x64xf32> to vector<128x64xbf16>
    %c0_4 = arith.constant 0 : index
    %c0_5 = arith.constant 0 : index
    %6 = vector.load %arg3[%c0_4, %c0_5] : memref<128x64xbf16, #tpu.memory_space<vmem>>, vector<128x64xbf16>
    tpu.vector_store %arg3[%c0_4, %c0_5], %5 {strides = array<i32>} : memref<128x64xbf16, #tpu.memory_space<vmem>>, vector<128x64xbf16>,
    return
  }
  func.func @transform_0(%arg0: i32) -> (i32, i32) {
    %c0_i32 = arith.constant 0 : i32
    %c0_i32_0 = arith.constant 0 : i32
    %c0_i32_1 = arith.constant 0 : i32
    return %c0_i32, %c0_i32_0 : i32, i32
  }
  func.func @transform_1(%arg0: i32) -> (i32, i32) {
    %c0_i32 = arith.constant 0 : i32
    %c0_i32_0 = arith.constant 0 : i32
    return %arg0, %c0_i32 : i32, i32
  }
  func.func @transform_2(%arg0: i32) -> (i32, i32) {
    %c0_i32 = arith.constant 0 : i32
    %c0_i32_0 = arith.constant 0 : i32
    return %arg0, %c0_i32 : i32, i32
  }
}

module attributes {stable_mosaic.version = 11 : i64} {
  func.func @_conv_relu_kernel(%arg0: i32, %arg1: memref<1792x64xbf16, #tpu.memory_space<vmem>>, %arg2: memref<128x1792xbf16, #tpu.memory_space<vmem>>, %arg3: memref<128x64xbf16, #tpu.memory_space<vmem>>) attributes {dimension_semantics = [#tpu.dimension_semantics<parallel>], iteration_bounds = array<i64: 2>, scalar_prefetch = 0 : i64, scratch_operands = 0 : i64, tpu.core_type = #tpu.core_type<tc>, window_params = [{pipeline_mode = #tpu.pipeline_mode<synchronous>, transform_indices = @transform_0, window_bounds = array<i64: 1792, 64>}, {transform_indices = @transform_1, window_bounds = array<i64: 128, 1792>}, {transform_indices = @transform_2, window_bounds = array<i64: 128, 64>}]} {
    %c0 = arith.constant 0 : index
    %c0_0 = arith.constant 0 : index
    %0 = vector.load %arg2[%c0, %c0_0] : memref<128x1792xbf16, #tpu.memory_space<vmem>>, vector<128x1792xbf16>
    %c0_1 = arith.constant 0 : index
    %c0_2 = arith.constant 0 : index
    %1 = vector.load %arg1[%c0_1, %c0_2] : memref<1792x64xbf16, #tpu.memory_space<vmem>>, vector<1792x64xbf16>
    %cst = arith.constant dense<0.000000e+00> : vector<128x64xf32>
    %2 = tpu.matmul %0, %1, %cst {dimension_numbers = #tpu.dot_dimension_numbers<[1], [0], [0], [1], [0, 0, 1, 1], [], []>} : vector<128x1792xbf16>, vector<1792x64xbf16>, vector<128x64xf32> -> vector<128x64xf32>
    %cst_3 = arith.constant 0.000000e+00 : f32
    %3 = vector.broadcast %cst_3 : f32 to vector<128x64xf32>
    %4 = arith.maximumf %2, %3 : vector<128x64xf32>
    %5 = arith.truncf %4 : vector<128x64xf32> to vector<128x64xbf16>
    %c0_4 = arith.constant 0 : index
    %c0_5 = arith.constant 0 : index
    %6 = vector.load %arg3[%c0_4, %c0_5] : memref<128x64xbf16, #tpu.memory_space<vmem>>, vector<128x64xbf16>
    tpu.vector_store %arg3[%c0_4, %c0_5], %5 {strides = array<i32>} : memref<128x64xbf16, #tpu.memory_space<vmem>>, vector<128x64xbf16>,
    return
  }
  func.func @transform_0(%arg0: i32) -> (i32, i32) {
    %c0_i32 = arith.constant 0 : i32
    %c0_i32_0 = arith.constant 0 : i32
    %c0_i32_1 = arith.constant 0 : i32
    return %c0_i32, %c0_i32_0 : i32, i32
  }
  func.func @transform_1(%arg0: i32) -> (i32, i32) {
    %c0_i32 = arith.constant 0 : i32
    %c0_i32_0 = arith.constant 0 : i32
    return %arg0, %c0_i32 : i32, i32
  }
  func.func @transform_2(%arg0: i32) -> (i32, i32) {
    %c0_i32 = arith.constant 0 : i32
    %c0_i32_0 = arith.constant 0 : i32
    return %arg0, %c0_i32 : i32, i32
  }
}

module attributes {stable_mosaic.version = 11 : i64} {
  func.func @_conv_relu_kernel(%arg0: i32, %arg1: memref<192x128xbf16, #tpu.memory_space<vmem>>, %arg2: memref<128x192xbf16, #tpu.memory_space<vmem>>, %arg3: memref<128x128xbf16, #tpu.memory_space<vmem>>) attributes {dimension_semantics = [#tpu.dimension_semantics<parallel>], iteration_bounds = array<i64: 2>, scalar_prefetch = 0 : i64, scratch_operands = 0 : i64, tpu.core_type = #tpu.core_type<tc>, window_params = [{pipeline_mode = #tpu.pipeline_mode<synchronous>, transform_indices = @transform_0, window_bounds = array<i64: 192, 128>}, {transform_indices = @transform_1, window_bounds = array<i64: 128, 192>}, {transform_indices = @transform_2, window_bounds = array<i64: 128, 128>}]} {
    %c0 = arith.constant 0 : index
    %c0_0 = arith.constant 0 : index
    %0 = vector.load %arg2[%c0, %c0_0] : memref<128x192xbf16, #tpu.memory_space<vmem>>, vector<128x192xbf16>
    %c0_1 = arith.constant 0 : index
    %c0_2 = arith.constant 0 : index
    %1 = vector.load %arg1[%c0_1, %c0_2] : memref<192x128xbf16, #tpu.memory_space<vmem>>, vector<192x128xbf16>
    %cst = arith.constant dense<0.000000e+00> : vector<128x128xf32>
    %2 = tpu.matmul %0, %1, %cst {dimension_numbers = #tpu.dot_dimension_numbers<[1], [0], [0], [1], [0, 0, 1, 1], [], []>} : vector<128x192xbf16>, vector<192x128xbf16>, vector<128x128xf32> -> vector<128x128xf32>
    %cst_3 = arith.constant 0.000000e+00 : f32
    %3 = vector.broadcast %cst_3 : f32 to vector<128x128xf32>
    %4 = arith.maximumf %2, %3 : vector<128x128xf32>
    %5 = arith.truncf %4 : vector<128x128xf32> to vector<128x128xbf16>
    %c0_4 = arith.constant 0 : index
    %c0_5 = arith.constant 0 : index
    %6 = vector.load %arg3[%c0_4, %c0_5] : memref<128x128xbf16, #tpu.memory_space<vmem>>, vector<128x128xbf16>
    tpu.vector_store %arg3[%c0_4, %c0_5], %5 {strides = array<i32>} : memref<128x128xbf16, #tpu.memory_space<vmem>>, vector<128x128xbf16>,
    return
  }
  func.func @transform_0(%arg0: i32) -> (i32, i32) {
    %c0_i32 = arith.constant 0 : i32
    %c0_i32_0 = arith.constant 0 : i32
    %c0_i32_1 = arith.constant 0 : i32
    return %c0_i32, %c0_i32_0 : i32, i32
  }
  func.func @transform_1(%arg0: i32) -> (i32, i32) {
    %c0_i32 = arith.constant 0 : i32
    %c0_i32_0 = arith.constant 0 : i32
    return %arg0, %c0_i32 : i32, i32
  }
  func.func @transform_2(%arg0: i32) -> (i32, i32) {
    %c0_i32 = arith.constant 0 : i32
    %c0_i32_0 = arith.constant 0 : i32
    return %arg0, %c0_i32 : i32, i32
  }
}

</mosaic_0001>

<bundles_post_ra>
// kernel: voxel_backbone8x_forward.12
= control target key start
LH: loop header
LB: loop body
LE: loop exit
PB: predicated region body
PF: predicated region fallthrough
CT: control target
= control target key end

     0   :  { %s706_s9 = smov 0   ;;  %s803_s0 = inlined_call_operand.vmem [shape: bf16[112,16], index: 0, kind: input, shape index: {}]   ;;  %s804_s1 = inlined_call_operand.vmem [shape: bf16[256,112], index: 1, kind: input, shape index: {}]   ;;  %s805_s2 = inlined_call_operand.vmem [shape: bf16[256,16], index: 2, kind: output, shape index: {}]  }
   0x1 LB: > { %s535_s10 = sadd.s32 4294967295, %s689_s9   ;;  %p539_p0 = scmp.ge.s32.totalorder %s689_s9, 1  ;;  %s689_s9 = sphi %s706_s9, %s12_s9  }
   0x2   : > { %p113_p1 = scmp.lt.s32.totalorder %s689_s9, 3 }
   0x4   : > { %p114_p2 = pnand %p539_p0, %p113_p1 }
   0x5   : > { %s540_s13 = sshll.u32 (!%p114_p2), %s535_s10, 4 }
   0x6   : > { %117 = sbr.rel (%p114_p2) target bundleno = 252 (0xfc), region = 28  ;;  %p136_p3 = scmp.lt.s32.totalorder (!%p114_p2), %s540_s13, 31 }
   0xb   : > { %v668_v0 = vld [vmem:[%s803_s0 + $0x30] sm:$0xff]   ;;  %v669_v1 = vld [vmem:[%s803_s0 + $0x28] sm:$0xff]   ;;  %s807_s13 = smov (!%p136_p3, %s540_s13), 31  ;;  %v670_v2 = vld [vmem:[%s803_s0 + $0x20] sm:$0xff]   ;;  %vm260_vm0 = vcmask 916480   ;;  %vm462_vm1 = vcmask 125952  }
   0xc   : > { %616 = vmatprep.subr.bf16.mxu0 %v668_v0  ;;  %646 = vmatprep.subr.bf16.mxu1 %v668_v0  ;;  %s541_s18 = sshll.u32 %s807_s13, 2  ;;  %v671_v3 = vld [vmem:[%s803_s0 + $0x18] sm:$0xff]   ;;  %v672_v6 = vld [vmem:[%s803_s0 + $0x10] sm:$0xff]   ;;  %v673_v7 = vld [vmem:[%s803_s0 + $0x8] sm:$0xff]  }
   0xd   : > { %617 = vmatpush3.bf16.msra.mxu0 %v668_v0  ;;  %653 = vmatpush3.bf16.msra.mxu1 %v668_v0  ;;  %s734_s23 = scalar_lea.vmem %s804_s1, %s541_s18  ;;  %v674_v8 = vld [vmem:[%s803_s0] sm:$0xff]   ;;  %s766_s4 = scalar_lea.vmem %s805_s2, %s541_s18 }
   0xe   : > { %618 = vmatprep.subr.bf16.mxu0 %v669_v1  ;;  %647 = vmatprep.subr.bf16.mxu1 %v669_v1  ;;  %v675_v4 = vld [vmem:[%s734_s23] sm:$0xff]   ;;  %v677_v9 = vld [vmem:[%s734_s23 + $0x8] sm:$0xff]   ;;  %v679_v11 = vld [vmem:[%s734_s23 + $0x10] sm:$0xff]  }
   0xf   : > { %v676_v5 = vld [vmem:[%s734_s23 + $0x20] sm:$0xff]   ;;  %630 = vmatprep.mubr.msk.bf16.mxu0 %vm260_vm0, %v675_v4  ;;  %v678_v10 = vld [vmem:[%s734_s23 + $0x28] sm:$0xff]   ;;  %v680_v12 = vld [vmem:[%s734_s23 + $0x30] sm:$0xff]  }
  0x10   : > { %638 = vmatprep.mubr.msk.bf16.mxu1 %vm260_vm0, %v676_v5  ;;  %v681_v13 = vld [vmem:[%s734_s23 + $0x18] sm:$0xff]  }
  0x11   : > { %619 = vmatpush3.bf16.msra.mxu0 %v669_v1  ;;  %654 = vmatpush3.bf16.msra.mxu1 %v669_v1  ;;  %v682_v14 = vld [vmem:[%s734_s23 + $0x38] sm:$0xff]  }
  0x12   : > { %620 = vmatprep.subr.bf16.mxu0 %v670_v2  ;;  %648 = vmatprep.subr.bf16.mxu1 %v670_v2 }
  0x15   : > { %621 = vmatpush3.bf16.msra.mxu0 %v670_v2  ;;  %655 = vmatpush3.bf16.msra.mxu1 %v670_v2 }
  0x16   : > { %622 = vmatprep.subr.bf16.mxu0 %v671_v3  ;;  %649 = vmatprep.subr.bf16.mxu1 %v671_v3 }
  0x19   : > { %623 = vmatpush3.bf16.msra.mxu0 %v671_v3  ;;  %656 = vmatpush3.bf16.msra.mxu1 %v671_v3 }
  0x1a   : > { %624 = vmatprep.subr.bf16.mxu0 %v672_v6  ;;  %650 = vmatprep.subr.bf16.mxu1 %v672_v6 }
  0x1d   : > { %625 = vmatpush3.bf16.msra.mxu0 %v672_v6  ;;  %657 = vmatpush3.bf16.msra.mxu1 %v672_v6 }
  0x1e   : > { %626 = vmatprep.subr.bf16.mxu0 %v673_v7  ;;  %651 = vmatprep.subr.bf16.mxu1 %v673_v7 }
  0x21   : > { %627 = vmatpush3.bf16.msra.mxu0 %v673_v7  ;;  %658 = vmatpush3.bf16.msra.mxu1 %v673_v7 }
  0x22   : > { %628 = vmatprep.subr.bf16.mxu0 %v674_v8  ;;  %652 = vmatprep.subr.bf16.mxu1 %v674_v8 }
  0x25   : > { %629 = vmatpush3.bf16.msra.mxu0 %v674_v8  ;;  %659 = vmatpush3.bf16.msra.mxu1 %v674_v8 }
  0x28   : > { %631 = vmatmul.mubr.msk.bf16.vlgmr.msra.gmra.mxu0 %vm260_vm0, %v677_v9  ;;  %639 = vmatmul.mubr.msk.bf16.vlgmr.msra.gmra.mxu1 %vm260_vm0, %v678_v10 }
  0x29   : > { %634 = vmatprep.mubr.msk.bf16.mxu0 %vm260_vm0, %v679_v11  ;;  %642 = vmatprep.mubr.msk.bf16.mxu1 %vm260_vm0, %v680_v12 }
  0x30   : > { %635 = vmatmul.mubr.msk.bf16.gmra.mxu0 %vm260_vm0, %v681_v13  ;;  %643 = vmatmul.mubr.msk.bf16.gmra.mxu1 %vm260_vm0, %v682_v14 }
  0xe8   : > { %v632_v15 = vpop.f32.mrf.mxu0  ;;  %v640_v16 = vpop.f32.mrf.mxu1 }
  0xe9   : > { %v384_v17 = vmax.f32 %v632_v15, 0.0  ;;  %v392_v18 = vmax.f32 %v640_v16, 0.0 }
  0xea   : > { %v319_v19 = vpop.f32.mrf.mxu0  ;;  %v351_v20 = vpop.f32.mrf.mxu1 }
  0xeb   : > { %v587_v21 = vpack.c.bf16 %v384_v17, %v384_v17  ;;  %v595_v22 = vpack.c.bf16 %v392_v18, %v392_v18  ;;  %v382_v23 = vmax.f32 %v319_v19, 0.0  ;;  %v390_v24 = vmax.f32 %v351_v20, 0.0 }
  0xec   : > { %v633_v25 = vpop.f32.mrf.mxu0  ;;  %v641_v26 = vpop.f32.mrf.mxu1 }
  0xed   : > { %465 = vst.msk [vmem:[%s766_s4 + $0x8] sm:$0xf] %vm462_vm1, %v587_v21  ;;  %473 = vst.msk [vmem:[%s766_s4 + $0x28] sm:$0xf] %vm462_vm1, %v595_v22  ;;  %v585_v27 = vpack.c.bf16 %v382_v23, %v382_v23  ;;  %v593_v28 = vpack.c.bf16 %v390_v24, %v390_v24  ;;  %v385_v29 = vmax.f32 %v633_v25, 0.0  ;;  %v393_v30 = vmax.f32 %v641_v26, 0.0 }
  0xee   : > { %v322_v31 = vpop.f32.mrf.mxu0  ;;  %v354_v32 = vpop.f32.mrf.mxu1 }
  0xef   : > { %463 = vst.msk [vmem:[%s766_s4] sm:$0xf] %vm462_vm1, %v585_v27  ;;  %471 = vst.msk [vmem:[%s766_s4 + $0x20] sm:$0xf] %vm462_vm1, %v593_v28  ;;  %v588_v33 = vpack.c.bf16 %v385_v29, %v385_v29  ;;  %v596_v34 = vpack.c.bf16 %v393_v30, %v393_v30  ;;  %v383_v35 = vmax.f32 %v322_v31, 0.0  ;;  %v391_v36 = vmax.f32 %v354_v32, 0.0 }
  0xf0   : > { %v636_v37 = vpop.f32.mrf.mxu0  ;;  %v644_v38 = vpop.f32.mrf.mxu1 }
  0xf1   : > { %466 = vst.msk [vmem:[%s766_s4 + $0xc] sm:$0xf] %vm462_vm1, %v588_v33  ;;  %474 = vst.msk [vmem:[%s766_s4 + $0x2c] sm:$0xf] %vm462_vm1, %v596_v34  ;;  %v586_v39 = vpack.c.bf16 %v383_v35, %v383_v35  ;;  %v594_v40 = vpack.c.bf16 %v391_v36, %v391_v36  ;;  %v388_v41 = vmax.f32 %v636_v37, 0.0  ;;  %v396_v42 = vmax.f32 %v644_v38, 0.0 }
  0xf2   : > { %v335_v43 = vpop.f32.mrf.mxu0  ;;  %v367_v44 = vpop.f32.mrf.mxu1 }
  0xf3   : > { %464 = vst.msk [vmem:[%s766_s4 + $0x4] sm:$0xf] %vm462_vm1, %v586_v39  ;;  %472 = vst.msk [vmem:[%s766_s4 + $0x24] sm:$0xf] %vm462_vm1, %v594_v40  ;;  %v591_v45 = vpack.c.bf16 %v388_v41, %v388_v41  ;;  %v599_v46 = vpack.c.bf16 %v396_v42, %v396_v42  ;;  %v386_v47 = vmax.f32 %v335_v43, 0.0  ;;  %v394_v48 = vmax.f32 %v367_v44, 0.0 }
  0xf4   : > { %v637_v49 = vpop.f32.mrf.mxu0  ;;  %v645_v50 = vpop.f32.mrf.mxu1 }
  0xf5   : > { %469 = vst.msk [vmem:[%s766_s4 + $0x18] sm:$0xf] %vm462_vm1, %v591_v45  ;;  %477 = vst.msk [vmem:[%s766_s4 + $0x38] sm:$0xf] %vm462_vm1, %v599_v46  ;;  %v589_v51 = vpack.c.bf16 %v386_v47, %v386_v47  ;;  %v597_v52 = vpack.c.bf16 %v394_v48, %v394_v48  ;;  %v389_v53 = vmax.f32 %v637_v49, 0.0  ;;  %v397_v54 = vmax.f32 %v645_v50, 0.0 }
  0xf6   : > { %v338_v55 = vpop.f32.mrf.mxu0  ;;  %v370_v56 = vpop.f32.mrf.mxu1 }
  0xf7   : > { %467 = vst.msk [vmem:[%s766_s4 + $0x10] sm:$0xf] %vm462_vm1, %v589_v51  ;;  %475 = vst.msk [vmem:[%s766_s4 + $0x30] sm:$0xf] %vm462_vm1, %v597_v52  ;;  %v592_v57 = vpack.c.bf16 %v389_v53, %v389_v53  ;;  %v600_v58 = vpack.c.bf16 %v397_v54, %v397_v54  ;;  %v387_v59 = vmax.f32 %v338_v55, 0.0  ;;  %v395_v60 = vmax.f32 %v370_v56, 0.0 }
  0xf9   : > { %470 = vst.msk [vmem:[%s766_s4 + $0x1c] sm:$0xf] %vm462_vm1, %v592_v57  ;;  %478 = vst.msk [vmem:[%s766_s4 + $0x3c] sm:$0xf] %vm462_vm1, %v600_v58  ;;  %v590_v61 = vpack.c.bf16 %v387_v59, %v387_v59  ;;  %v598_v62 = vpack.c.bf16 %v395_v60, %v395_v60 }
  0xfb   : > { %468 = vst.msk [vmem:[%s766_s4 + $0x14] sm:$0xf] %vm462_vm1, %v590_v61  ;;  %476 = vst.msk [vmem:[%s766_s4 + $0x34] sm:$0xf] %vm462_vm1, %v598_v62 }
  0xfc PF: > { %s12_s9 = sadd.s32 1, %s689_s9  }
  0xfd   : > { %p9_p4 = scmp.ge.s32.totalorder %s12_s9, 4  }
  0xff   :  { %11 = sbr.rel (!%p9_p4) target bundleno = 1 (0x1), region = 58 }

// kernel: voxel_backbone8x_forward.13
= control target key start
LH: loop header
LB: loop body
LE: loop exit
PB: predicated region body
PF: predicated region fallthrough
CT: control target
= control target key end

     0   :  { %s1207_s9 = smov 0   ;;  %s1396_s0 = inlined_call_operand.vmem [shape: bf16[432,16], index: 0, kind: input, shape index: {}]   ;;  %s1397_s1 = inlined_call_operand.vmem [shape: bf16[256,432], index: 1, kind: input, shape index: {}]   ;;  %s1398_s2 = inlined_call_operand.vmem [shape: bf16[256,16], index: 2, kind: output, shape index: {}]  }
   0x1 LB: > { %s923_s10 = sadd.s32 4294967295, %s1189_s9   ;;  %p927_p0 = scmp.ge.s32.totalorder %s1189_s9, 1  ;;  %s1189_s9 = sphi %s1207_s9, %s12_s9  }
   0x2   : > { %p114_p1 = scmp.lt.s32.totalorder %s1189_s9, 3 }
   0x4   : > { %p115_p2 = pnand %p927_p0, %p114_p1 }
   0x5   : > { %s928_s29 = sshll.u32 (!%p115_p2), %s923_s10, 4 }
   0x6   : > { %118 = sbr.rel (%p115_p2) target bundleno = 316 (0x13c), region = 28  ;;  %p138_p3 = scmp.lt.s32.totalorder (!%p115_p2), %s928_s29, 31 }
   0xb   : > { %v1108_v0 = vld [vmem:[%s1396_s0 + $0xb8] sm:$0xff]   ;;  %v1191_v1 = vmov 0   ;;  %v1111_v4 = vld [vmem:[%s1396_s0 + $0xb0] sm:$0xff]   ;;  %v1114_v7 = vld [vmem:[%s1396_s0 + $0xa8] sm:$0xff]   ;;  %s1400_s29 = smov (!%p138_p3, %s928_s29), 31  ;;  %vm551_vm0 = vcmask 392192  }
   0xc   : > { %673 = vmatprep.subr.bf16.mxu1 %v1191_v1  ;;  %v1109_v2 = vld [vmem:[%s1396_s0 + $0x78] sm:$0xff]   ;;  %v1112_v5 = vld [vmem:[%s1396_s0 + $0x70] sm:$0xff]   ;;  %v1115_v8 = vld [vmem:[%s1396_s0 + $0x68] sm:$0xff]   ;;  %s1018_s19 = sshll.u32 %s1400_s29, 4  ;;  %s932_s17 = sshll.u32 %s1400_s29, 2  ;;  %vm850_vm1 = vcmask 125952  }
   0xd   : > { %674 = vmatpush1.bf16.msra.mxu1 %v1108_v0  ;;  %v1110_v3 = vld [vmem:[%s1396_s0 + $0x38] sm:$0xff]   ;;  %1035 = vmatprep.subr.bf16.mxu0 %v1109_v2  ;;  %v1113_v6 = vld [vmem:[%s1396_s0 + $0x30] sm:$0xff]   ;;  %v1116_v9 = vld [vmem:[%s1396_s0 + $0x28] sm:$0xff]   ;;  %s1287_s28 = scalar_lea.vmem %s1397_s1, %s1018_s19  ;;  %s1359_s20 = scalar_lea.vmem %s1398_s2, %s932_s17 }
   0xe   : > { %675 = vmatprep.subr.bf16.mxu1 %v1191_v1  ;;  %1036 = vmatpush3.bf16.msra.mxu0 %v1110_v3  ;;  %v1117_v10 = vld [vmem:[%s1396_s0 + $0xa0] sm:$0xff]   ;;  %v1121_v13 = vld [vmem:[%s1396_s0 + $0x58] sm:$0xff]   ;;  %v1124_v16 = vld [vmem:[%s1396_s0 + $0x50] sm:$0xff]  }
   0xf   : > { %1037 = vmatprep.subr.bf16.mxu0 %v1112_v5  ;;  %v1118_v11 = vld [vmem:[%s1396_s0 + $0x60] sm:$0xff]   ;;  %v1120_v14 = vld [vmem:[%s1396_s0 + $0x98] sm:$0xff]   ;;  %v1123_v17 = vld [vmem:[%s1396_s0 + $0x90] sm:$0xff]  }
  0x10   : > { %v1119_v12 = vld [vmem:[%s1396_s0 + $0x20] sm:$0xff]   ;;  %v1122_v15 = vld [vmem:[%s1396_s0 + $0x18] sm:$0xff]   ;;  %v1125_v18 = vld [vmem:[%s1396_s0 + $0x10] sm:$0xff]  }
  0x11   : > { %676 = vmatpush1.bf16.msra.mxu1 %v1111_v4  ;;  %v1127_v19 = vld [vmem:[%s1396_s0 + $0x48] sm:$0xff]   ;;  %v1130_v22 = vld [vmem:[%s1396_s0 + $0x40] sm:$0xff]   ;;  %v1135_v26 = vld [vmem:[%s1396_s0 + $0xd0] sm:$0xff]  }
  0x12   : > { %677 = vmatprep.subr.bf16.mxu1 %v1191_v1  ;;  %1038 = vmatpush3.bf16.msra.mxu0 %v1113_v6  ;;  %v1126_v20 = vld [vmem:[%s1396_s0 + $0x88] sm:$0xff]   ;;  %v1134_v23 = vld [vmem:[%s1287_s28 + $0x4] ss:$16 sps:$4 sm:$0xff]   ;;  %v1132_v28 = vld [vmem:[%s1287_s28] ss:$16 sps:$4 sm:$0xff]  }
  0x13   : > { %1039 = vmatprep.subr.bf16.mxu0 %v1115_v8  ;;  %v1128_v21 = vld [vmem:[%s1396_s0 + $0x8] sm:$0xff]   ;;  %v1129_v24 = vld [vmem:[%s1396_s0 + $0x80] sm:$0xff]   ;;  %608 = vmatprep.mubr.bf16.mxu0 %v1134_v23 }
  0x14   : > { %v1131_v25 = vld [vmem:[%s1396_s0] sm:$0xff]   ;;  %v1143_v27 = vld [vmem:[%s1287_s28 + $0xc] ss:$16 sps:$4 sm:$0xff]   ;;  %v1141_v34 = vld [vmem:[%s1287_s28 + $0x8] ss:$16 sps:$4 sm:$0xff]  }
  0x15   : > { %678 = vmatpush1.bf16.msra.mxu1 %v1114_v7  ;;  %v1137_v29 = vld [vmem:[%s1287_s28 + $0x24] ss:$16 sps:$4 sm:$0xff]   ;;  %992 = vmatprep.mubr.msk.bf16.mxu1 %vm551_vm0, %v1143_v27  ;;  %v1136_v30 = vld [vmem:[%s1396_s0 + $0xc8] sm:$0xff]   ;;  %v1140_v32 = vld [vmem:[%s1287_s28 + $0x20] ss:$16 sps:$4 sm:$0xff]  }
  0x16   : > { %679 = vmatprep.subr.bf16.mxu1 %v1191_v1  ;;  %1040 = vmatpush3.bf16.msra.mxu0 %v1116_v9  ;;  %v1139_v31 = vld [vmem:[%s1396_s0 + $0xc0] sm:$0xff]   ;;  %v1147_v35 = vld [vmem:[%s1287_s28 + $0x2c] ss:$16 sps:$4 sm:$0xff]   ;;  %v1149_v38 = vld [vmem:[%s1287_s28 + $0x28] ss:$16 sps:$4 sm:$0xff]  }
  0x17   : > { %1041 = vmatprep.subr.bf16.mxu0 %v1118_v11  ;;  %v1144_v33 = vld [vmem:[%s1287_s28 + $0x44] ss:$16 sps:$4 sm:$0xff]   ;;  %v1146_v36 = vld [vmem:[%s1287_s28 + $0x40] ss:$16 sps:$4 sm:$0xff]   ;;  %v1153_v39 = vld [vmem:[%s1287_s28 + $0x4c] ss:$16 sps:$4 sm:$0xff]  }
  0x18   : > { %v1150_v37 = vld [vmem:[%s1287_s28 + $0x64] ss:$16 sps:$4 sm:$0xff]   ;;  %v1152_v40 = vld [vmem:[%s1287_s28 + $0x60] ss:$16 sps:$4 sm:$0xff]   ;;  %v1155_v42 = vld [vmem:[%s1287_s28 + $0x48] ss:$16 sps:$4 sm:$0xff]  }
  0x19   : > { %680 = vmatpush1.bf16.msra.mxu1 %v1117_v10  ;;  %v1156_v41 = vld [vmem:[%s1287_s28 + $0x84] ss:$16 sps:$4 sm:$0xff]   ;;  %v1159_v43 = vld [vmem:[%s1287_s28 + $0x6c] ss:$16 sps:$4 sm:$0xff]   ;;  %v1158_v44 = vld [vmem:[%s1287_s28 + $0x80] ss:$16 sps:$4 sm:$0xff]  }
  0x1a   : > { %681 = vmatprep.subr.bf16.mxu1 %v1191_v1  ;;  %1042 = vmatpush3.bf16.msra.mxu0 %v1119_v12  ;;  %v1162_v45 = vld [vmem:[%s1287_s28 + $0xa4] ss:$16 sps:$4 sm:$0xff]   ;;  %v1161_v46 = vld [vmem:[%s1287_s28 + $0x68] ss:$16 sps:$4 sm:$0xff]   ;;  %v1165_v47 = vld [vmem:[%s1287_s28 + $0x8c] ss:$16 sps:$4 sm:$0xff]  }
  0x1b   : > { %1043 = vmatprep.subr.bf16.mxu0 %v1121_v13  ;;  %v1164_v48 = vld [vmem:[%s1287_s28 + $0xa0] ss:$16 sps:$4 sm:$0xff]   ;;  %v1168_v49 = vld [vmem:[%s1287_s28 + $0xc4] ss:$16 sps:$4 sm:$0xff]   ;;  %v1167_v50 = vld [vmem:[%s1287_s28 + $0x88] ss:$16 sps:$4 sm:$0xff]  }
  0x1c   : > { %v1171_v51 = vld [vmem:[%s1287_s28 + $0xac] ss:$16 sps:$4 sm:$0xff]   ;;  %v1170_v52 = vld [vmem:[%s1287_s28 + $0xc0] ss:$16 sps:$4 sm:$0xff]   ;;  %v1174_v53 = vld [vmem:[%s1287_s28 + $0xe4] ss:$16 sps:$4 sm:$0xff]  }
  0x1d   : > { %682 = vmatpush1.bf16.msra.mxu1 %v1120_v14  ;;  %v1173_v54 = vld [vmem:[%s1287_s28 + $0xa8] ss:$16 sps:$4 sm:$0xff]   ;;  %v1177_v55 = vld [vmem:[%s1287_s28 + $0xcc] ss:$16 sps:$4 sm:$0xff]   ;;  %v1176_v56 = vld [vmem:[%s1287_s28 + $0xe0] ss:$16 sps:$4 sm:$0xff]  }
  0x1e   : > { %683 = vmatprep.subr.bf16.mxu1 %v1191_v1  ;;  %1044 = vmatpush3.bf16.msra.mxu0 %v1122_v15  ;;  %v1179_v57 = vld [vmem:[%s1287_s28 + $0xc8] ss:$16 sps:$4 sm:$0xff]   ;;  %v1180_v58 = vld [vmem:[%s1287_s28 + $0xec] ss:$16 sps:$4 sm:$0xff]  }
  0x1f   : > { %1045 = vmatprep.subr.bf16.mxu0 %v1124_v16  ;;  %v1182_v59 = vld [vmem:[%s1287_s28 + $0xe8] ss:$16 sps:$4 sm:$0xff]  }
  0x21   : > { %684 = vmatpush1.bf16.msra.mxu1 %v1123_v17 }
  0x22   : > { %685 = vmatprep.subr.bf16.mxu1 %v1191_v1  ;;  %1046 = vmatpush3.bf16.msra.mxu0 %v1125_v18 }
  0x23   : > { %1047 = vmatprep.subr.bf16.mxu0 %v1127_v19 }
  0x25   : > { %686 = vmatpush1.bf16.msra.mxu1 %v1126_v20 }
  0x26   : > { %687 = vmatprep.subr.bf16.mxu1 %v1191_v1  ;;  %1048 = vmatpush3.bf16.msra.mxu0 %v1128_v21 }
  0x27   : > { %1049 = vmatprep.subr.bf16.mxu0 %v1130_v22 }
  0x29   : > { %688 = vmatpush1.bf16.msra.mxu1 %v1129_v24 }
  0x2a   : > { %699 = vmatprep.subr.bf16.mxu1 %v1191_v1  ;;  %1050 = vmatpush3.bf16.msra.mxu0 %v1131_v25 }
  0x2d   : > { %700 = vmatpush2.bf16.msra.mxu1 %v1135_v26  ;;  %609 = vmatmul.mubr.bf16.vlgmr.msra.gmra.mxu0 %v1132_v28 }
  0x2e   : > { %701 = vmatprep.subr.bf16.mxu1 %v1191_v1  ;;  %616 = vmatprep.mubr.bf16.mxu0 %v1137_v29 }
  0x31   : > { %702 = vmatpush2.bf16.msra.mxu1 %v1136_v30 }
  0x32   : > { %703 = vmatprep.subr.bf16.mxu1 %v1191_v1 }
  0x35   : > { %704 = vmatpush2.bf16.msra.mxu1 %v1139_v31  ;;  %617 = vmatmul.mubr.bf16.gmra.mxu0 %v1140_v32 }
  0x36   : > { %624 = vmatprep.mubr.bf16.mxu0 %v1144_v33 }
  0x38   : > { %706 = vmatmul.mubr.bf16.vlgmr.msra.gmra.mxu1 %v1141_v34 }
  0x39   : > { %993 = vmatprep.mubr.msk.bf16.mxu1 %vm551_vm0, %v1147_v35 }
  0x3d   : > { %625 = vmatmul.mubr.bf16.gmra.mxu0 %v1146_v36 }
  0x3e   : > { %632 = vmatprep.mubr.bf16.mxu0 %v1150_v37 }
  0x40   : > { %714 = vmatmul.mubr.bf16.gmra.mxu1 %v1149_v38 }
  0x41   : > { %994 = vmatprep.mubr.msk.bf16.mxu1 %vm551_vm0, %v1153_v39 }
  0x45   : > { %633 = vmatmul.mubr.bf16.gmra.mxu0 %v1152_v40 }
  0x46   : > { %640 = vmatprep.mubr.bf16.mxu0 %v1156_v41 }
  0x48   : > { %722 = vmatmul.mubr.bf16.gmra.mxu1 %v1155_v42 }
  0x49   : > { %995 = vmatprep.mubr.msk.bf16.mxu1 %vm551_vm0, %v1159_v43 }
  0x4d   : > { %641 = vmatmul.mubr.bf16.gmra.mxu0 %v1158_v44 }
  0x4e   : > { %648 = vmatprep.mubr.bf16.mxu0 %v1162_v45 }
  0x50   : > { %730 = vmatmul.mubr.bf16.gmra.mxu1 %v1161_v46 }
  0x51   : > { %996 = vmatprep.mubr.msk.bf16.mxu1 %vm551_vm0, %v1165_v47 }
  0x55   : > { %649 = vmatmul.mubr.bf16.gmra.mxu0 %v1164_v48 }
  0x56   : > { %656 = vmatprep.mubr.bf16.mxu0 %v1168_v49 }
  0x58   : > { %738 = vmatmul.mubr.bf16.gmra.mxu1 %v1167_v50 }
  0x59   : > { %997 = vmatprep.mubr.msk.bf16.mxu1 %vm551_vm0, %v1171_v51 }
  0x5d   : > { %657 = vmatmul.mubr.bf16.gmra.mxu0 %v1170_v52 }
  0x5e   : > { %664 = vmatprep.mubr.bf16.mxu0 %v1174_v53 }
  0x60   : > { %746 = vmatmul.mubr.bf16.gmra.mxu1 %v1173_v54 }
  0x61   : > { %998 = vmatprep.mubr.msk.bf16.mxu1 %vm551_vm0, %v1177_v55 }
  0x65   : > { %665 = vmatmul.mubr.bf16.gmra.mxu0 %v1176_v56 }
  0x68   : > { %754 = vmatmul.mubr.bf16.gmra.mxu1 %v1179_v57 }
  0x69   : > { %999 = vmatprep.mubr.msk.bf16.mxu1 %vm551_vm0, %v1180_v58 }
  0x70   : > { %762 = vmatmul.mubr.bf16.gmra.mxu1 %v1182_v59 }
  0xed   : > { %v1051_v60 = vpop.f32.mrf.mxu0 }
  0xef   : > { %v1052_v61 = vpop.f32.mrf.mxu0 }
  0xf0   : > { %v1053_v1 = vadd.f32 %v1052_v61, %v1051_v60 }
  0xf1   : > { %v1054_v62 = vpop.f32.mrf.mxu0 }
  0xf3   : > { %v1055_v63 = vpop.f32.mrf.mxu0 }
  0xf4   : > { %v1056_v7 = vadd.f32 %v1055_v63, %v1054_v62 }
  0xf5   : > { %v1057_v0 = vpop.f32.mrf.mxu0 }
  0xf7   : > { %v1058_v2 = vpop.f32.mrf.mxu0 }
  0xf8   : > { %v707_v3 = vpop.f32.mrf.mxu1  ;;  %v1059_v15 = vadd.f32 %v1058_v2, %v1057_v0 }
  0xf9   : > { %v708_v4 = vadd.f32 %v1053_v1, %v707_v3  ;;  %v1060_v5 = vpop.f32.mrf.mxu0 }
  0xfa   : > { %v709_v6 = vpop.f32.mrf.mxu1 }
  0xfb   : > { %v770_v8 = vmax.f32 %v708_v4, 0.0  ;;  %v1061_v9 = vpop.f32.mrf.mxu0 }
  0xfc   : > { %v710_v10 = vpop.f32.mrf.mxu1  ;;  %v1062_v23 = vadd.f32 %v1061_v9, %v1060_v5 }
  0xfd   : > { %v1019_v11 = vpack.c.bf16 %v770_v8, %v770_v8  ;;  %v711_v12 = vadd.f32 %v1056_v7, %v710_v10  ;;  %v1063_v13 = vpop.f32.mrf.mxu0 }
  0xfe   : > { %v712_v14 = vpop.f32.mrf.mxu1 }
  0xff   : > { %851 = vst.msk [vmem:[%s1359_s20] sm:$0xf] %vm850_vm1, %v1019_v11  ;;  %v771_v16 = vmax.f32 %v711_v12, 0.0  ;;  %v1064_v17 = vpop.f32.mrf.mxu0 }
 0x100   : > { %v715_v18 = vpop.f32.mrf.mxu1  ;;  %v1065_v31 = vadd.f32 %v1064_v17, %v1063_v13 }
 0x101   : > { %v1020_v19 = vpack.c.bf16 %v771_v16, %v771_v16  ;;  %v716_v20 = vadd.f32 %v1059_v15, %v715_v18  ;;  %v1066_v21 = vpop.f32.mrf.mxu0 }
 0x102   : > { %v717_v22 = vpop.f32.mrf.mxu1 }
 0x103   : > { %852 = vst.msk [vmem:[%s1359_s20 + $0x4] sm:$0xf] %vm850_vm1, %v1020_v19  ;;  %v772_v24 = vmax.f32 %v716_v20, 0.0  ;;  %v1067_v25 = vpop.f32.mrf.mxu0 }
 0x104   : > { %v718_v26 = vpop.f32.mrf.mxu1  ;;  %v1068_v39 = vadd.f32 %v1067_v25, %v1066_v21 }
 0x105   : > { %v1021_v27 = vpack.c.bf16 %v772_v24, %v772_v24  ;;  %v719_v28 = vadd.f32 %v1062_v23, %v718_v26  ;;  %v1069_v29 = vpop.f32.mrf.mxu0 }
 0x106   : > { %v720_v30 = vpop.f32.mrf.mxu1 }
 0x107   : > { %853 = vst.msk [vmem:[%s1359_s20 + $0x8] sm:$0xf] %vm850_vm1, %v1021_v27  ;;  %v773_v32 = vmax.f32 %v719_v28, 0.0  ;;  %v1070_v33 = vpop.f32.mrf.mxu0 }
 0x108   : > { %v723_v34 = vpop.f32.mrf.mxu1  ;;  %v1071_v47 = vadd.f32 %v1070_v33, %v1069_v29 }
 0x109   : > { %v1022_v35 = vpack.c.bf16 %v773_v32, %v773_v32  ;;  %v724_v36 = vadd.f32 %v1065_v31, %v723_v34  ;;  %v1072_v37 = vpop.f32.mrf.mxu0 }
 0x10a   : > { %v725_v38 = vpop.f32.mrf.mxu1 }
 0x10b   : > { %854 = vst.msk [vmem:[%s1359_s20 + $0xc] sm:$0xf] %vm850_vm1, %v1022_v35  ;;  %v774_v40 = vmax.f32 %v724_v36, 0.0  ;;  %v1073_v41 = vpop.f32.mrf.mxu0 }
 0x10c   : > { %v726_v42 = vpop.f32.mrf.mxu1  ;;  %v1074_v55 = vadd.f32 %v1073_v41, %v1072_v37 }
 0x10d   : > { %v1023_v43 = vpack.c.bf16 %v774_v40, %v774_v40  ;;  %v727_v44 = vadd.f32 %v1068_v39, %v726_v42  ;;  %v1075_v45 = vpop.f32.mrf.mxu0 }
 0x10e   : > { %v728_v46 = vpop.f32.mrf.mxu1 }
 0x10f   : > { %855 = vst.msk [vmem:[%s1359_s20 + $0x10] sm:$0xf] %vm850_vm1, %v1023_v43  ;;  %v775_v48 = vmax.f32 %v727_v44, 0.0  ;;  %v1076_v49 = vpop.f32.mrf.mxu0 }
 0x110   : > { %v731_v50 = vpop.f32.mrf.mxu1  ;;  %v1077_v63 = vadd.f32 %v1076_v49, %v1075_v45 }
 0x111   : > { %v1024_v51 = vpack.c.bf16 %v775_v48, %v775_v48  ;;  %v732_v52 = vadd.f32 %v1071_v47, %v731_v50  ;;  %v1078_v53 = vpop.f32.mrf.mxu0 }
 0x112   : > { %v733_v54 = vpop.f32.mrf.mxu1 }
 0x113   : > { %856 = vst.msk [vmem:[%s1359_s20 + $0x14] sm:$0xf] %vm850_vm1, %v1024_v51  ;;  %v776_v56 = vmax.f32 %v732_v52, 0.0  ;;  %v1079_v57 = vpop.f32.mrf.mxu0 }
 0x114   : > { %v734_v58 = vpop.f32.mrf.mxu1  ;;  %v1080_v7 = vadd.f32 %v1079_v57, %v1078_v53 }
 0x115   : > { %v1025_v59 = vpack.c.bf16 %v776_v56, %v776_v56  ;;  %v735_v60 = vadd.f32 %v1074_v55, %v734_v58  ;;  %v1081_v61 = vpop.f32.mrf.mxu0 }
 0x116   : > { %v736_v62 = vpop.f32.mrf.mxu1 }
 0x117   : > { %857 = vst.msk [vmem:[%s1359_s20 + $0x18] sm:$0xf] %vm850_vm1, %v1025_v59  ;;  %v777_v0 = vmax.f32 %v735_v60, 0.0  ;;  %v1082_v1 = vpop.f32.mrf.mxu0 }
 0x118   : > { %v739_v2 = vpop.f32.mrf.mxu1  ;;  %v1083_v15 = vadd.f32 %v1082_v1, %v1081_v61 }
 0x119   : > { %v1026_v3 = vpack.c.bf16 %v777_v0, %v777_v0  ;;  %v740_v4 = vadd.f32 %v1077_v63, %v739_v2  ;;  %v1084_v5 = vpop.f32.mrf.mxu0 }
 0x11a   : > { %v741_v6 = vpop.f32.mrf.mxu1 }
 0x11b   : > { %858 = vst.msk [vmem:[%s1359_s20 + $0x1c] sm:$0xf] %vm850_vm1, %v1026_v3  ;;  %v778_v8 = vmax.f32 %v740_v4, 0.0  ;;  %v1085_v9 = vpop.f32.mrf.mxu0 }
 0x11c   : > { %v742_v10 = vpop.f32.mrf.mxu1  ;;  %v1086_v23 = vadd.f32 %v1085_v9, %v1084_v5 }
 0x11d   : > { %v1027_v11 = vpack.c.bf16 %v778_v8, %v778_v8  ;;  %v743_v12 = vadd.f32 %v1080_v7, %v742_v10  ;;  %v1087_v13 = vpop.f32.mrf.mxu0 }
 0x11e   : > { %v744_v14 = vpop.f32.mrf.mxu1 }
 0x11f   : > { %859 = vst.msk [vmem:[%s1359_s20 + $0x20] sm:$0xf] %vm850_vm1, %v1027_v11  ;;  %v779_v16 = vmax.f32 %v743_v12, 0.0  ;;  %v1088_v17 = vpop.f32.mrf.mxu0 }
 0x120   : > { %v747_v18 = vpop.f32.mrf.mxu1  ;;  %v1089_v31 = vadd.f32 %v1088_v17, %v1087_v13 }
 0x121   : > { %v1028_v19 = vpack.c.bf16 %v779_v16, %v779_v16  ;;  %v748_v20 = vadd.f32 %v1083_v15, %v747_v18  ;;  %v1090_v21 = vpop.f32.mrf.mxu0 }
 0x122   : > { %v749_v22 = vpop.f32.mrf.mxu1 }
 0x123   : > { %860 = vst.msk [vmem:[%s1359_s20 + $0x24] sm:$0xf] %vm850_vm1, %v1028_v19  ;;  %v780_v24 = vmax.f32 %v748_v20, 0.0  ;;  %v1091_v25 = vpop.f32.mrf.mxu0 }
 0x124   : > { %v750_v26 = vpop.f32.mrf.mxu1  ;;  %v1092_v38 = vadd.f32 %v1091_v25, %v1090_v21 }
 0x125   : > { %v1029_v27 = vpack.c.bf16 %v780_v24, %v780_v24  ;;  %v751_v28 = vadd.f32 %v1086_v23, %v750_v26  ;;  %v1093_v29 = vpop.f32.mrf.mxu0 }
 0x126   : > { %v752_v30 = vpop.f32.mrf.mxu1 }
 0x127   : > { %861 = vst.msk [vmem:[%s1359_s20 + $0x28] sm:$0xf] %vm850_vm1, %v1029_v27  ;;  %v781_v32 = vmax.f32 %v751_v28, 0.0  ;;  %v1094_v33 = vpop.f32.mrf.mxu0 }
 0x128   : > { %v755_v34 = vpop.f32.mrf.mxu1  ;;  %v1095_v45 = vadd.f32 %v1094_v33, %v1093_v29 }
 0x129   : > { %v1030_v35 = vpack.c.bf16 %v781_v32, %v781_v32  ;;  %v756_v36 = vadd.f32 %v1089_v31, %v755_v34  ;;  %v1096_v40 = vpop.f32.mrf.mxu0 }
 0x12a   : > { %v757_v37 = vpop.f32.mrf.mxu1 }
 0x12b   : > { %862 = vst.msk [vmem:[%s1359_s20 + $0x2c] sm:$0xf] %vm850_vm1, %v1030_v35  ;;  %v782_v39 = vmax.f32 %v756_v36, 0.0  ;;  %v1097_v47 = vpop.f32.mrf.mxu0 }
 0x12c   : > { %v758_v41 = vpop.f32.mrf.mxu1  ;;  %v1098_v52 = vadd.f32 %v1097_v47, %v1096_v40 }
 0x12d   : > { %v1031_v42 = vpack.c.bf16 %v782_v39, %v782_v39  ;;  %v759_v43 = vadd.f32 %v1092_v38, %v758_v41 }
 0x12e   : > { %v760_v44 = vpop.f32.mrf.mxu1 }
 0x12f   : > { %863 = vst.msk [vmem:[%s1359_s20 + $0x30] sm:$0xf] %vm850_vm1, %v1031_v42  ;;  %v783_v46 = vmax.f32 %v759_v43, 0.0 }
 0x130   : > { %v763_v48 = vpop.f32.mrf.mxu1 }
 0x131   : > { %v1032_v49 = vpack.c.bf16 %v783_v46, %v783_v46  ;;  %v764_v50 = vadd.f32 %v1095_v45, %v763_v48 }
 0x132   : > { %v765_v51 = vpop.f32.mrf.mxu1 }
 0x133   : > { %864 = vst.msk [vmem:[%s1359_s20 + $0x34] sm:$0xf] %vm850_vm1, %v1032_v49  ;;  %v784_v53 = vmax.f32 %v764_v50, 0.0 }
 0x134   : > { %v766_v54 = vpop.f32.mrf.mxu1 }
 0x135   : > { %v1033_v55 = vpack.c.bf16 %v784_v53, %v784_v53  ;;  %v767_v56 = vadd.f32 %v1098_v52, %v766_v54 }
 0x136   : > { %v768_v57 = vpop.f32.mrf.mxu1 }
 0x137   : > { %865 = vst.msk [vmem:[%s1359_s20 + $0x38] sm:$0xf] %vm850_vm1, %v1033_v55  ;;  %v785_v58 = vmax.f32 %v767_v56, 0.0 }
 0x139   : > { %v1034_v59 = vpack.c.bf16 %v785_v58, %v785_v58 }
 0x13b   : > { %866 = vst.msk [vmem:[%s1359_s20 + $0x3c] sm:$0xf] %vm850_vm1, %v1034_v59 }
 0x13c PF: > { %s12_s9 = sadd.s32 1, %s1189_s9  }
 0x13d   : > { %p9_p4 = scmp.ge.s32.totalorder %s12_s9, 4  }
 0x13f   :  { %11 = sbr.rel (!%p9_p4) target bundleno = 1 (0x1), region = 58 }

// kernel: voxel_backbone8x_forward.14
= control target key start
LH: loop header
LB: loop body
LE: loop exit
PB: predicated region body
PF: predicated region fallthrough
CT: control target
= control target key end

     0   :  { %s1807_s9 = smov 0   ;;  %s2068_s0 = inlined_call_operand.vmem [shape: bf16[432,32], index: 0, kind: input, shape index: {}]   ;;  %s2069_s1 = inlined_call_operand.vmem [shape: bf16[2048,432], index: 1, kind: input, shape index: {}]   ;;  %s2070_s2 = inlined_call_operand.vmem [shape: bf16[2048,32], index: 2, kind: output, shape index: {}]  }
   0x1 LB: > { %s1355_s10 = sadd.s32 4294967295, %s1789_s9   ;;  %p1359_p0 = scmp.ge.s32.totalorder %s1789_s9, 1  ;;  %s1789_s9 = sphi %s1807_s9, %s12_s9  }
   0x2   : > { %p114_p1 = scmp.lt.s32.totalorder %s1789_s9, 9 }
   0x4   : > { %p115_p2 = pnand %p1359_p0, %p114_p1 }
   0x5   : > { %s1360_s29 = sshll.u32 (!%p115_p2), %s1355_s10, 5 }
   0x6   : > { %118 = sbr.rel (%p115_p2) target bundleno = 380 (0x17c), region = 28  ;;  %p138_p3 = scmp.lt.s32.totalorder (!%p115_p2), %s1360_s29, 255 }
   0xb   : > { %v1660_v0 = vld [vmem:[%s2068_s0 + $0xb8] sm:$0xff]   ;;  %v1791_v1 = vmov 0   ;;  %v1663_v4 = vld [vmem:[%s2068_s0 + $0xb0] sm:$0xff]   ;;  %v1666_v7 = vld [vmem:[%s2068_s0 + $0xa8] sm:$0xff]   ;;  %s2072_s29 = smov (!%p138_p3, %s1360_s29), 255  ;;  %vm735_vm0 = vcmask 392192  }
   0xc   : > { %945 = vmatprep.subr.bf16.mxu1 %v1791_v1  ;;  %v1661_v2 = vld [vmem:[%s2068_s0 + $0x78] sm:$0xff]   ;;  %v1664_v5 = vld [vmem:[%s2068_s0 + $0x70] sm:$0xff]   ;;  %v1667_v8 = vld [vmem:[%s2068_s0 + $0x68] sm:$0xff]   ;;  %s1506_s19 = sshll.u32 %s2072_s29, 4  ;;  %s1364_s17 = sshll.u32 %s2072_s29, 2  ;;  %vm1266_vm1 = vcmask 257024  }
   0xd   : > { %946 = vmatpush1.bf16.msra.mxu1 %v1660_v0  ;;  %v1662_v3 = vld [vmem:[%s2068_s0 + $0x38] sm:$0xff]   ;;  %1539 = vmatprep.subr.bf16.mxu0 %v1661_v2  ;;  %v1665_v6 = vld [vmem:[%s2068_s0 + $0x30] sm:$0xff]   ;;  %v1668_v9 = vld [vmem:[%s2068_s0 + $0x28] sm:$0xff]   ;;  %s1887_s28 = scalar_lea.vmem %s2069_s1, %s1506_s19  ;;  %s1999_s20 = scalar_lea.vmem %s2070_s2, %s1364_s17 }
   0xe   : > { %947 = vmatprep.subr.bf16.mxu1 %v1791_v1  ;;  %1540 = vmatpush3.bf16.msra.mxu0 %v1662_v3  ;;  %v1669_v10 = vld [vmem:[%s2068_s0 + $0xa0] sm:$0xff]   ;;  %v1673_v13 = vld [vmem:[%s2068_s0 + $0x58] sm:$0xff]   ;;  %v1676_v16 = vld [vmem:[%s2068_s0 + $0x50] sm:$0xff]  }
   0xf   : > { %1541 = vmatprep.subr.bf16.mxu0 %v1664_v5  ;;  %v1670_v11 = vld [vmem:[%s2068_s0 + $0x60] sm:$0xff]   ;;  %v1672_v14 = vld [vmem:[%s2068_s0 + $0x98] sm:$0xff]   ;;  %v1675_v17 = vld [vmem:[%s2068_s0 + $0x90] sm:$0xff]  }
  0x10   : > { %v1671_v12 = vld [vmem:[%s2068_s0 + $0x20] sm:$0xff]   ;;  %v1674_v15 = vld [vmem:[%s2068_s0 + $0x18] sm:$0xff]   ;;  %v1677_v18 = vld [vmem:[%s2068_s0 + $0x10] sm:$0xff]  }
  0x11   : > { %948 = vmatpush1.bf16.msra.mxu1 %v1663_v4  ;;  %v1679_v19 = vld [vmem:[%s2068_s0 + $0x48] sm:$0xff]   ;;  %v1682_v22 = vld [vmem:[%s2068_s0 + $0x40] sm:$0xff]   ;;  %v1687_v26 = vld [vmem:[%s2068_s0 + $0xd0] sm:$0xff]  }
  0x12   : > { %949 = vmatprep.subr.bf16.mxu1 %v1791_v1  ;;  %1542 = vmatpush3.bf16.msra.mxu0 %v1665_v6  ;;  %v1678_v20 = vld [vmem:[%s2068_s0 + $0x88] sm:$0xff]   ;;  %v1686_v23 = vld [vmem:[%s1887_s28 + $0x4] ss:$16 sps:$4 sm:$0xff]   ;;  %v1684_v28 = vld [vmem:[%s1887_s28] ss:$16 sps:$4 sm:$0xff]  }
  0x13   : > { %1543 = vmatprep.subr.bf16.mxu0 %v1667_v8  ;;  %v1680_v21 = vld [vmem:[%s2068_s0 + $0x8] sm:$0xff]   ;;  %v1681_v24 = vld [vmem:[%s2068_s0 + $0x80] sm:$0xff]   ;;  %816 = vmatprep.mubr.bf16.mxu0 %v1686_v23 }
  0x14   : > { %v1683_v25 = vld [vmem:[%s2068_s0] sm:$0xff]   ;;  %v1695_v27 = vld [vmem:[%s1887_s28 + $0xc] ss:$16 sps:$4 sm:$0xff]   ;;  %v1693_v34 = vld [vmem:[%s1887_s28 + $0x8] ss:$16 sps:$4 sm:$0xff]  }
  0x15   : > { %950 = vmatpush1.bf16.msra.mxu1 %v1666_v7  ;;  %v1689_v29 = vld [vmem:[%s1887_s28 + $0x24] ss:$16 sps:$4 sm:$0xff]   ;;  %1456 = vmatprep.mubr.msk.bf16.mxu1 %vm735_vm0, %v1695_v27  ;;  %v1688_v30 = vld [vmem:[%s2068_s0 + $0xc8] sm:$0xff]   ;;  %v1692_v32 = vld [vmem:[%s1887_s28 + $0x20] ss:$16 sps:$4 sm:$0xff]  }
  0x16   : > { %951 = vmatprep.subr.bf16.mxu1 %v1791_v1  ;;  %1544 = vmatpush3.bf16.msra.mxu0 %v1668_v9  ;;  %v1691_v31 = vld [vmem:[%s2068_s0 + $0xc0] sm:$0xff]   ;;  %v1699_v35 = vld [vmem:[%s1887_s28 + $0x2c] ss:$16 sps:$4 sm:$0xff]   ;;  %v1701_v38 = vld [vmem:[%s1887_s28 + $0x28] ss:$16 sps:$4 sm:$0xff]  }
  0x17   : > { %1545 = vmatprep.subr.bf16.mxu0 %v1670_v11  ;;  %v1696_v33 = vld [vmem:[%s1887_s28 + $0x44] ss:$16 sps:$4 sm:$0xff]   ;;  %v1698_v36 = vld [vmem:[%s1887_s28 + $0x40] ss:$16 sps:$4 sm:$0xff]   ;;  %v1705_v39 = vld [vmem:[%s1887_s28 + $0x4c] ss:$16 sps:$4 sm:$0xff]  }
  0x18   : > { %v1702_v37 = vld [vmem:[%s1887_s28 + $0x64] ss:$16 sps:$4 sm:$0xff]   ;;  %v1704_v40 = vld [vmem:[%s1887_s28 + $0x60] ss:$16 sps:$4 sm:$0xff]   ;;  %v1707_v42 = vld [vmem:[%s1887_s28 + $0x48] ss:$16 sps:$4 sm:$0xff]  }
  0x19   : > { %952 = vmatpush1.bf16.msra.mxu1 %v1669_v10  ;;  %v1708_v41 = vld [vmem:[%s1887_s28 + $0x84] ss:$16 sps:$4 sm:$0xff]   ;;  %v1711_v43 = vld [vmem:[%s1887_s28 + $0x6c] ss:$16 sps:$4 sm:$0xff]   ;;  %v1710_v44 = vld [vmem:[%s1887_s28 + $0x80] ss:$16 sps:$4 sm:$0xff]  }
  0x1a   : > { %953 = vmatprep.subr.bf16.mxu1 %v1791_v1  ;;  %1546 = vmatpush3.bf16.msra.mxu0 %v1671_v12  ;;  %v1714_v45 = vld [vmem:[%s1887_s28 + $0xa4] ss:$16 sps:$4 sm:$0xff]   ;;  %v1713_v46 = vld [vmem:[%s1887_s28 + $0x68] ss:$16 sps:$4 sm:$0xff]   ;;  %v1717_v47 = vld [vmem:[%s1887_s28 + $0x8c] ss:$16 sps:$4 sm:$0xff]  }
  0x1b   : > { %1547 = vmatprep.subr.bf16.mxu0 %v1673_v13  ;;  %v1716_v48 = vld [vmem:[%s1887_s28 + $0xa0] ss:$16 sps:$4 sm:$0xff]   ;;  %v1720_v49 = vld [vmem:[%s1887_s28 + $0xc4] ss:$16 sps:$4 sm:$0xff]   ;;  %v1719_v50 = vld [vmem:[%s1887_s28 + $0x88] ss:$16 sps:$4 sm:$0xff]  }
  0x1c   : > { %v1723_v51 = vld [vmem:[%s1887_s28 + $0xac] ss:$16 sps:$4 sm:$0xff]   ;;  %v1722_v52 = vld [vmem:[%s1887_s28 + $0xc0] ss:$16 sps:$4 sm:$0xff]   ;;  %v1726_v53 = vld [vmem:[%s1887_s28 + $0xe4] ss:$16 sps:$4 sm:$0xff]  }
  0x1d   : > { %954 = vmatpush1.bf16.msra.mxu1 %v1672_v14  ;;  %v1725_v54 = vld [vmem:[%s1887_s28 + $0xa8] ss:$16 sps:$4 sm:$0xff]   ;;  %v1729_v55 = vld [vmem:[%s1887_s28 + $0xcc] ss:$16 sps:$4 sm:$0xff]   ;;  %v1728_v56 = vld [vmem:[%s1887_s28 + $0xe0] ss:$16 sps:$4 sm:$0xff]  }
  0x1e   : > { %955 = vmatprep.subr.bf16.mxu1 %v1791_v1  ;;  %1548 = vmatpush3.bf16.msra.mxu0 %v1674_v15  ;;  %v1732_v57 = vld [vmem:[%s1887_s28 + $0x104] ss:$16 sps:$4 sm:$0xff]   ;;  %v1731_v58 = vld [vmem:[%s1887_s28 + $0xc8] ss:$16 sps:$4 sm:$0xff]   ;;  %v1735_v59 = vld [vmem:[%s1887_s28 + $0xec] ss:$16 sps:$4 sm:$0xff]  }
  0x1f   : > { %1549 = vmatprep.subr.bf16.mxu0 %v1676_v16  ;;  %v1734_v60 = vld [vmem:[%s1887_s28 + $0x100] ss:$16 sps:$4 sm:$0xff]   ;;  %v1738_v61 = vld [vmem:[%s1887_s28 + $0x124] ss:$16 sps:$4 sm:$0xff]   ;;  %v1737_v62 = vld [vmem:[%s1887_s28 + $0xe8] ss:$16 sps:$4 sm:$0xff]  }
  0x20   : > { %v1741_v63 = vld [vmem:[%s1887_s28 + $0x10c] ss:$16 sps:$4 sm:$0xff]   ;;  %v1740_v0 = vld [vmem:[%s1887_s28 + $0x120] ss:$16 sps:$4 sm:$0xff]   ;;  %v1743_v2 = vld [vmem:[%s1887_s28 + $0x108] ss:$16 sps:$4 sm:$0xff]  }
  0x21   : > { %956 = vmatpush1.bf16.msra.mxu1 %v1675_v17  ;;  %v1747_v3 = vld [vmem:[%s1887_s28 + $0x12c] ss:$16 sps:$4 sm:$0xff]   ;;  %v1746_v4 = vld [vmem:[%s1887_s28 + $0x140] ss:$16 sps:$4 sm:$0xff]   ;;  %v1750_v5 = vld [vmem:[%s1887_s28 + $0x164] ss:$16 sps:$4 sm:$0xff]  }
  0x22   : > { %957 = vmatprep.subr.bf16.mxu1 %v1791_v1  ;;  %1550 = vmatpush3.bf16.msra.mxu0 %v1677_v18  ;;  %v1749_v6 = vld [vmem:[%s1887_s28 + $0x128] ss:$16 sps:$4 sm:$0xff]   ;;  %v1753_v7 = vld [vmem:[%s1887_s28 + $0x14c] ss:$16 sps:$4 sm:$0xff]   ;;  %v1752_v8 = vld [vmem:[%s1887_s28 + $0x160] ss:$16 sps:$4 sm:$0xff]  }
  0x23   : > { %1551 = vmatprep.subr.bf16.mxu0 %v1679_v19  ;;  %v1756_v9 = vld [vmem:[%s1887_s28 + $0x184] ss:$16 sps:$4 sm:$0xff]   ;;  %v1755_v10 = vld [vmem:[%s1887_s28 + $0x148] ss:$16 sps:$4 sm:$0xff]   ;;  %v1759_v11 = vld [vmem:[%s1887_s28 + $0x16c] ss:$16 sps:$4 sm:$0xff]  }
  0x24   : > { %v1758_v12 = vld [vmem:[%s1887_s28 + $0x180] ss:$16 sps:$4 sm:$0xff]   ;;  %v1762_v13 = vld [vmem:[%s1887_s28 + $0x1a4] ss:$16 sps:$4 sm:$0xff]   ;;  %v1761_v14 = vld [vmem:[%s1887_s28 + $0x168] ss:$16 sps:$4 sm:$0xff]  }
  0x25   : > { %958 = vmatpush1.bf16.msra.mxu1 %v1678_v20  ;;  %v1765_v15 = vld [vmem:[%s1887_s28 + $0x18c] ss:$16 sps:$4 sm:$0xff]   ;;  %v1764_v16 = vld [vmem:[%s1887_s28 + $0x1a0] ss:$16 sps:$4 sm:$0xff]   ;;  %v1768_v17 = vld [vmem:[%s1887_s28 + $0x1c4] ss:$16 sps:$4 sm:$0xff]  }
  0x26   : > { %959 = vmatprep.subr.bf16.mxu1 %v1791_v1  ;;  %1552 = vmatpush3.bf16.msra.mxu0 %v1680_v21  ;;  %v1767_v18 = vld [vmem:[%s1887_s28 + $0x188] ss:$16 sps:$4 sm:$0xff]   ;;  %v1771_v19 = vld [vmem:[%s1887_s28 + $0x1ac] ss:$16 sps:$4 sm:$0xff]   ;;  %v1770_v20 = vld [vmem:[%s1887_s28 + $0x1c0] ss:$16 sps:$4 sm:$0xff]  }
  0x27   : > { %1553 = vmatprep.subr.bf16.mxu0 %v1682_v22  ;;  %v1774_v21 = vld [vmem:[%s1887_s28 + $0x1e4] ss:$16 sps:$4 sm:$0xff]   ;;  %v1773_v22 = vld [vmem:[%s1887_s28 + $0x1a8] ss:$16 sps:$4 sm:$0xff]   ;;  %v1777_v23 = vld [vmem:[%s1887_s28 + $0x1cc] ss:$16 sps:$4 sm:$0xff]  }
  0x28   : > { %v1782_v27 = vld [vmem:[%s1887_s28 + $0x1e8] ss:$16 sps:$4 sm:$0xff]  }
  0x29   : > { %960 = vmatpush1.bf16.msra.mxu1 %v1681_v24  ;;  %v1776_v24 = vld [vmem:[%s1887_s28 + $0x1e0] ss:$16 sps:$4 sm:$0xff]  }
  0x2a   : > { %971 = vmatprep.subr.bf16.mxu1 %v1791_v1  ;;  %1554 = vmatpush3.bf16.msra.mxu0 %v1683_v25  ;;  %v1779_v25 = vld [vmem:[%s1887_s28 + $0x1c8] ss:$16 sps:$4 sm:$0xff]  }
  0x2d   : > { %972 = vmatpush2.bf16.msra.mxu1 %v1687_v26  ;;  %817 = vmatmul.mubr.bf16.vlgmr.msra.gmra.mxu0 %v1684_v28  ;;  %v1780_v26 = vld [vmem:[%s1887_s28 + $0x1ec] ss:$16 sps:$4 sm:$0xff]  }
  0x2e   : > { %973 = vmatprep.subr.bf16.mxu1 %v1791_v1  ;;  %824 = vmatprep.mubr.bf16.mxu0 %v1689_v29 }
  0x31   : > { %974 = vmatpush2.bf16.msra.mxu1 %v1688_v30 }
  0x32   : > { %975 = vmatprep.subr.bf16.mxu1 %v1791_v1  ;;  %v1744_v1 = vld [vmem:[%s1887_s28 + $0x144] ss:$16 sps:$4 sm:$0xff]  }
  0x35   : > { %976 = vmatpush2.bf16.msra.mxu1 %v1691_v31  ;;  %825 = vmatmul.mubr.bf16.gmra.mxu0 %v1692_v32 }
  0x36   : > { %832 = vmatprep.mubr.bf16.mxu0 %v1696_v33 }
  0x38   : > { %978 = vmatmul.mubr.bf16.vlgmr.msra.gmra.mxu1 %v1693_v34 }
  0x39   : > { %1457 = vmatprep.mubr.msk.bf16.mxu1 %vm735_vm0, %v1699_v35 }
  0x3d   : > { %833 = vmatmul.mubr.bf16.gmra.mxu0 %v1698_v36 }
  0x3e   : > { %840 = vmatprep.mubr.bf16.mxu0 %v1702_v37 }
  0x40   : > { %986 = vmatmul.mubr.bf16.gmra.mxu1 %v1701_v38 }
  0x41   : > { %1458 = vmatprep.mubr.msk.bf16.mxu1 %vm735_vm0, %v1705_v39 }
  0x45   : > { %841 = vmatmul.mubr.bf16.gmra.mxu0 %v1704_v40 }
  0x46   : > { %848 = vmatprep.mubr.bf16.mxu0 %v1708_v41 }
  0x48   : > { %994 = vmatmul.mubr.bf16.gmra.mxu1 %v1707_v42 }
  0x49   : > { %1459 = vmatprep.mubr.msk.bf16.mxu1 %vm735_vm0, %v1711_v43 }
  0x4d   : > { %849 = vmatmul.mubr.bf16.gmra.mxu0 %v1710_v44 }
  0x4e   : > { %856 = vmatprep.mubr.bf16.mxu0 %v1714_v45 }
  0x50   : > { %1002 = vmatmul.mubr.bf16.gmra.mxu1 %v1713_v46 }
  0x51   : > { %1460 = vmatprep.mubr.msk.bf16.mxu1 %vm735_vm0, %v1717_v47 }
  0x55   : > { %857 = vmatmul.mubr.bf16.gmra.mxu0 %v1716_v48 }
  0x56   : > { %864 = vmatprep.mubr.bf16.mxu0 %v1720_v49 }
  0x58   : > { %1010 = vmatmul.mubr.bf16.gmra.mxu1 %v1719_v50 }
  0x59   : > { %1461 = vmatprep.mubr.msk.bf16.mxu1 %vm735_vm0, %v1723_v51 }
  0x5d   : > { %865 = vmatmul.mubr.bf16.gmra.mxu0 %v1722_v52 }
  0x5e   : > { %872 = vmatprep.mubr.bf16.mxu0 %v1726_v53 }
  0x60   : > { %1018 = vmatmul.mubr.bf16.gmra.mxu1 %v1725_v54 }
  0x61   : > { %1462 = vmatprep.mubr.msk.bf16.mxu1 %vm735_vm0, %v1729_v55 }
  0x65   : > { %873 = vmatmul.mubr.bf16.gmra.mxu0 %v1728_v56 }
  0x66   : > { %880 = vmatprep.mubr.bf16.mxu0 %v1732_v57 }
  0x68   : > { %1026 = vmatmul.mubr.bf16.gmra.mxu1 %v1731_v58 }
  0x69   : > { %1463 = vmatprep.mubr.msk.bf16.mxu1 %vm735_vm0, %v1735_v59 }
  0x6d   : > { %881 = vmatmul.mubr.bf16.gmra.mxu0 %v1734_v60 }
  0x6e   : > { %888 = vmatprep.mubr.bf16.mxu0 %v1738_v61 }
  0x70   : > { %1034 = vmatmul.mubr.bf16.gmra.mxu1 %v1737_v62 }
  0x71   : > { %1464 = vmatprep.mubr.msk.bf16.mxu1 %vm735_vm0, %v1741_v63 }
  0x75   : > { %889 = vmatmul.mubr.bf16.gmra.mxu0 %v1740_v0 }
  0x76   : > { %896 = vmatprep.mubr.bf16.mxu0 %v1744_v1 }
  0x78   : > { %1042 = vmatmul.mubr.bf16.gmra.mxu1 %v1743_v2 }
  0x79   : > { %1465 = vmatprep.mubr.msk.bf16.mxu1 %vm735_vm0, %v1747_v3 }
  0x7d   : > { %897 = vmatmul.mubr.bf16.gmra.mxu0 %v1746_v4 }
  0x7e   : > { %904 = vmatprep.mubr.bf16.mxu0 %v1750_v5 }
  0x80   : > { %1050 = vmatmul.mubr.bf16.gmra.mxu1 %v1749_v6 }
  0x81   : > { %1466 = vmatprep.mubr.msk.bf16.mxu1 %vm735_vm0, %v1753_v7 }
  0x85   : > { %905 = vmatmul.mubr.bf16.gmra.mxu0 %v1752_v8 }
  0x86   : > { %912 = vmatprep.mubr.bf16.mxu0 %v1756_v9 }
  0x88   : > { %1058 = vmatmul.mubr.bf16.gmra.mxu1 %v1755_v10 }
  0x89   : > { %1467 = vmatprep.mubr.msk.bf16.mxu1 %vm735_vm0, %v1759_v11 }
  0x8d   : > { %913 = vmatmul.mubr.bf16.gmra.mxu0 %v1758_v12 }
  0x8e   : > { %920 = vmatprep.mubr.bf16.mxu0 %v1762_v13 }
  0x90   : > { %1066 = vmatmul.mubr.bf16.gmra.mxu1 %v1761_v14 }
  0x91   : > { %1468 = vmatprep.mubr.msk.bf16.mxu1 %vm735_vm0, %v1765_v15 }
  0x95   : > { %921 = vmatmul.mubr.bf16.gmra.mxu0 %v1764_v16 }
  0x96   : > { %928 = vmatprep.mubr.bf16.mxu0 %v1768_v17 }
  0x98   : > { %1074 = vmatmul.mubr.bf16.gmra.mxu1 %v1767_v18 }
  0x99   : > { %1469 = vmatprep.mubr.msk.bf16.mxu1 %vm735_vm0, %v1771_v19 }
  0x9d   : > { %929 = vmatmul.mubr.bf16.gmra.mxu0 %v1770_v20 }
  0x9e   : > { %936 = vmatprep.mubr.bf16.mxu0 %v1774_v21 }
  0xa0   : > { %1082 = vmatmul.mubr.bf16.gmra.mxu1 %v1773_v22 }
  0xa1   : > { %1470 = vmatprep.mubr.msk.bf16.mxu1 %vm735_vm0, %v1777_v23 }
  0xa5   : > { %937 = vmatmul.mubr.bf16.gmra.mxu0 %v1776_v24 }
  0xa8   : > { %1090 = vmatmul.mubr.bf16.gmra.mxu1 %v1779_v25 }
  0xa9   : > { %1471 = vmatprep.mubr.msk.bf16.mxu1 %vm735_vm0, %v1780_v26 }
  0xb0   : > { %1098 = vmatmul.mubr.bf16.gmra.mxu1 %v1782_v27 }
  0xed   : > { %v1555_v28 = vpop.f32.mrf.mxu0 }
  0xef   : > { %v1556_v29 = vpop.f32.mrf.mxu0 }
  0xf0   : > { %v1557_v33 = vadd.f32 %v1556_v29, %v1555_v28 }
  0xf1   : > { %v1558_v30 = vpop.f32.mrf.mxu0 }
  0xf3   : > { %v1559_v31 = vpop.f32.mrf.mxu0 }
  0xf4   : > { %v1560_v39 = vadd.f32 %v1559_v31, %v1558_v30 }
  0xf5   : > { %v1561_v32 = vpop.f32.mrf.mxu0 }
  0xf7   : > { %v1562_v34 = vpop.f32.mrf.mxu0 }
  0xf8   : > { %v979_v35 = vpop.f32.mrf.mxu1  ;;  %v1563_v47 = vadd.f32 %v1562_v34, %v1561_v32 }
  0xf9   : > { %v980_v36 = vadd.f32 %v1557_v33, %v979_v35  ;;  %v1564_v37 = vpop.f32.mrf.mxu0 }
  0xfa   : > { %v981_v38 = vpop.f32.mrf.mxu1 }
  0xfb   : > { %v1106_v40 = vmax.f32 %v980_v36, 0.0  ;;  %v1565_v41 = vpop.f32.mrf.mxu0 }
  0xfc   : > { %v982_v42 = vpop.f32.mrf.mxu1  ;;  %v1566_v55 = vadd.f32 %v1565_v41, %v1564_v37 }
  0xfd   : > { %v1507_v43 = vpack.c.bf16 %v1106_v40, %v1106_v40  ;;  %v983_v44 = vadd.f32 %v1560_v39, %v982_v42  ;;  %v1567_v45 = vpop.f32.mrf.mxu0 }
  0xfe   : > { %v984_v46 = vpop.f32.mrf.mxu1 }
  0xff   : > { %1267 = vst.msk [vmem:[%s1999_s20] sm:$0xf] %vm1266_vm1, %v1507_v43  ;;  %v1107_v48 = vmax.f32 %v983_v44, 0.0  ;;  %v1568_v49 = vpop.f32.mrf.mxu0 }
 0x100   : > { %v987_v50 = vpop.f32.mrf.mxu1  ;;  %v1569_v63 = vadd.f32 %v1568_v49, %v1567_v45 }
 0x101   : > { %v1508_v51 = vpack.c.bf16 %v1107_v48, %v1107_v48  ;;  %v988_v52 = vadd.f32 %v1563_v47, %v987_v50  ;;  %v1570_v53 = vpop.f32.mrf.mxu0 }
 0x102   : > { %v989_v54 = vpop.f32.mrf.mxu1 }
 0x103   : > { %1268 = vst.msk [vmem:[%s1999_s20 + $0x4] sm:$0xf] %vm1266_vm1, %v1508_v51  ;;  %v1108_v56 = vmax.f32 %v988_v52, 0.0  ;;  %v1571_v57 = vpop.f32.mrf.mxu0 }
 0x104   : > { %v990_v58 = vpop.f32.mrf.mxu1  ;;  %v1572_v7 = vadd.f32 %v1571_v57, %v1570_v53 }
 0x105   : > { %v1509_v59 = vpack.c.bf16 %v1108_v56, %v1108_v56  ;;  %v991_v60 = vadd.f32 %v1566_v55, %v990_v58  ;;  %v1573_v61 = vpop.f32.mrf.mxu0 }
 0x106   : > { %v992_v62 = vpop.f32.mrf.mxu1 }
 0x107   : > { %1269 = vst.msk [vmem:[%s1999_s20 + $0x8] sm:$0xf] %vm1266_vm1, %v1509_v59  ;;  %v1109_v0 = vmax.f32 %v991_v60, 0.0  ;;  %v1574_v1 = vpop.f32.mrf.mxu0 }
 0x108   : > { %v995_v2 = vpop.f32.mrf.mxu1  ;;  %v1575_v15 = vadd.f32 %v1574_v1, %v1573_v61 }
 0x109   : > { %v1510_v3 = vpack.c.bf16 %v1109_v0, %v1109_v0  ;;  %v996_v4 = vadd.f32 %v1569_v63, %v995_v2  ;;  %v1576_v5 = vpop.f32.mrf.mxu0 }
 0x10a   : > { %v997_v6 = vpop.f32.mrf.mxu1 }
 0x10b   : > { %1270 = vst.msk [vmem:[%s1999_s20 + $0xc] sm:$0xf] %vm1266_vm1, %v1510_v3  ;;  %v1110_v8 = vmax.f32 %v996_v4, 0.0  ;;  %v1577_v9 = vpop.f32.mrf.mxu0 }
 0x10c   : > { %v998_v10 = vpop.f32.mrf.mxu1  ;;  %v1578_v23 = vadd.f32 %v1577_v9, %v1576_v5 }
 0x10d   : > { %v1511_v11 = vpack.c.bf16 %v1110_v8, %v1110_v8  ;;  %v999_v12 = vadd.f32 %v1572_v7, %v998_v10  ;;  %v1579_v13 = vpop.f32.mrf.mxu0 }
 0x10e   : > { %v1000_v14 = vpop.f32.mrf.mxu1 }
 0x10f   : > { %1271 = vst.msk [vmem:[%s1999_s20 + $0x10] sm:$0xf] %vm1266_vm1, %v1511_v11  ;;  %v1111_v16 = vmax.f32 %v999_v12, 0.0  ;;  %v1580_v17 = vpop.f32.mrf.mxu0 }
 0x110   : > { %v1003_v18 = vpop.f32.mrf.mxu1  ;;  %v1581_v31 = vadd.f32 %v1580_v17, %v1579_v13 }
 0x111   : > { %v1512_v19 = vpack.c.bf16 %v1111_v16, %v1111_v16  ;;  %v1004_v20 = vadd.f32 %v1575_v15, %v1003_v18  ;;  %v1582_v21 = vpop.f32.mrf.mxu0 }
 0x112   : > { %v1005_v22 = vpop.f32.mrf.mxu1 }
 0x113   : > { %1272 = vst.msk [vmem:[%s1999_s20 + $0x14] sm:$0xf] %vm1266_vm1, %v1512_v19  ;;  %v1112_v24 = vmax.f32 %v1004_v20, 0.0  ;;  %v1583_v25 = vpop.f32.mrf.mxu0 }
 0x114   : > { %v1006_v26 = vpop.f32.mrf.mxu1  ;;  %v1584_v39 = vadd.f32 %v1583_v25, %v1582_v21 }
 0x115   : > { %v1513_v27 = vpack.c.bf16 %v1112_v24, %v1112_v24  ;;  %v1007_v28 = vadd.f32 %v1578_v23, %v1006_v26  ;;  %v1585_v29 = vpop.f32.mrf.mxu0 }
 0x116   : > { %v1008_v30 = vpop.f32.mrf.mxu1 }
 0x117   : > { %1273 = vst.msk [vmem:[%s1999_s20 + $0x18] sm:$0xf] %vm1266_vm1, %v1513_v27  ;;  %v1113_v32 = vmax.f32 %v1007_v28, 0.0  ;;  %v1586_v33 = vpop.f32.mrf.mxu0 }
 0x118   : > { %v1011_v34 = vpop.f32.mrf.mxu1  ;;  %v1587_v47 = vadd.f32 %v1586_v33, %v1585_v29 }
 0x119   : > { %v1514_v35 = vpack.c.bf16 %v1113_v32, %v1113_v32  ;;  %v1012_v36 = vadd.f32 %v1581_v31, %v1011_v34  ;;  %v1588_v37 = vpop.f32.mrf.mxu0 }
 0x11a   : > { %v1013_v38 = vpop.f32.mrf.mxu1 }
 0x11b   : > { %1274 = vst.msk [vmem:[%s1999_s20 + $0x1c] sm:$0xf] %vm1266_vm1, %v1514_v35  ;;  %v1114_v40 = vmax.f32 %v1012_v36, 0.0  ;;  %v1589_v41 = vpop.f32.mrf.mxu0 }
 0x11c   : > { %v1014_v42 = vpop.f32.mrf.mxu1  ;;  %v1590_v55 = vadd.f32 %v1589_v41, %v1588_v37 }
 0x11d   : > { %v1515_v43 = vpack.c.bf16 %v1114_v40, %v1114_v40  ;;  %v1015_v44 = vadd.f32 %v1584_v39, %v1014_v42  ;;  %v1591_v45 = vpop.f32.mrf.mxu0 }
 0x11e   : > { %v1016_v46 = vpop.f32.mrf.mxu1 }
 0x11f   : > { %1275 = vst.msk [vmem:[%s1999_s20 + $0x20] sm:$0xf] %vm1266_vm1, %v1515_v43  ;;  %v1115_v48 = vmax.f32 %v1015_v44, 0.0  ;;  %v1592_v49 = vpop.f32.mrf.mxu0 }
 0x120   : > { %v1019_v50 = vpop.f32.mrf.mxu1  ;;  %v1593_v63 = vadd.f32 %v1592_v49, %v1591_v45 }
 0x121   : > { %v1516_v51 = vpack.c.bf16 %v1115_v48, %v1115_v48  ;;  %v1020_v52 = vadd.f32 %v1587_v47, %v1019_v50  ;;  %v1594_v53 = vpop.f32.mrf.mxu0 }
 0x122   : > { %v1021_v54 = vpop.f32.mrf.mxu1 }
 0x123   : > { %1276 = vst.msk [vmem:[%s1999_s20 + $0x24] sm:$0xf] %vm1266_vm1, %v1516_v51  ;;  %v1116_v56 = vmax.f32 %v1020_v52, 0.0  ;;  %v1595_v57 = vpop.f32.mrf.mxu0 }
 0x124   : > { %v1022_v58 = vpop.f32.mrf.mxu1  ;;  %v1596_v7 = vadd.f32 %v1595_v57, %v1594_v53 }
 0x125   : > { %v1517_v59 = vpack.c.bf16 %v1116_v56, %v1116_v56  ;;  %v1023_v60 = vadd.f32 %v1590_v55, %v1022_v58  ;;  %v1597_v61 = vpop.f32.mrf.mxu0 }
 0x126   : > { %v1024_v62 = vpop.f32.mrf.mxu1 }
 0x127   : > { %1277 = vst.msk [vmem:[%s1999_s20 + $0x28] sm:$0xf] %vm1266_vm1, %v1517_v59  ;;  %v1117_v0 = vmax.f32 %v1023_v60, 0.0  ;;  %v1598_v1 = vpop.f32.mrf.mxu0 }
 0x128   : > { %v1027_v2 = vpop.f32.mrf.mxu1  ;;  %v1599_v15 = vadd.f32 %v1598_v1, %v1597_v61 }
 0x129   : > { %v1518_v3 = vpack.c.bf16 %v1117_v0, %v1117_v0  ;;  %v1028_v4 = vadd.f32 %v1593_v63, %v1027_v2  ;;  %v1600_v5 = vpop.f32.mrf.mxu0 }
 0x12a   : > { %v1029_v6 = vpop.f32.mrf.mxu1 }
 0x12b   : > { %1278 = vst.msk [vmem:[%s1999_s20 + $0x2c] sm:$0xf] %vm1266_vm1, %v1518_v3  ;;  %v1118_v8 = vmax.f32 %v1028_v4, 0.0  ;;  %v1601_v9 = vpop.f32.mrf.mxu0 }
 0x12c   : > { %v1030_v10 = vpop.f32.mrf.mxu1  ;;  %v1602_v23 = vadd.f32 %v1601_v9, %v1600_v5 }
 0x12d   : > { %v1519_v11 = vpack.c.bf16 %v1118_v8, %v1118_v8  ;;  %v1031_v12 = vadd.f32 %v1596_v7, %v1030_v10  ;;  %v1603_v13 = vpop.f32.mrf.mxu0 }
 0x12e   : > { %v1032_v14 = vpop.f32.mrf.mxu1 }
 0x12f   : > { %1279 = vst.msk [vmem:[%s1999_s20 + $0x30] sm:$0xf] %vm1266_vm1, %v1519_v11  ;;  %v1119_v16 = vmax.f32 %v1031_v12, 0.0  ;;  %v1604_v17 = vpop.f32.mrf.mxu0 }
 0x130   : > { %v1035_v18 = vpop.f32.mrf.mxu1  ;;  %v1605_v31 = vadd.f32 %v1604_v17, %v1603_v13 }
 0x131   : > { %v1520_v19 = vpack.c.bf16 %v1119_v16, %v1119_v16  ;;  %v1036_v20 = vadd.f32 %v1599_v15, %v1035_v18  ;;  %v1606_v21 = vpop.f32.mrf.mxu0 }
 0x132   : > { %v1037_v22 = vpop.f32.mrf.mxu1 }
 0x133   : > { %1280 = vst.msk [vmem:[%s1999_s20 + $0x34] sm:$0xf] %vm1266_vm1, %v1520_v19  ;;  %v1120_v24 = vmax.f32 %v1036_v20, 0.0  ;;  %v1607_v25 = vpop.f32.mrf.mxu0 }
 0x134   : > { %v1038_v26 = vpop.f32.mrf.mxu1  ;;  %v1608_v39 = vadd.f32 %v1607_v25, %v1606_v21 }
 0x135   : > { %v1521_v27 = vpack.c.bf16 %v1120_v24, %v1120_v24  ;;  %v1039_v28 = vadd.f32 %v1602_v23, %v1038_v26  ;;  %v1609_v29 = vpop.f32.mrf.mxu0 }
 0x136   : > { %v1040_v30 = vpop.f32.mrf.mxu1 }
 0x137   : > { %1281 = vst.msk [vmem:[%s1999_s20 + $0x38] sm:$0xf] %vm1266_vm1, %v1521_v27  ;;  %v1121_v32 = vmax.f32 %v1039_v28, 0.0  ;;  %v1610_v33 = vpop.f32.mrf.mxu0 }
 0x138   : > { %v1043_v34 = vpop.f32.mrf.mxu1  ;;  %v1611_v47 = vadd.f32 %v1610_v33, %v1609_v29 }
 0x139   : > { %v1522_v35 = vpack.c.bf16 %v1121_v32, %v1121_v32  ;;  %v1044_v36 = vadd.f32 %v1605_v31, %v1043_v34  ;;  %v1612_v37 = vpop.f32.mrf.mxu0 }
 0x13a   : > { %v1045_v38 = vpop.f32.mrf.mxu1 }
 0x13b   : > { %1282 = vst.msk [vmem:[%s1999_s20 + $0x3c] sm:$0xf] %vm1266_vm1, %v1522_v35  ;;  %v1122_v40 = vmax.f32 %v1044_v36, 0.0  ;;  %v1613_v41 = vpop.f32.mrf.mxu0 }
 0x13c   : > { %v1046_v42 = vpop.f32.mrf.mxu1  ;;  %v1614_v55 = vadd.f32 %v1613_v41, %v1612_v37 }
 0x13d   : > { %v1523_v43 = vpack.c.bf16 %v1122_v40, %v1122_v40  ;;  %v1047_v44 = vadd.f32 %v1608_v39, %v1046_v42  ;;  %v1615_v45 = vpop.f32.mrf.mxu0 }
 0x13e   : > { %v1048_v46 = vpop.f32.mrf.mxu1 }
 0x13f   : > { %1283 = vst.msk [vmem:[%s1999_s20 + $0x40] sm:$0xf] %vm1266_vm1, %v1523_v43  ;;  %v1123_v48 = vmax.f32 %v1047_v44, 0.0  ;;  %v1616_v49 = vpop.f32.mrf.mxu0 }
 0x140   : > { %v1051_v50 = vpop.f32.mrf.mxu1  ;;  %v1617_v63 = vadd.f32 %v1616_v49, %v1615_v45 }
 0x141   : > { %v1524_v51 = vpack.c.bf16 %v1123_v48, %v1123_v48  ;;  %v1052_v52 = vadd.f32 %v1611_v47, %v1051_v50  ;;  %v1618_v53 = vpop.f32.mrf.mxu0 }
 0x142   : > { %v1053_v54 = vpop.f32.mrf.mxu1 }
 0x143   : > { %1284 = vst.msk [vmem:[%s1999_s20 + $0x44] sm:$0xf] %vm1266_vm1, %v1524_v51  ;;  %v1124_v56 = vmax.f32 %v1052_v52, 0.0  ;;  %v1619_v57 = vpop.f32.mrf.mxu0 }
 0x144   : > { %v1054_v58 = vpop.f32.mrf.mxu1  ;;  %v1620_v7 = vadd.f32 %v1619_v57, %v1618_v53 }
 0x145   : > { %v1525_v59 = vpack.c.bf16 %v1124_v56, %v1124_v56  ;;  %v1055_v60 = vadd.f32 %v1614_v55, %v1054_v58  ;;  %v1621_v61 = vpop.f32.mrf.mxu0 }
 0x146   : > { %v1056_v62 = vpop.f32.mrf.mxu1 }
 0x147   : > { %1285 = vst.msk [vmem:[%s1999_s20 + $0x48] sm:$0xf] %vm1266_vm1, %v1525_v59  ;;  %v1125_v0 = vmax.f32 %v1055_v60, 0.0  ;;  %v1622_v1 = vpop.f32.mrf.mxu0 }
 0x148   : > { %v1059_v2 = vpop.f32.mrf.mxu1  ;;  %v1623_v15 = vadd.f32 %v1622_v1, %v1621_v61 }
 0x149   : > { %v1526_v3 = vpack.c.bf16 %v1125_v0, %v1125_v0  ;;  %v1060_v4 = vadd.f32 %v1617_v63, %v1059_v2  ;;  %v1624_v5 = vpop.f32.mrf.mxu0 }
 0x14a   : > { %v1061_v6 = vpop.f32.mrf.mxu1 }
 0x14b   : > { %1286 = vst.msk [vmem:[%s1999_s20 + $0x4c] sm:$0xf] %vm1266_vm1, %v1526_v3  ;;  %v1126_v8 = vmax.f32 %v1060_v4, 0.0  ;;  %v1625_v9 = vpop.f32.mrf.mxu0 }
 0x14c   : > { %v1062_v10 = vpop.f32.mrf.mxu1  ;;  %v1626_v23 = vadd.f32 %v1625_v9, %v1624_v5 }
 0x14d   : > { %v1527_v11 = vpack.c.bf16 %v1126_v8, %v1126_v8  ;;  %v1063_v12 = vadd.f32 %v1620_v7, %v1062_v10  ;;  %v1627_v13 = vpop.f32.mrf.mxu0 }
 0x14e   : > { %v1064_v14 = vpop.f32.mrf.mxu1 }
 0x14f   : > { %1287 = vst.msk [vmem:[%s1999_s20 + $0x50] sm:$0xf] %vm1266_vm1, %v1527_v11  ;;  %v1127_v16 = vmax.f32 %v1063_v12, 0.0  ;;  %v1628_v17 = vpop.f32.mrf.mxu0 }
 0x150   : > { %v1067_v18 = vpop.f32.mrf.mxu1  ;;  %v1629_v31 = vadd.f32 %v1628_v17, %v1627_v13 }
 0x151   : > { %v1528_v19 = vpack.c.bf16 %v1127_v16, %v1127_v16  ;;  %v1068_v20 = vadd.f32 %v1623_v15, %v1067_v18  ;;  %v1630_v21 = vpop.f32.mrf.mxu0 }
 0x152   : > { %v1069_v22 = vpop.f32.mrf.mxu1 }
 0x153   : > { %1288 = vst.msk [vmem:[%s1999_s20 + $0x54] sm:$0xf] %vm1266_vm1, %v1528_v19  ;;  %v1128_v24 = vmax.f32 %v1068_v20, 0.0  ;;  %v1631_v25 = vpop.f32.mrf.mxu0 }
 0x154   : > { %v1070_v26 = vpop.f32.mrf.mxu1  ;;  %v1632_v39 = vadd.f32 %v1631_v25, %v1630_v21 }
 0x155   : > { %v1529_v27 = vpack.c.bf16 %v1128_v24, %v1128_v24  ;;  %v1071_v28 = vadd.f32 %v1626_v23, %v1070_v26  ;;  %v1633_v29 = vpop.f32.mrf.mxu0 }
 0x156   : > { %v1072_v30 = vpop.f32.mrf.mxu1 }
 0x157   : > { %1289 = vst.msk [vmem:[%s1999_s20 + $0x58] sm:$0xf] %vm1266_vm1, %v1529_v27  ;;  %v1129_v32 = vmax.f32 %v1071_v28, 0.0  ;;  %v1634_v33 = vpop.f32.mrf.mxu0 }
 0x158   : > { %v1075_v34 = vpop.f32.mrf.mxu1  ;;  %v1635_v47 = vadd.f32 %v1634_v33, %v1633_v29 }
 0x159   : > { %v1530_v35 = vpack.c.bf16 %v1129_v32, %v1129_v32  ;;  %v1076_v36 = vadd.f32 %v1629_v31, %v1075_v34  ;;  %v1636_v37 = vpop.f32.mrf.mxu0 }
 0x15a   : > { %v1077_v38 = vpop.f32.mrf.mxu1 }
 0x15b   : > { %1290 = vst.msk [vmem:[%s1999_s20 + $0x5c] sm:$0xf] %vm1266_vm1, %v1530_v35  ;;  %v1130_v40 = vmax.f32 %v1076_v36, 0.0  ;;  %v1637_v41 = vpop.f32.mrf.mxu0 }
 0x15c   : > { %v1078_v42 = vpop.f32.mrf.mxu1  ;;  %v1638_v55 = vadd.f32 %v1637_v41, %v1636_v37 }
 0x15d   : > { %v1531_v43 = vpack.c.bf16 %v1130_v40, %v1130_v40  ;;  %v1079_v44 = vadd.f32 %v1632_v39, %v1078_v42  ;;  %v1639_v45 = vpop.f32.mrf.mxu0 }
 0x15e   : > { %v1080_v46 = vpop.f32.mrf.mxu1 }
 0x15f   : > { %1291 = vst.msk [vmem:[%s1999_s20 + $0x60] sm:$0xf] %vm1266_vm1, %v1531_v43  ;;  %v1131_v48 = vmax.f32 %v1079_v44, 0.0  ;;  %v1640_v49 = vpop.f32.mrf.mxu0 }
 0x160   : > { %v1083_v50 = vpop.f32.mrf.mxu1  ;;  %v1641_v63 = vadd.f32 %v1640_v49, %v1639_v45 }
 0x161   : > { %v1532_v51 = vpack.c.bf16 %v1131_v48, %v1131_v48  ;;  %v1084_v52 = vadd.f32 %v1635_v47, %v1083_v50  ;;  %v1642_v53 = vpop.f32.mrf.mxu0 }
 0x162   : > { %v1085_v54 = vpop.f32.mrf.mxu1 }
 0x163   : > { %1292 = vst.msk [vmem:[%s1999_s20 + $0x64] sm:$0xf] %vm1266_vm1, %v1532_v51  ;;  %v1132_v56 = vmax.f32 %v1084_v52, 0.0  ;;  %v1643_v57 = vpop.f32.mrf.mxu0 }
 0x164   : > { %v1086_v58 = vpop.f32.mrf.mxu1  ;;  %v1644_v6 = vadd.f32 %v1643_v57, %v1642_v53 }
 0x165   : > { %v1533_v59 = vpack.c.bf16 %v1132_v56, %v1132_v56  ;;  %v1087_v60 = vadd.f32 %v1638_v55, %v1086_v58  ;;  %v1645_v61 = vpop.f32.mrf.mxu0 }
 0x166   : > { %v1088_v62 = vpop.f32.mrf.mxu1 }
 0x167   : > { %1293 = vst.msk [vmem:[%s1999_s20 + $0x68] sm:$0xf] %vm1266_vm1, %v1533_v59  ;;  %v1133_v0 = vmax.f32 %v1087_v60, 0.0  ;;  %v1646_v1 = vpop.f32.mrf.mxu0 }
 0x168   : > { %v1091_v2 = vpop.f32.mrf.mxu1  ;;  %v1647_v13 = vadd.f32 %v1646_v1, %v1645_v61 }
 0x169   : > { %v1534_v3 = vpack.c.bf16 %v1133_v0, %v1133_v0  ;;  %v1092_v4 = vadd.f32 %v1641_v63, %v1091_v2  ;;  %v1648_v8 = vpop.f32.mrf.mxu0 }
 0x16a   : > { %v1093_v5 = vpop.f32.mrf.mxu1 }
 0x16b   : > { %1294 = vst.msk [vmem:[%s1999_s20 + $0x6c] sm:$0xf] %vm1266_vm1, %v1534_v3  ;;  %v1134_v7 = vmax.f32 %v1092_v4, 0.0  ;;  %v1649_v15 = vpop.f32.mrf.mxu0 }
 0x16c   : > { %v1094_v9 = vpop.f32.mrf.mxu1  ;;  %v1650_v20 = vadd.f32 %v1649_v15, %v1648_v8 }
 0x16d   : > { %v1535_v10 = vpack.c.bf16 %v1134_v7, %v1134_v7  ;;  %v1095_v11 = vadd.f32 %v1644_v6, %v1094_v9 }
 0x16e   : > { %v1096_v12 = vpop.f32.mrf.mxu1 }
 0x16f   : > { %1295 = vst.msk [vmem:[%s1999_s20 + $0x70] sm:$0xf] %vm1266_vm1, %v1535_v10  ;;  %v1135_v14 = vmax.f32 %v1095_v11, 0.0 }
 0x170   : > { %v1099_v16 = vpop.f32.mrf.mxu1 }
 0x171   : > { %v1536_v17 = vpack.c.bf16 %v1135_v14, %v1135_v14  ;;  %v1100_v18 = vadd.f32 %v1647_v13, %v1099_v16 }
 0x172   : > { %v1101_v19 = vpop.f32.mrf.mxu1 }
 0x173   : > { %1296 = vst.msk [vmem:[%s1999_s20 + $0x74] sm:$0xf] %vm1266_vm1, %v1536_v17  ;;  %v1136_v21 = vmax.f32 %v1100_v18, 0.0 }
 0x174   : > { %v1102_v22 = vpop.f32.mrf.mxu1 }
 0x175   : > { %v1537_v23 = vpack.c.bf16 %v1136_v21, %v1136_v21  ;;  %v1103_v24 = vadd.f32 %v1650_v20, %v1102_v22 }
 0x176   : > { %v1104_v25 = vpop.f32.mrf.mxu1 }
 0x177   : > { %1297 = vst.msk [vmem:[%s1999_s20 + $0x78] sm:$0xf] %vm1266_vm1, %v1537_v23  ;;  %v1137_v26 = vmax.f32 %v1103_v24, 0.0 }
 0x179   : > { %v1538_v27 = vpack.c.bf16 %v1137_v26, %v1137_v26 }
 0x17b   : > { %1298 = vst.msk [vmem:[%s1999_s20 + $0x7c] sm:$0xf] %vm1266_vm1, %v1538_v27 }
 0x17c PF: > { %s12_s9 = sadd.s32 1, %s1789_s9  }
 0x17d   : > { %p9_p4 = scmp.ge.s32.totalorder %s12_s9, 10  }
 0x17f   :  { %11 = sbr.rel (!%p9_p4) target bundleno = 1 (0x1), region = 58 }

// kernel: voxel_backbone8x_forward.15
= control target key start
LH: loop header
LB: loop body
LE: loop exit
PB: predicated region body
PF: predicated region fallthrough
CT: control target
= control target key end

     0   :  { %s3111_s9 = smov 0   ;;  %s3744_s0 = inlined_call_operand.vmem [shape: bf16[896,32], index: 0, kind: input, shape index: {}]   ;;  %s3745_s1 = inlined_call_operand.vmem [shape: bf16[2048,896], index: 1, kind: input, shape index: {}]   ;;  %s3746_s2 = inlined_call_operand.vmem [shape: bf16[2048,32], index: 2, kind: output, shape index: {}]  }
   0x1 LB: > { %s2196_s10 = sadd.s32 4294967295, %s3094_s9   ;;  %p2200_p0 = scmp.ge.s32.totalorder %s3094_s9, 1  ;;  %s3094_s9 = sphi %s3111_s9, %s12_s9  }
   0x2   : > { %p114_p1 = scmp.lt.s32.totalorder %s3094_s9, 9 }
   0x4   : > { %p115_p2 = pnand %p2200_p0, %p114_p1 }
   0x6   : > { %118 = sbr.rel (%p115_p2) target bundleno = 470 (0x1d6), region = 28 }
   0xb   : > { %v2872_v0 = vld [vmem:[%s3744_s0 + $0x78] sm:$0xff]   ;;  %s2201_s13 = sshll.u32 %s2196_s10, 5  ;;  %v2874_v2 = vld [vmem:[%s3744_s0 + $0x70] sm:$0xff]   ;;  %v2876_v4 = vld [vmem:[%s3744_s0 + $0x68] sm:$0xff]   ;;  %vm2107_vm0 = vcmask 257024  }
   0xc   : > { %v2873_v1 = vld [vmem:[%s3744_s0 + $0x38] sm:$0xff]   ;;  %2439 = vmatprep.subr.bf16.mxu0 %v2872_v0  ;;  %2847 = vmatprep.subr.bf16.mxu1 %v2872_v0  ;;  %p138_p3 = scmp.lt.s32.totalorder %s2201_s13, 255  ;;  %v2875_v3 = vld [vmem:[%s3744_s0 + $0x30] sm:$0xff]   ;;  %v2877_v5 = vld [vmem:[%s3744_s0 + $0x28] sm:$0xff]  }
   0xd   : > { %2440 = vmatpush3.bf16.msra.mxu0 %v2873_v1  ;;  %2855 = vmatpush3.bf16.msra.mxu1 %v2873_v1  ;;  %v2878_v6 = vld [vmem:[%s3744_s0 + $0x60] sm:$0xff]   ;;  %v2880_v8 = vld [vmem:[%s3744_s0 + $0x58] sm:$0xff]   ;;  %v2882_v10 = vld [vmem:[%s3744_s0 + $0x50] sm:$0xff]  }
   0xe   : > { %2441 = vmatprep.subr.bf16.mxu0 %v2874_v2  ;;  %2848 = vmatprep.subr.bf16.mxu1 %v2874_v2  ;;  %s3770_s13 = smov (!%p138_p3, %s2201_s13), 255  ;;  %v2879_v7 = vld [vmem:[%s3744_s0 + $0x20] sm:$0xff]   ;;  %v2881_v9 = vld [vmem:[%s3744_s0 + $0x18] sm:$0xff]   ;;  %v2883_v13 = vld [vmem:[%s3744_s0 + $0x10] sm:$0xff]  }
   0xf   : > { %s2863_s26 = smul.u32 28, %s3770_s13  ;;  %v2884_v14 = vld [vmem:[%s3744_s0 + $0x48] sm:$0xff]   ;;  %v2886_v16 = vld [vmem:[%s3744_s0 + $0x40] sm:$0xff]   ;;  %v2894_v18 = vld [vmem:[%s3744_s0 + $0xf8] sm:$0xff]  }
  0x10   : > { %v2885_v15 = vld [vmem:[%s3744_s0 + $0x8] sm:$0xff]   ;;  %v2887_v17 = vld [vmem:[%s3744_s0] sm:$0xff]   ;;  %v2895_v21 = vld [vmem:[%s3744_s0 + $0x178] sm:$0xff]  }
  0x11   : > { %2442 = vmatpush3.bf16.msra.mxu0 %v2875_v3  ;;  %2856 = vmatpush3.bf16.msra.mxu1 %v2875_v3  ;;  %s3152_s5 = scalar_lea.vmem %s3745_s1, %s2863_s26  ;;  %v2896_v22 = vld [vmem:[%s3744_s0 + $0xb8] sm:$0xff]   ;;  %v2898_v24 = vld [vmem:[%s3744_s0 + $0xf0] sm:$0xff]   ;;  %v2906_v32 = vld [vmem:[%s3744_s0 + $0xe8] sm:$0xff]  }
  0x12   : > { %2443 = vmatprep.subr.bf16.mxu0 %v2876_v4  ;;  %2849 = vmatprep.subr.bf16.mxu1 %v2876_v4  ;;  %v2890_v11 = vld [vmem:[%s3152_s5 + $0x4] ss:$28 sps:$4 sm:$0xff]   ;;  %v2897_v23 = vld [vmem:[%s3744_s0 + $0x138] sm:$0xff]   ;;  %v2909_v27 = vld [vmem:[%s3744_s0 + $0x170] sm:$0xff]  }
  0x13   : > { %v2893_v12 = vld [vmem:[%s3152_s5 + $0x2a4] ss:$28 sps:$4 sm:$0xff]   ;;  %1335 = vmatprep.mubr.bf16.mxu0 %v2890_v11  ;;  %v2900_v25 = vld [vmem:[%s3152_s5 + $0x3c] ss:$28 sps:$4 sm:$0xff]   ;;  %v2899_v28 = vld [vmem:[%s3744_s0 + $0xb0] sm:$0xff]  }
  0x14   : > { %1431 = vmatprep.mubr.bf16.mxu1 %v2893_v12  ;;  %v2888_v19 = vld [vmem:[%s3152_s5] ss:$28 sps:$4 sm:$0xff]   ;;  %v2911_v29 = vld [vmem:[%s3744_s0 + $0x130] sm:$0xff]   ;;  %v2907_v33 = vld [vmem:[%s3744_s0 + $0xa8] sm:$0xff]  }
  0x15   : > { %2444 = vmatpush3.bf16.msra.mxu0 %v2877_v5  ;;  %2857 = vmatpush3.bf16.msra.mxu1 %v2877_v5  ;;  %v2891_v20 = vld [vmem:[%s3152_s5 + $0x2a0] ss:$28 sps:$4 sm:$0xff]   ;;  %v2904_v30 = vld [vmem:[%s3152_s5 + $0x38] ss:$28 sps:$4 sm:$0xff]   ;;  %v2916_v39 = vld [vmem:[%s3152_s5 + $0x70] ss:$28 sps:$4 sm:$0xff]  }
  0x16   : > { %2445 = vmatprep.subr.bf16.mxu0 %v2878_v6  ;;  %2850 = vmatprep.subr.bf16.mxu1 %v2878_v6  ;;  %v2902_v26 = vld [vmem:[%s3152_s5 + $0x2dc] ss:$28 sps:$4 sm:$0xff]   ;;  %v2908_v34 = vld [vmem:[%s3744_s0 + $0xe0] sm:$0xff]   ;;  %v2912_v35 = vld [vmem:[%s3152_s5 + $0x74] ss:$28 sps:$4 sm:$0xff]  }
  0x17   : > { %v2905_v31 = vld [vmem:[%s3152_s5 + $0x2d8] ss:$28 sps:$4 sm:$0xff]   ;;  %v2910_v37 = vld [vmem:[%s3744_s0 + $0xa0] sm:$0xff]   ;;  %v2917_v40 = vld [vmem:[%s3152_s5 + $0x310] ss:$28 sps:$4 sm:$0xff]  }
  0x18   : > { %v2914_v36 = vld [vmem:[%s3152_s5 + $0x314] ss:$28 sps:$4 sm:$0xff]   ;;  %v2918_v38 = vld [vmem:[%s3744_s0 + $0xd8] sm:$0xff]   ;;  %v2929_v41 = vld [vmem:[%s3744_s0 + $0x168] sm:$0xff]  }
  0x19   : > { %2446 = vmatpush3.bf16.msra.mxu0 %v2879_v7  ;;  %2858 = vmatpush3.bf16.msra.mxu1 %v2879_v7  ;;  %v2919_v42 = vld [vmem:[%s3744_s0 + $0x98] sm:$0xff]   ;;  %v2920_v43 = vld [vmem:[%s3744_s0 + $0xd0] sm:$0xff]   ;;  %v2931_v44 = vld [vmem:[%s3744_s0 + $0x128] sm:$0xff]  }
  0x1a   : > { %2447 = vmatprep.subr.bf16.mxu0 %v2880_v8  ;;  %2851 = vmatprep.subr.bf16.mxu1 %v2880_v8  ;;  %v2922_v45 = vld [vmem:[%s3152_s5 + $0xac] ss:$28 sps:$4 sm:$0xff]   ;;  %v2921_v47 = vld [vmem:[%s3744_s0 + $0x90] sm:$0xff]   ;;  %v2940_v51 = vld [vmem:[%s3744_s0 + $0x160] sm:$0xff]  }
  0x1b   : > { %v2924_v46 = vld [vmem:[%s3152_s5 + $0x34c] ss:$28 sps:$4 sm:$0xff]   ;;  %v2942_v53 = vld [vmem:[%s3744_s0 + $0x120] sm:$0xff]   ;;  %v2941_v58 = vld [vmem:[%s3744_s0 + $0x1b8] sm:$0xff]  }
  0x1c   : > { %v2928_v48 = vld [vmem:[%s3744_s0 + $0xc8] sm:$0xff]   ;;  %v2934_v54 = vld [vmem:[%s3152_s5 + $0xe4] ss:$28 sps:$4 sm:$0xff]   ;;  %v2955_v60 = vld [vmem:[%s3744_s0 + $0x158] sm:$0xff]  }
  0x1d   : > { %2448 = vmatpush3.bf16.msra.mxu0 %v2881_v9  ;;  %2859 = vmatpush3.bf16.msra.mxu1 %v2881_v9  ;;  %v2926_v49 = vld [vmem:[%s3152_s5 + $0xa8] ss:$28 sps:$4 sm:$0xff]   ;;  %v2956_v61 = vld [vmem:[%s3744_s0 + $0x118] sm:$0xff]   ;;  %v2957_v1 = vld [vmem:[%s3744_s0 + $0x1b0] sm:$0xff]  }
  0x1e   : > { %2449 = vmatprep.subr.bf16.mxu0 %v2882_v10  ;;  %2852 = vmatprep.subr.bf16.mxu1 %v2882_v10  ;;  %v2927_v50 = vld [vmem:[%s3152_s5 + $0x348] ss:$28 sps:$4 sm:$0xff]   ;;  %v2939_v62 = vld [vmem:[%s3152_s5 + $0xe0] ss:$28 sps:$4 sm:$0xff]   ;;  %v2964_v2 = vld [vmem:[%s3744_s0 + $0x150] sm:$0xff]  }
  0x1f   : > { %v2930_v52 = vld [vmem:[%s3744_s0 + $0x88] sm:$0xff]   ;;  %v2932_v55 = vld [vmem:[%s3744_s0 + $0xc0] sm:$0xff]   ;;  %v2943_v63 = vld [vmem:[%s3152_s5 + $0x11c] ss:$28 sps:$4 sm:$0xff]  }
  0x20   : > { %v2938_v56 = vld [vmem:[%s3152_s5 + $0xc] ss:$28 sps:$4 sm:$0xff]   ;;  %v2933_v57 = vld [vmem:[%s3744_s0 + $0x80] sm:$0xff]   ;;  %v2965_v3 = vld [vmem:[%s3744_s0 + $0x110] sm:$0xff]  }
  0x21   : > { %2450 = vmatpush3.bf16.msra.mxu0 %v2883_v13  ;;  %2860 = vmatpush3.bf16.msra.mxu1 %v2883_v13  ;;  %v2936_v59 = vld [vmem:[%s3152_s5 + $0x8] ss:$28 sps:$4 sm:$0xff]   ;;  %v2947_v4 = vld [vmem:[%s3152_s5 + $0x118] ss:$28 sps:$4 sm:$0xff]   ;;  %v2948_v5 = vld [vmem:[%s3152_s5 + $0x40] ss:$28 sps:$4 sm:$0xff]  }
  0x22   : > { %2451 = vmatprep.subr.bf16.mxu0 %v2884_v14  ;;  %2853 = vmatprep.subr.bf16.mxu1 %v2884_v14  ;;  %v2945_v0 = vld [vmem:[%s3152_s5 + $0x44] ss:$28 sps:$4 sm:$0xff]   ;;  %v2949_v6 = vld [vmem:[%s3152_s5 + $0x154] ss:$28 sps:$4 sm:$0xff]   ;;  %v2972_v7 = vld [vmem:[%s3744_s0 + $0x1a8] sm:$0xff]  }
  0x23   : > { %v2951_v8 = vld [vmem:[%s3152_s5 + $0x7c] ss:$28 sps:$4 sm:$0xff]   ;;  %v2979_v9 = vld [vmem:[%s3744_s0 + $0x148] sm:$0xff]   ;;  %v2960_v14 = vld [vmem:[%s3152_s5 + $0xb4] ss:$28 sps:$4 sm:$0xff]  }
  0x24   : > { %v2980_v10 = vld [vmem:[%s3744_s0 + $0x108] sm:$0xff]   ;;  %v2954_v12 = vld [vmem:[%s3152_s5 + $0x78] ss:$28 sps:$4 sm:$0xff]  }
  0x25   : > { %2452 = vmatpush3.bf16.msra.mxu0 %v2885_v15  ;;  %2861 = vmatpush3.bf16.msra.mxu1 %v2885_v15  ;;  %v2953_v11 = vld [vmem:[%s3152_s5 + $0x150] ss:$28 sps:$4 sm:$0xff]   ;;  %v2987_v15 = vld [vmem:[%s3744_s0 + $0x140] sm:$0xff]  }
  0x26   : > { %2453 = vmatprep.subr.bf16.mxu0 %v2886_v16  ;;  %2854 = vmatprep.subr.bf16.mxu1 %v2886_v16  ;;  %v2958_v13 = vld [vmem:[%s3152_s5 + $0x18c] ss:$28 sps:$4 sm:$0xff]   ;;  %v2988_v16 = vld [vmem:[%s3744_s0 + $0x1a0] sm:$0xff]  }
  0x29   : > { %2454 = vmatpush3.bf16.msra.mxu0 %v2887_v17  ;;  %2862 = vmatpush3.bf16.msra.mxu1 %v2887_v17  ;;  %v2989_v17 = vld [vmem:[%s3744_s0 + $0x100] sm:$0xff]  }
  0x2a   : > { %2551 = vmatprep.subr.bf16.mxu1 %v2894_v18  ;;  %2663 = vmatprep.subr.bf16.mxu0 %v2895_v21  ;;  %v2962_v18 = vld [vmem:[%s3152_s5 + $0x188] ss:$28 sps:$4 sm:$0xff]  }
  0x2b   : > { %v2968_v21 = vld [vmem:[%s3152_s5 + $0xec] ss:$28 sps:$4 sm:$0xff]  }
  0x2c   : > { %1336 = vmatmul.mubr.bf16.vlgmr.msra.gmra.mxu0 %v2888_v19  ;;  %1432 = vmatmul.mubr.bf16.vlgmr.msra.gmra.mxu1 %v2891_v20  ;;  %v2963_v19 = vld [vmem:[%s3152_s5 + $0xb0] ss:$28 sps:$4 sm:$0xff]   ;;  %v2966_v20 = vld [vmem:[%s3152_s5 + $0x1c4] ss:$28 sps:$4 sm:$0xff]  }
  0x2d   : > { %2552 = vmatpush3.bf16.msra.mxu1 %v2896_v22  ;;  %2664 = vmatpush3.bf16.msra.mxu0 %v2897_v23  ;;  %v3002_v22 = vld [vmem:[%s3744_s0 + $0x198] sm:$0xff]  }
  0x2e   : > { %2553 = vmatprep.subr.bf16.mxu1 %v2898_v24  ;;  %1343 = vmatprep.mubr.bf16.mxu0 %v2900_v25  ;;  %v2970_v23 = vld [vmem:[%s3152_s5 + $0x1c0] ss:$28 sps:$4 sm:$0xff]   ;;  %v2971_v24 = vld [vmem:[%s3152_s5 + $0xe8] ss:$28 sps:$4 sm:$0xff]   ;;  %v3015_v25 = vld [vmem:[%s3744_s0 + $0x190] sm:$0xff]  }
  0x2f   : > { %1439 = vmatprep.mubr.bf16.mxu1 %v2902_v26  ;;  %2665 = vmatprep.subr.bf16.mxu0 %v2909_v27  ;;  %v2973_v26 = vld [vmem:[%s3152_s5 + $0x1fc] ss:$28 sps:$4 sm:$0xff]   ;;  %v2975_v27 = vld [vmem:[%s3152_s5 + $0x124] ss:$28 sps:$4 sm:$0xff]  }
  0x31   : > { %2554 = vmatpush3.bf16.msra.mxu1 %v2899_v28  ;;  %2666 = vmatpush3.bf16.msra.mxu0 %v2911_v29  ;;  %v3028_v28 = vld [vmem:[%s3744_s0 + $0x188] sm:$0xff]   ;;  %v2977_v29 = vld [vmem:[%s3152_s5 + $0x1f8] ss:$28 sps:$4 sm:$0xff]  }
  0x32   : > { %2555 = vmatprep.subr.bf16.mxu1 %v2906_v32  ;;  %2667 = vmatprep.subr.bf16.mxu0 %v2929_v41  ;;  %v2983_v32 = vld [vmem:[%s3152_s5 + $0x15c] ss:$28 sps:$4 sm:$0xff]   ;;  %v3000_v41 = vld [vmem:[%s3152_s5 + $0x14] ss:$28 sps:$4 sm:$0xff]  }
  0x34   : > { %1344 = vmatmul.mubr.bf16.gmra.mxu0 %v2904_v30  ;;  %1440 = vmatmul.mubr.bf16.gmra.mxu1 %v2905_v31  ;;  %v2978_v30 = vld [vmem:[%s3152_s5 + $0x120] ss:$28 sps:$4 sm:$0xff]   ;;  %v2981_v31 = vld [vmem:[%s3152_s5 + $0x234] ss:$28 sps:$4 sm:$0xff]  }
  0x35   : > { %2556 = vmatpush3.bf16.msra.mxu1 %v2907_v33  ;;  %1351 = vmatprep.mubr.bf16.mxu0 %v2912_v35  ;;  %v3041_v33 = vld [vmem:[%s3744_s0 + $0x180] sm:$0xff]   ;;  %v2986_v35 = vld [vmem:[%s3152_s5 + $0x158] ss:$28 sps:$4 sm:$0xff]  }
  0x36   : > { %2557 = vmatprep.subr.bf16.mxu1 %v2908_v34  ;;  %1447 = vmatprep.mubr.bf16.mxu1 %v2914_v36  ;;  %v2985_v34 = vld [vmem:[%s3152_s5 + $0x230] ss:$28 sps:$4 sm:$0xff]  }
  0x37   : > { %2668 = vmatpush3.bf16.msra.mxu0 %v2931_v44  ;;  %v2990_v36 = vld [vmem:[%s3152_s5 + $0x26c] ss:$28 sps:$4 sm:$0xff]   ;;  %v3003_v44 = vld [vmem:[%s3152_s5 + $0x204] ss:$28 sps:$4 sm:$0xff]  }
  0x38   : > { %2669 = vmatprep.subr.bf16.mxu0 %v2940_v51  ;;  %v3014_v51 = vld [vmem:[%s3152_s5 + $0x80] ss:$28 sps:$4 sm:$0xff]  }
  0x39   : > { %2558 = vmatpush3.bf16.msra.mxu1 %v2910_v37  ;;  %v2992_v37 = vld [vmem:[%s3152_s5 + $0x194] ss:$28 sps:$4 sm:$0xff]  }
  0x3a   : > { %2559 = vmatprep.subr.bf16.mxu1 %v2918_v38  ;;  %v2994_v38 = vld [vmem:[%s3152_s5 + $0x268] ss:$28 sps:$4 sm:$0xff]  }
  0x3b   : > { %2670 = vmatpush3.bf16.msra.mxu0 %v2942_v53  ;;  %v3018_v53 = vld [vmem:[%s3152_s5 + $0xbc] ss:$28 sps:$4 sm:$0xff]  }
  0x3c   : > { %1352 = vmatmul.mubr.bf16.gmra.mxu0 %v2916_v39  ;;  %1448 = vmatmul.mubr.bf16.gmra.mxu1 %v2917_v40  ;;  %v2995_v39 = vld [vmem:[%s3152_s5 + $0x190] ss:$28 sps:$4 sm:$0xff]  }
  0x3d   : > { %2560 = vmatpush3.bf16.msra.mxu1 %v2919_v42  ;;  %1359 = vmatprep.mubr.bf16.mxu0 %v2922_v45  ;;  %v2996_v40 = vld [vmem:[%s3152_s5 + $0x1cc] ss:$28 sps:$4 sm:$0xff]  }
  0x3e   : > { %2561 = vmatprep.subr.bf16.mxu1 %v2920_v43  ;;  %1455 = vmatprep.mubr.bf16.mxu1 %v2924_v46  ;;  %v2998_v42 = vld [vmem:[%s3152_s5 + $0x10] ss:$28 sps:$4 sm:$0xff]   ;;  %v3001_v43 = vld [vmem:[%s3152_s5 + $0x1c8] ss:$28 sps:$4 sm:$0xff]   ;;  %v3007_v46 = vld [vmem:[%s3152_s5 + $0x200] ss:$28 sps:$4 sm:$0xff]  }
  0x3f   : > { %2671 = vmatprep.subr.bf16.mxu0 %v2955_v60  ;;  %v3005_v45 = vld [vmem:[%s3152_s5 + $0x4c] ss:$28 sps:$4 sm:$0xff]   ;;  %v3029_v60 = vld [vmem:[%s3152_s5 + $0x2e4] ss:$28 sps:$4 sm:$0xff]  }
  0x40   : > { %2672 = vmatpush3.bf16.msra.mxu0 %v2956_v61  ;;  %v3031_v61 = vld [vmem:[%s3152_s5 + $0x12c] ss:$28 sps:$4 sm:$0xff]  }
  0x41   : > { %2562 = vmatpush3.bf16.msra.mxu1 %v2921_v47  ;;  %2673 = vmatprep.subr.bf16.mxu0 %v2964_v2  ;;  %v3008_v47 = vld [vmem:[%s3152_s5 + $0x48] ss:$28 sps:$4 sm:$0xff]   ;;  %v3039_v2 = vld [vmem:[%s3152_s5 + $0x318] ss:$28 sps:$4 sm:$0xff]  }
  0x42   : > { %2563 = vmatprep.subr.bf16.mxu1 %v2928_v48  ;;  %v3009_v48 = vld [vmem:[%s3152_s5 + $0x23c] ss:$28 sps:$4 sm:$0xff]  }
  0x44   : > { %1360 = vmatmul.mubr.bf16.gmra.mxu0 %v2926_v49  ;;  %1456 = vmatmul.mubr.bf16.gmra.mxu1 %v2927_v50  ;;  %v3011_v49 = vld [vmem:[%s3152_s5 + $0x84] ss:$28 sps:$4 sm:$0xff]   ;;  %v3013_v50 = vld [vmem:[%s3152_s5 + $0x238] ss:$28 sps:$4 sm:$0xff]  }
  0x45   : > { %2564 = vmatpush3.bf16.msra.mxu1 %v2930_v52  ;;  %1367 = vmatprep.mubr.bf16.mxu0 %v2934_v54  ;;  %v3016_v52 = vld [vmem:[%s3152_s5 + $0x274] ss:$28 sps:$4 sm:$0xff]  }
  0x46   : > { %2565 = vmatprep.subr.bf16.mxu1 %v2932_v55  ;;  %1496 = vmatprep.mubr.bf16.mxu1 %v2938_v56  ;;  %v3020_v54 = vld [vmem:[%s3152_s5 + $0x270] ss:$28 sps:$4 sm:$0xff]   ;;  %v3021_v55 = vld [vmem:[%s3152_s5 + $0xb8] ss:$28 sps:$4 sm:$0xff]  }
  0x47   : > { %2674 = vmatpush3.bf16.msra.mxu0 %v2965_v3  ;;  %v3022_v56 = vld [vmem:[%s3152_s5 + $0x2ac] ss:$28 sps:$4 sm:$0xff]   ;;  %v3040_v3 = vld [vmem:[%s3152_s5 + $0x160] ss:$28 sps:$4 sm:$0xff]  }
  0x48   : > { %2675 = vmatprep.subr.bf16.mxu0 %v2979_v9  ;;  %v3050_v9 = vld [vmem:[%s3152_s5 + $0x18] ss:$28 sps:$4 sm:$0xff]  }
  0x49   : > { %2566 = vmatpush3.bf16.msra.mxu1 %v2933_v57  ;;  %v3024_v57 = vld [vmem:[%s3152_s5 + $0xf4] ss:$28 sps:$4 sm:$0xff]  }
  0x4a   : > { %2799 = vmatprep.subr.bf16.mxu1 %v2941_v58 }
  0x4b   : > { %2676 = vmatpush3.bf16.msra.mxu0 %v2980_v10  ;;  %v3051_v10 = vld [vmem:[%s3152_s5 + $0x1d0] ss:$28 sps:$4 sm:$0xff]  }
  0x4c   : > { %1368 = vmatmul.mubr.bf16.gmra.mxu0 %v2939_v62  ;;  %1497 = vmatmul.mubr.bf16.vlgmr.msra.gmra.mxu1 %v2936_v59  ;;  %v3027_v59 = vld [vmem:[%s3152_s5 + $0xf0] ss:$28 sps:$4 sm:$0xff]   ;;  %v3033_v62 = vld [vmem:[%s3152_s5 + $0x2e0] ss:$28 sps:$4 sm:$0xff]  }
  0x4d   : > { %2800 = vmatpush3.bf16.msra.mxu1 %v2941_v58  ;;  %1375 = vmatprep.mubr.bf16.mxu0 %v2943_v63  ;;  %v3026_v58 = vld [vmem:[%s3152_s5 + $0x2a8] ss:$28 sps:$4 sm:$0xff]  }
  0x4e   : > { %1504 = vmatprep.mubr.bf16.mxu1 %v2945_v0  ;;  %2801 = vmatprep.subr.bf16.mxu1 %v2957_v1  ;;  %v3034_v63 = vld [vmem:[%s3152_s5 + $0x128] ss:$28 sps:$4 sm:$0xff]   ;;  %v3035_v0 = vld [vmem:[%s3152_s5 + $0x31c] ss:$28 sps:$4 sm:$0xff]  }
  0x4f   : > { %2677 = vmatprep.subr.bf16.mxu0 %v2987_v15  ;;  %v3057_v15 = vld [vmem:[%s3152_s5 + $0xc0] ss:$28 sps:$4 sm:$0xff]  }
  0x50   : > { %2678 = vmatpush3.bf16.msra.mxu0 %v2989_v17  ;;  %v3060_v17 = vld [vmem:[%s3152_s5 + $0xf8] ss:$28 sps:$4 sm:$0xff]  }
  0x51   : > { %2802 = vmatpush3.bf16.msra.mxu1 %v2957_v1  ;;  %v3037_v1 = vld [vmem:[%s3152_s5 + $0x164] ss:$28 sps:$4 sm:$0xff]  }
  0x52   : > { %2803 = vmatprep.subr.bf16.mxu1 %v2972_v7 }
  0x54   : > { %1376 = vmatmul.mubr.bf16.gmra.mxu0 %v2947_v4  ;;  %1505 = vmatmul.mubr.bf16.gmra.mxu1 %v2948_v5  ;;  %v3042_v4 = vld [vmem:[%s3152_s5 + $0x354] ss:$28 sps:$4 sm:$0xff]   ;;  %v3044_v5 = vld [vmem:[%s3152_s5 + $0x19c] ss:$28 sps:$4 sm:$0xff]  }
  0x55   : > { %1383 = vmatprep.mubr.bf16.mxu0 %v2949_v6  ;;  %1512 = vmatprep.mubr.bf16.mxu1 %v2951_v8  ;;  %v3046_v6 = vld [vmem:[%s3152_s5 + $0x350] ss:$28 sps:$4 sm:$0xff]  }
  0x56   : > { %2804 = vmatpush3.bf16.msra.mxu1 %v2972_v7  ;;  %v3047_v7 = vld [vmem:[%s3152_s5 + $0x198] ss:$28 sps:$4 sm:$0xff]  }
  0x57   : > { %2805 = vmatprep.subr.bf16.mxu1 %v2988_v16  ;;  %v3048_v8 = vld [vmem:[%s3152_s5 + $0x1d4] ss:$28 sps:$4 sm:$0xff]  }
  0x5a   : > { %2806 = vmatpush3.bf16.msra.mxu1 %v2988_v16  ;;  %v3058_v16 = vld [vmem:[%s3152_s5 + $0x244] ss:$28 sps:$4 sm:$0xff]  }
  0x5b   : > { %2807 = vmatprep.subr.bf16.mxu1 %v3002_v22 }
  0x5c   : > { %1384 = vmatmul.mubr.bf16.gmra.mxu0 %v2953_v11  ;;  %1513 = vmatmul.mubr.bf16.gmra.mxu1 %v2954_v12  ;;  %v3052_v11 = vld [vmem:[%s3152_s5 + $0x50] ss:$28 sps:$4 sm:$0xff]  }
  0x5d   : > { %1391 = vmatprep.mubr.bf16.mxu0 %v2958_v13  ;;  %1520 = vmatprep.mubr.bf16.mxu1 %v2960_v14  ;;  %v3053_v12 = vld [vmem:[%s3152_s5 + $0x20c] ss:$28 sps:$4 sm:$0xff]  }
  0x5e   : > { %2808 = vmatpush3.bf16.msra.mxu1 %v3002_v22  ;;  %v3055_v13 = vld [vmem:[%s3152_s5 + $0x88] ss:$28 sps:$4 sm:$0xff]   ;;  %v3066_v22 = vld [vmem:[%s3152_s5 + $0x278] ss:$28 sps:$4 sm:$0xff]  }
  0x5f   : > { %2809 = vmatprep.subr.bf16.mxu1 %v3015_v25  ;;  %v3056_v14 = vld [vmem:[%s3152_s5 + $0x208] ss:$28 sps:$4 sm:$0xff]  }
  0x62   : > { %2810 = vmatpush3.bf16.msra.mxu1 %v3015_v25  ;;  %v3070_v25 = vld [vmem:[%s3152_s5 + $0x1d8] ss:$28 sps:$4 sm:$0xff]  }
  0x63   : > { %2811 = vmatprep.subr.bf16.mxu1 %v3028_v28 }
  0x64   : > { %1392 = vmatmul.mubr.bf16.gmra.mxu0 %v2962_v18  ;;  %1521 = vmatmul.mubr.bf16.gmra.mxu1 %v2963_v19  ;;  %v3061_v18 = vld [vmem:[%s3152_s5 + $0x240] ss:$28 sps:$4 sm:$0xff]   ;;  %v3062_v19 = vld [vmem:[%s3152_s5 + $0x130] ss:$28 sps:$4 sm:$0xff]  }
  0x65   : > { %1399 = vmatprep.mubr.bf16.mxu0 %v2966_v20  ;;  %1528 = vmatprep.mubr.bf16.mxu1 %v2968_v21  ;;  %v3063_v20 = vld [vmem:[%s3152_s5 + $0x27c] ss:$28 sps:$4 sm:$0xff]   ;;  %v3065_v21 = vld [vmem:[%s3152_s5 + $0x168] ss:$28 sps:$4 sm:$0xff]  }
  0x66   : > { %2812 = vmatpush3.bf16.msra.mxu1 %v3028_v28  ;;  %v3073_v28 = vld [vmem:[%s3152_s5 + $0x2ec] ss:$28 sps:$4 sm:$0xff]  }
  0x67   : > { %2813 = vmatprep.subr.bf16.mxu1 %v3041_v33 }
  0x6a   : > { %2814 = vmatpush3.bf16.msra.mxu1 %v3041_v33 }
  0x6c   : > { %1400 = vmatmul.mubr.bf16.gmra.mxu0 %v2970_v23  ;;  %1529 = vmatmul.mubr.bf16.gmra.mxu1 %v2971_v24  ;;  %v3067_v23 = vld [vmem:[%s3152_s5 + $0x1a0] ss:$28 sps:$4 sm:$0xff]   ;;  %v3068_v24 = vld [vmem:[%s3152_s5 + $0x2b4] ss:$28 sps:$4 sm:$0xff]  }
  0x6d   : > { %1407 = vmatprep.mubr.bf16.mxu0 %v2973_v26  ;;  %1536 = vmatprep.mubr.bf16.mxu1 %v2975_v27  ;;  %v3071_v26 = vld [vmem:[%s3152_s5 + $0x2b0] ss:$28 sps:$4 sm:$0xff]  }
  0x6e   : > { %v3072_v27 = vld [vmem:[%s3152_s5 + $0x210] ss:$28 sps:$4 sm:$0xff]  }
  0x74   : > { %1408 = vmatmul.mubr.bf16.gmra.mxu0 %v2977_v29  ;;  %1537 = vmatmul.mubr.bf16.gmra.mxu1 %v2978_v30  ;;  %v3075_v29 = vld [vmem:[%s3152_s5 + $0x248] ss:$28 sps:$4 sm:$0xff]  }
  0x75   : > { %1415 = vmatprep.mubr.bf16.mxu0 %v2981_v31  ;;  %1544 = vmatprep.mubr.bf16.mxu1 %v2983_v32 }
  0x7c   : > { %1416 = vmatmul.mubr.bf16.gmra.mxu0 %v2985_v34  ;;  %1545 = vmatmul.mubr.bf16.gmra.mxu1 %v2986_v35 }
  0x7d   : > { %1423 = vmatprep.mubr.bf16.mxu0 %v2990_v36  ;;  %1552 = vmatprep.mubr.bf16.mxu1 %v2992_v37 }
  0x84   : > { %1424 = vmatmul.mubr.bf16.gmra.mxu0 %v2994_v38  ;;  %1553 = vmatmul.mubr.bf16.gmra.mxu1 %v2995_v39  ;;  %v3076_v38 = vld [vmem:[%s3152_s5 + $0x2e8] ss:$28 sps:$4 sm:$0xff]   ;;  %v3077_v39 = vld [vmem:[%s3152_s5 + $0x280] ss:$28 sps:$4 sm:$0xff]  }
  0x85   : > { %1560 = vmatprep.mubr.bf16.mxu1 %v2996_v40  ;;  %1657 = vmatprep.mubr.bf16.mxu0 %v3000_v41  ;;  %v3078_v40 = vld [vmem:[%s3152_s5 + $0x324] ss:$28 sps:$4 sm:$0xff]   ;;  %v3080_v41 = vld [vmem:[%s3152_s5 + $0x2b8] ss:$28 sps:$4 sm:$0xff]  }
  0x8c   : > { %1561 = vmatmul.mubr.bf16.gmra.mxu1 %v3001_v43  ;;  %1658 = vmatmul.mubr.bf16.vlgmr.msra.gmra.mxu0 %v2998_v42 }
  0x8d   : > { %1568 = vmatprep.mubr.bf16.mxu1 %v3003_v44  ;;  %1665 = vmatprep.mubr.bf16.mxu0 %v3005_v45 }
  0x94   : > { %1569 = vmatmul.mubr.bf16.gmra.mxu1 %v3007_v46  ;;  %1666 = vmatmul.mubr.bf16.gmra.mxu0 %v3008_v47 }
  0x95   : > { %1576 = vmatprep.mubr.bf16.mxu1 %v3009_v48  ;;  %1673 = vmatprep.mubr.bf16.mxu0 %v3011_v49 }
  0x9c   : > { %1577 = vmatmul.mubr.bf16.gmra.mxu1 %v3013_v50  ;;  %1674 = vmatmul.mubr.bf16.gmra.mxu0 %v3014_v51 }
  0x9d   : > { %1584 = vmatprep.mubr.bf16.mxu1 %v3016_v52  ;;  %1681 = vmatprep.mubr.bf16.mxu0 %v3018_v53 }
  0xa4   : > { %1585 = vmatmul.mubr.bf16.gmra.mxu1 %v3020_v54  ;;  %1682 = vmatmul.mubr.bf16.gmra.mxu0 %v3021_v55  ;;  %v3081_v54 = vld [vmem:[%s3152_s5 + $0x320] ss:$28 sps:$4 sm:$0xff]   ;;  %v3082_v55 = vld [vmem:[%s3152_s5 + $0x2f0] ss:$28 sps:$4 sm:$0xff]  }
  0xa5   : > { %1592 = vmatprep.mubr.bf16.mxu1 %v3022_v56  ;;  %1689 = vmatprep.mubr.bf16.mxu0 %v3024_v57  ;;  %v3083_v56 = vld [vmem:[%s3152_s5 + $0x35c] ss:$28 sps:$4 sm:$0xff]   ;;  %v3085_v57 = vld [vmem:[%s3152_s5 + $0x328] ss:$28 sps:$4 sm:$0xff]  }
  0xac   : > { %1593 = vmatmul.mubr.bf16.gmra.mxu1 %v3026_v58  ;;  %1690 = vmatmul.mubr.bf16.gmra.mxu0 %v3027_v59 }
  0xad   : > { %1600 = vmatprep.mubr.bf16.mxu1 %v3029_v60  ;;  %1697 = vmatprep.mubr.bf16.mxu0 %v3031_v61 }
  0xb4   : > { %1601 = vmatmul.mubr.bf16.gmra.mxu1 %v3033_v62  ;;  %1698 = vmatmul.mubr.bf16.gmra.mxu0 %v3034_v63 }
  0xb5   : > { %1608 = vmatprep.mubr.bf16.mxu1 %v3035_v0  ;;  %1705 = vmatprep.mubr.bf16.mxu0 %v3037_v1 }
  0xbc   : > { %1609 = vmatmul.mubr.bf16.gmra.mxu1 %v3039_v2  ;;  %1706 = vmatmul.mubr.bf16.gmra.mxu0 %v3040_v3 }
  0xbd   : > { %1616 = vmatprep.mubr.bf16.mxu1 %v3042_v4  ;;  %1713 = vmatprep.mubr.bf16.mxu0 %v3044_v5 }
  0xc4   : > { %1617 = vmatmul.mubr.bf16.gmra.mxu1 %v3046_v6  ;;  %1714 = vmatmul.mubr.bf16.gmra.mxu0 %v3047_v7  ;;  %v3086_v6 = vld [vmem:[%s3152_s5 + $0x358] ss:$28 sps:$4 sm:$0xff]   ;;  %v3087_v7 = vld [vmem:[%s3152_s5 + $0x360] ss:$28 sps:$4 sm:$0xff]   ;;  %s2204_s5 = sshll.u32 %s3770_s13, 2 }
  0xc5   : > { %1721 = vmatprep.mubr.bf16.mxu0 %v3048_v8  ;;  %2815 = vmatprep.mubr.bf16.mxu1 %v3050_v9  ;;  %s3592_s29 = scalar_lea.vmem %s3746_s2, %s2204_s5 }
  0xcc   : > { %1722 = vmatmul.mubr.bf16.gmra.mxu0 %v3051_v10  ;;  %2816 = vmatmul.mubr.bf16.vlgmr.msra.gmra.mxu1 %v3052_v11 }
  0xcd   : > { %1729 = vmatprep.mubr.bf16.mxu0 %v3053_v12  ;;  %2819 = vmatprep.mubr.bf16.mxu1 %v3055_v13 }
  0xd4   : > { %1730 = vmatmul.mubr.bf16.gmra.mxu0 %v3056_v14  ;;  %2820 = vmatmul.mubr.bf16.gmra.mxu1 %v3057_v15 }
  0xd5   : > { %1737 = vmatprep.mubr.bf16.mxu0 %v3058_v16  ;;  %2823 = vmatprep.mubr.bf16.mxu1 %v3060_v17 }
  0xdc   : > { %1738 = vmatmul.mubr.bf16.gmra.mxu0 %v3061_v18  ;;  %2824 = vmatmul.mubr.bf16.gmra.mxu1 %v3062_v19 }
  0xdd   : > { %1745 = vmatprep.mubr.bf16.mxu0 %v3063_v20  ;;  %2827 = vmatprep.mubr.bf16.mxu1 %v3065_v21 }
  0xe4   : > { %1746 = vmatmul.mubr.bf16.gmra.mxu0 %v3066_v22  ;;  %2828 = vmatmul.mubr.bf16.gmra.mxu1 %v3067_v23 }
  0xe5   : > { %1753 = vmatprep.mubr.bf16.mxu0 %v3068_v24  ;;  %2831 = vmatprep.mubr.bf16.mxu1 %v3070_v25 }
  0xec   : > { %v2455_v30 = vpop.f32.mrf.mxu0  ;;  %v2527_v31 = vpop.f32.mrf.mxu1  ;;  %1754 = vmatmul.mubr.bf16.gmra.mxu0 %v3071_v26  ;;  %2832 = vmatmul.mubr.bf16.gmra.mxu1 %v3072_v27 }
  0xed   : > { %1761 = vmatprep.mubr.bf16.mxu0 %v3073_v28  ;;  %2835 = vmatprep.mubr.bf16.mxu1 %v3075_v29 }
  0xee   : > { %v2456_v32 = vpop.f32.mrf.mxu0  ;;  %v2528_v33 = vpop.f32.mrf.mxu1 }
  0xef   : > { %v3397_v34 = vadd.f32 %v2456_v32, %v2455_v30  ;;  %v3399_v35 = vadd.f32 %v2528_v33, %v2527_v31 }
  0xf0   : > { %v2458_v36 = vpop.f32.mrf.mxu0  ;;  %v2530_v37 = vpop.f32.mrf.mxu1 }
  0xf2   : > { %v2459_v42 = vpop.f32.mrf.mxu0  ;;  %v2531_v43 = vpop.f32.mrf.mxu1 }
  0xf3   : > { %v3405_v44 = vadd.f32 %v2459_v42, %v2458_v36  ;;  %v3407_v45 = vadd.f32 %v2531_v43, %v2530_v37 }
  0xf4   : > { %v2461_v46 = vpop.f32.mrf.mxu0  ;;  %v2533_v47 = vpop.f32.mrf.mxu1  ;;  %1762 = vmatmul.mubr.bf16.gmra.mxu0 %v3076_v38  ;;  %2836 = vmatmul.mubr.bf16.gmra.mxu1 %v3077_v39 }
  0xf5   : > { %1769 = vmatprep.mubr.bf16.mxu0 %v3078_v40  ;;  %2839 = vmatprep.mubr.bf16.mxu1 %v3080_v41 }
  0xf6   : > { %v2462_v48 = vpop.f32.mrf.mxu0  ;;  %v2534_v49 = vpop.f32.mrf.mxu1 }
  0xf7   : > { %v3409_v50 = vadd.f32 %v2462_v48, %v2461_v46  ;;  %v3411_v51 = vadd.f32 %v2534_v49, %v2533_v47 }
  0xf8   : > { %v2464_v52 = vpop.f32.mrf.mxu0  ;;  %v2536_v53 = vpop.f32.mrf.mxu1 }
  0xfa   : > { %v2465_v58 = vpop.f32.mrf.mxu0  ;;  %v2537_v59 = vpop.f32.mrf.mxu1 }
  0xfb   : > { %v3417_v60 = vadd.f32 %v2465_v58, %v2464_v52  ;;  %v3419_v61 = vadd.f32 %v2537_v59, %v2536_v53 }
  0xfc   : > { %v2467_v62 = vpop.f32.mrf.mxu0  ;;  %v2539_v63 = vpop.f32.mrf.mxu1  ;;  %1770 = vmatmul.mubr.bf16.gmra.mxu0 %v3081_v54  ;;  %2840 = vmatmul.mubr.bf16.gmra.mxu1 %v3082_v55 }
  0xfd   : > { %1777 = vmatprep.mubr.bf16.mxu0 %v3083_v56  ;;  %2843 = vmatprep.mubr.bf16.mxu1 %v3085_v57 }
  0xfe   : > { %v2468_v0 = vpop.f32.mrf.mxu0  ;;  %v2540_v1 = vpop.f32.mrf.mxu1 }
  0xff   : > { %v2469_v2 = vadd.f32 %v2468_v0, %v2467_v62  ;;  %v3421_v3 = vadd.f32 %v2540_v1, %v2539_v63 }
 0x100   : > { %v2470_v4 = vpop.f32.mrf.mxu0  ;;  %v2542_v5 = vpop.f32.mrf.mxu1 }
 0x102   : > { %v2471_v8 = vpop.f32.mrf.mxu0  ;;  %v2543_v9 = vpop.f32.mrf.mxu1 }
 0x103   : > { %v2472_v10 = vadd.f32 %v2471_v8, %v2470_v4  ;;  %v3425_v11 = vadd.f32 %v2543_v9, %v2542_v5 }
 0x104   : > { %v2473_v12 = vpop.f32.mrf.mxu0  ;;  %v2545_v13 = vpop.f32.mrf.mxu1  ;;  %1778 = vmatmul.mubr.bf16.gmra.mxu0 %v3086_v6  ;;  %2844 = vmatmul.mubr.bf16.gmra.mxu1 %v3087_v7 }
 0x106   : > { %v2474_v14 = vpop.f32.mrf.mxu0  ;;  %v2546_v15 = vpop.f32.mrf.mxu1 }
 0x107   : > { %v2475_v16 = vadd.f32 %v2474_v14, %v2473_v12  ;;  %v3427_v17 = vadd.f32 %v2546_v15, %v2545_v13 }
 0x108   : > { %v2476_v18 = vpop.f32.mrf.mxu0  ;;  %v2548_v19 = vpop.f32.mrf.mxu1 }
 0x10a   : > { %v2477_v20 = vpop.f32.mrf.mxu0  ;;  %v2549_v21 = vpop.f32.mrf.mxu1 }
 0x10b   : > { %v2478_v22 = vadd.f32 %v2477_v20, %v2476_v18  ;;  %v3429_v23 = vadd.f32 %v2549_v21, %v2548_v19 }
 0x10c   : > { %v2479_v24 = vpop.f32.mrf.mxu0  ;;  %v2567_v25 = vpop.f32.mrf.mxu1 }
 0x10e   : > { %v2480_v26 = vpop.f32.mrf.mxu0  ;;  %v2568_v27 = vpop.f32.mrf.mxu1 }
 0x10f   : > { %v2481_v28 = vadd.f32 %v2480_v26, %v2479_v24  ;;  %v2569_v29 = vadd.f32 %v2568_v27, %v2567_v25 }
 0x110   : > { %v2482_v30 = vpop.f32.mrf.mxu0  ;;  %v2570_v31 = vpop.f32.mrf.mxu1 }
 0x111   : > { %v3432_v32 = vadd.f32 %v2569_v29, %v3397_v34 }
 0x112   : > { %v2483_v33 = vpop.f32.mrf.mxu0  ;;  %v2571_v36 = vpop.f32.mrf.mxu1 }
 0x113   : > { %v2484_v37 = vadd.f32 %v2483_v33, %v2482_v30  ;;  %v2572_v38 = vadd.f32 %v2571_v36, %v2570_v31 }
 0x114   : > { %v2485_v39 = vpop.f32.mrf.mxu0  ;;  %v2573_v40 = vpop.f32.mrf.mxu1 }
 0x115   : > { %v3435_v41 = vadd.f32 %v2572_v38, %v3405_v44 }
 0x116   : > { %v2486_v42 = vpop.f32.mrf.mxu0  ;;  %v2574_v43 = vpop.f32.mrf.mxu1 }
 0x117   : > { %v2487_v46 = vadd.f32 %v2486_v42, %v2485_v39  ;;  %v2575_v47 = vadd.f32 %v2574_v43, %v2573_v40 }
 0x118   : > { %v2488_v48 = vpop.f32.mrf.mxu0  ;;  %v2576_v49 = vpop.f32.mrf.mxu1 }
 0x119   : > { %v3438_v52 = vadd.f32 %v2575_v47, %v3409_v50 }
 0x11a   : > { %v2489_v34 = vpop.f32.mrf.mxu0  ;;  %v2577_v53 = vpop.f32.mrf.mxu1 }
 0x11b   : > { %v2490_v54 = vadd.f32 %v2489_v34, %v2488_v48  ;;  %v2578_v55 = vadd.f32 %v2577_v53, %v2576_v49 }
 0x11c   : > { %v2491_v56 = vpop.f32.mrf.mxu0  ;;  %v2579_v57 = vpop.f32.mrf.mxu1 }
 0x11d   : > { %v3441_v58 = vadd.f32 %v2578_v55, %v3417_v60 }
 0x11e   : > { %v2492_v44 = vpop.f32.mrf.mxu0  ;;  %v2580_v59 = vpop.f32.mrf.mxu1 }
 0x11f   : > { %v2493_v62 = vadd.f32 %v2492_v44, %v2491_v56  ;;  %v2581_v63 = vadd.f32 %v2580_v59, %v2579_v57 }
 0x120   : > { %v2494_v0 = vpop.f32.mrf.mxu0  ;;  %v2582_v1 = vpop.f32.mrf.mxu1 }
 0x121   : > { %v3443_v4 = vadd.f32 %v2581_v63, %v2469_v2 }
 0x122   : > { %v2495_v5 = vpop.f32.mrf.mxu0  ;;  %v2583_v50 = vpop.f32.mrf.mxu1 }
 0x123   : > { %v2496_v6 = vadd.f32 %v2495_v5, %v2494_v0  ;;  %v2584_v7 = vadd.f32 %v2583_v50, %v2582_v1 }
 0x124   : > { %v2497_v8 = vpop.f32.mrf.mxu0  ;;  %v2585_v9 = vpop.f32.mrf.mxu1 }
 0x125   : > { %v3445_v12 = vadd.f32 %v2584_v7, %v2472_v10 }
 0x126   : > { %v2498_v13 = vpop.f32.mrf.mxu0  ;;  %v2586_v14 = vpop.f32.mrf.mxu1 }
 0x127   : > { %v2499_v60 = vadd.f32 %v2498_v13, %v2497_v8  ;;  %v2587_v15 = vadd.f32 %v2586_v14, %v2585_v9 }
 0x128   : > { %v2500_v18 = vpop.f32.mrf.mxu0  ;;  %v2588_v19 = vpop.f32.mrf.mxu1 }
 0x129   : > { %v3447_v20 = vadd.f32 %v2587_v15, %v2475_v16 }
 0x12a   : > { %v2501_v21 = vpop.f32.mrf.mxu0  ;;  %v2589_v24 = vpop.f32.mrf.mxu1 }
 0x12b   : > { %v2502_v2 = vadd.f32 %v2501_v21, %v2500_v18  ;;  %v2590_v25 = vadd.f32 %v2589_v24, %v2588_v19 }
 0x12c   : > { %v2503_v26 = vpop.f32.mrf.mxu0  ;;  %v2591_v27 = vpop.f32.mrf.mxu1 }
 0x12d   : > { %v3449_v29 = vadd.f32 %v2590_v25, %v2478_v22 }
 0x12e   : > { %v2504_v30 = vpop.f32.mrf.mxu0  ;;  %v2592_v31 = vpop.f32.mrf.mxu1 }
 0x12f   : > { %v2505_v10 = vadd.f32 %v2504_v30, %v2503_v26  ;;  %v2593_v33 = vadd.f32 %v2592_v31, %v2591_v27 }
 0x130   : > { %v2506_v36 = vpop.f32.mrf.mxu0  ;;  %v2594_v38 = vpop.f32.mrf.mxu1 }
 0x131   : > { %v3451_v39 = vadd.f32 %v2593_v33, %v2481_v28 }
 0x132   : > { %v2507_v40 = vpop.f32.mrf.mxu0  ;;  %v2595_v42 = vpop.f32.mrf.mxu1 }
 0x133   : > { %v2508_v16 = vadd.f32 %v2507_v40, %v2506_v36  ;;  %v2596_v43 = vadd.f32 %v2595_v42, %v2594_v38 }
 0x134   : > { %v2509_v47 = vpop.f32.mrf.mxu0  ;;  %v2597_v48 = vpop.f32.mrf.mxu1 }
 0x135   : > { %v3453_v49 = vadd.f32 %v2596_v43, %v2484_v37 }
 0x136   : > { %v2510_v34 = vpop.f32.mrf.mxu0  ;;  %v2598_v53 = vpop.f32.mrf.mxu1 }
 0x137   : > { %v2511_v22 = vadd.f32 %v2510_v34, %v2509_v47  ;;  %v2599_v55 = vadd.f32 %v2598_v53, %v2597_v48 }
 0x138   : > { %v2512_v56 = vpop.f32.mrf.mxu0  ;;  %v2600_v57 = vpop.f32.mrf.mxu1 }
 0x139   : > { %v3455_v44 = vadd.f32 %v2599_v55, %v2487_v46 }
 0x13a   : > { %v2513_v59 = vpop.f32.mrf.mxu0  ;;  %v2601_v63 = vpop.f32.mrf.mxu1 }
 0x13b   : > { %v2514_v28 = vadd.f32 %v2513_v59, %v2512_v56  ;;  %v2602_v0 = vadd.f32 %v2601_v63, %v2600_v57 }
 0x13c   : > { %v2515_v1 = vpop.f32.mrf.mxu0  ;;  %v2603_v5 = vpop.f32.mrf.mxu1 }
 0x13d   : > { %v3457_v50 = vadd.f32 %v2602_v0, %v2490_v54 }
 0x13e   : > { %v2516_v7 = vpop.f32.mrf.mxu0  ;;  %v2604_v8 = vpop.f32.mrf.mxu1 }
 0x13f   : > { %v2517_v37 = vadd.f32 %v2516_v7, %v2515_v1  ;;  %v2605_v9 = vadd.f32 %v2604_v8, %v2603_v5 }
 0x140   : > { %v2518_v13 = vpop.f32.mrf.mxu0  ;;  %v2606_v14 = vpop.f32.mrf.mxu1 }
 0x141   : > { %v3459_v15 = vadd.f32 %v2605_v9, %v2493_v62 }
 0x142   : > { %v2519_v18 = vpop.f32.mrf.mxu0  ;;  %v2607_v19 = vpop.f32.mrf.mxu1 }
 0x143   : > { %v2520_v46 = vadd.f32 %v2519_v18, %v2518_v13  ;;  %v2608_v21 = vadd.f32 %v2607_v19, %v2606_v14 }
 0x144   : > { %v2521_v24 = vpop.f32.mrf.mxu0  ;;  %v2609_v25 = vpop.f32.mrf.mxu1 }
 0x145   : > { %v3461_v26 = vadd.f32 %v2608_v21, %v2496_v6 }
 0x146   : > { %v2522_v27 = vpop.f32.mrf.mxu0  ;;  %v2610_v30 = vpop.f32.mrf.mxu1 }
 0x147   : > { %v2523_v54 = vadd.f32 %v2522_v27, %v2521_v24  ;;  %v2611_v31 = vadd.f32 %v2610_v30, %v2609_v25 }
 0x148   : > { %v2524_v33 = vpop.f32.mrf.mxu0  ;;  %v2612_v36 = vpop.f32.mrf.mxu1 }
 0x149   : > { %v3463_v38 = vadd.f32 %v2611_v31, %v2499_v60 }
 0x14a   : > { %v2525_v40 = vpop.f32.mrf.mxu0  ;;  %v2613_v42 = vpop.f32.mrf.mxu1 }
 0x14b   : > { %v2526_v62 = vadd.f32 %v2525_v40, %v2524_v33  ;;  %v2614_v43 = vadd.f32 %v2613_v42, %v2612_v36 }
 0x14c   : > { %v2615_v47 = vpop.f32.mrf.mxu1  ;;  %v3465_v48 = vpop.f32.mrf.mxu0 }
 0x14d   : > { %v3467_v34 = vadd.f32 %v2614_v43, %v2502_v2 }
 0x14e   : > { %v2616_v53 = vpop.f32.mrf.mxu1  ;;  %v3469_v6 = vpop.f32.mrf.mxu0 }
 0x14f   : > { %v2617_v55 = vadd.f32 %v2616_v53, %v2615_v47 }
 0x150   : > { %v2618_v56 = vpop.f32.mrf.mxu1  ;;  %v3471_v57 = vpop.f32.mrf.mxu0 }
 0x151   : > { %v3473_v59 = vadd.f32 %v2617_v55, %v2505_v10 }
 0x152   : > { %v2619_v60 = vpop.f32.mrf.mxu1  ;;  %v3475_v63 = vpop.f32.mrf.mxu0 }
 0x153   : > { %v2620_v0 = vadd.f32 %v2619_v60, %v2618_v56 }
 0x154   : > { %v2621_v1 = vpop.f32.mrf.mxu1  ;;  %v3477_v5 = vpop.f32.mrf.mxu0 }
 0x155   : > { %v3479_v7 = vadd.f32 %v2620_v0, %v2508_v16 }
 0x156   : > { %v2622_v2 = vpop.f32.mrf.mxu1  ;;  %v3481_v8 = vpop.f32.mrf.mxu0 }
 0x157   : > { %3747 = vst [vmem:[#allocation2_spill] sm:$0xff] %v3479_v7  ;;  %v2623_v9 = vadd.f32 %v2622_v2, %v2621_v1 }
 0x158   : > { %v2624_v13 = vpop.f32.mrf.mxu1  ;;  %v3483_v14 = vpop.f32.mrf.mxu0 }
 0x159   : > { %v3485_v18 = vadd.f32 %v2623_v9, %v2511_v22 }
 0x15a   : > { %v2625_v10 = vpop.f32.mrf.mxu1  ;;  %v3487_v19 = vpop.f32.mrf.mxu0 }
 0x15b   : > { %v2626_v21 = vadd.f32 %v2625_v10, %v2624_v13 }
 0x15c   : > { %v2627_v24 = vpop.f32.mrf.mxu1  ;;  %v3489_v25 = vpop.f32.mrf.mxu0 }
 0x15d   : > { %v3491_v27 = vadd.f32 %v2626_v21, %v2514_v28 }
 0x15e   : > { %v2628_v16 = vpop.f32.mrf.mxu1  ;;  %v3493_v30 = vpop.f32.mrf.mxu0 }
 0x15f   : > { %v2629_v31 = vadd.f32 %v2628_v16, %v2627_v24 }
 0x160   : > { %v2630_v33 = vpop.f32.mrf.mxu1  ;;  %v3495_v36 = vpop.f32.mrf.mxu0 }
 0x161   : > { %v3497_v40 = vadd.f32 %v2629_v31, %v2517_v37 }
 0x162   : > { %v2631_v22 = vpop.f32.mrf.mxu1  ;;  %v3499_v42 = vpop.f32.mrf.mxu0 }
 0x163   : > { %3748 = vst [vmem:[#allocation3_spill] sm:$0xff] %v3497_v40  ;;  %v2632_v43 = vadd.f32 %v2631_v22, %v2630_v33 }
 0x164   : > { %v2633_v47 = vpop.f32.mrf.mxu1  ;;  %v3501_v53 = vpop.f32.mrf.mxu0 }
 0x165   : > { %v3503_v55 = vadd.f32 %v2632_v43, %v2520_v46 }
 0x166   : > { %v2634_v28 = vpop.f32.mrf.mxu1  ;;  %v3505_v56 = vpop.f32.mrf.mxu0 }
 0x167   : > { %3749 = vst [vmem:[#allocation4_spill] sm:$0xff] %v3503_v55  ;;  %v2635_v60 = vadd.f32 %v2634_v28, %v2633_v47 }
 0x168   : > { %v2636_v0 = vpop.f32.mrf.mxu1  ;;  %v3507_v1 = vpop.f32.mrf.mxu0 }
 0x169   : > { %v3509_v2 = vadd.f32 %v2635_v60, %v2523_v54 }
 0x16a   : > { %v2637_v37 = vpop.f32.mrf.mxu1  ;;  %v3511_v9 = vpop.f32.mrf.mxu0 }
 0x16b   : > { %3750 = vst [vmem:[#allocation5_spill] sm:$0xff] %v3509_v2  ;;  %v2638_v13 = vadd.f32 %v2637_v37, %v2636_v0 }
 0x16c   : > { %v2639_v10 = vpop.f32.mrf.mxu1  ;;  %v3513_v21 = vpop.f32.mrf.mxu0 }
 0x16d   : > { %v3515_v24 = vadd.f32 %v2638_v13, %v2526_v62 }
 0x16e   : > { %v2640_v46 = vpop.f32.mrf.mxu1  ;;  %v3517_v16 = vpop.f32.mrf.mxu0 }
 0x16f   : > { %3751 = vst [vmem:[#allocation6_spill] sm:$0xff] %v3515_v24  ;;  %v2641_v31 = vadd.f32 %v2640_v46, %v2639_v10 }
 0x170   : > { %v2642_v33 = vpop.f32.mrf.mxu1  ;;  %v3519_v22 = vpop.f32.mrf.mxu0 }
 0x171   : > { %v3522_v43 = vadd.f32 %v2641_v31, %v3399_v35 }
 0x172   : > { %v2643_v54 = vpop.f32.mrf.mxu1  ;;  %v3524_v47 = vpop.f32.mrf.mxu0 }
 0x173   : > { %3752 = vst [vmem:[#allocation7_spill] sm:$0xff] %v3522_v43  ;;  %v2644_v28 = vadd.f32 %v2643_v54, %v2642_v33 }
 0x174   : > { %v2645_v60 = vpop.f32.mrf.mxu1  ;;  %v3526_v0 = vpop.f32.mrf.mxu0 }
 0x175   : > { %v3529_v62 = vadd.f32 %v2644_v28, %v3407_v45 }
 0x176   : > { %v2646_v37 = vpop.f32.mrf.mxu1  ;;  %v3531_v13 = vpop.f32.mrf.mxu0 }
 0x177   : > { %3753 = vst [vmem:[#allocation8_spill] sm:$0xff] %v3529_v62  ;;  %v2647_v10 = vadd.f32 %v2646_v37, %v2645_v60 }
 0x178   : > { %v2648_v46 = vpop.f32.mrf.mxu1  ;;  %v3533_v55 = vpop.f32.mrf.mxu0 }
 0x179   : > { %v3536_v35 = vadd.f32 %v2647_v10, %v3411_v51 }
 0x17a   : > { %v2649_v31 = vpop.f32.mrf.mxu1  ;;  %v3538_v43 = vpop.f32.mrf.mxu0 }
 0x17b   : > { %3754 = vst [vmem:[#allocation9_spill] sm:$0xff] %v3536_v35  ;;  %v2650_v33 = vadd.f32 %v2649_v31, %v2648_v46 }
 0x17c   : > { %v2651_v54 = vpop.f32.mrf.mxu1  ;;  %v3540_v24 = vpop.f32.mrf.mxu0 }
 0x17d   : > { %v3543_v45 = vadd.f32 %v2650_v33, %v3419_v61 }
 0x17e   : > { %v2652_v28 = vpop.f32.mrf.mxu1  ;;  %v3545_v62 = vpop.f32.mrf.mxu0 }
 0x17f   : > { %3755 = vst [vmem:[#allocation10_spill] sm:$0xff] %v3543_v45  ;;  %v2653_v60 = vadd.f32 %v2652_v28, %v2651_v54  ;;  %v2687_v54 = vadd.f32 %v3481_v8, %v3477_v5  ;;  %v2684_v5 = vadd.f32 %v3475_v63, %v3471_v57 }
 0x180   : > { %v2654_v37 = vpop.f32.mrf.mxu1  ;;  %v3547_v40 = vpop.f32.mrf.mxu0 }
 0x181   : > { %v3550_v51 = vadd.f32 %v2653_v60, %v3421_v3  ;;  %v1668_v7 = vadd.f32 %v2687_v54, %v3438_v52  ;;  %v1663_v63 = vadd.f32 %v2684_v5, %v3435_v41 }
 0x182   : > { %v2655_v10 = vpop.f32.mrf.mxu1  ;;  %v3552_v35 = vpop.f32.mrf.mxu0 }
 0x183   : > { %3756 = vst [vmem:[#allocation11_spill] sm:$0xff] %v3550_v51  ;;  %v2656_v46 = vadd.f32 %v2655_v10, %v2654_v37  ;;  %v2681_v37 = vadd.f32 %v3469_v6, %v3465_v48 }
 0x184   : > { %v2657_v31 = vpop.f32.mrf.mxu1  ;;  %v3554_v2 = vpop.f32.mrf.mxu0 }
 0x185   : > { %v3557_v61 = vadd.f32 %v2656_v46, %v3425_v11  ;;  %v2690_v46 = vadd.f32 %v3487_v19, %v3483_v14  ;;  %v1660_v6 = vadd.f32 %v2681_v37, %v3432_v32  ;;  %v2699_v14 = vadd.f32 %v3505_v56, %v3501_v53 }
 0x186   : > { %v2658_v33 = vpop.f32.mrf.mxu1  ;;  %v3559_v45 = vpop.f32.mrf.mxu0 }
 0x187   : > { %3757 = vst [vmem:[#allocation12_spill] sm:$0xff] %v3557_v61  ;;  %v2659_v28 = vadd.f32 %v2658_v33, %v2657_v31  ;;  %v1671_v57 = vadd.f32 %v2690_v46, %v3441_v58  ;;  %v2702_v58 = vadd.f32 %v3511_v9, %v3507_v1  ;;  %v1684_v41 = vadd.f32 %v2699_v14, %v3447_v20 }
 0x188   : > { %v2660_v3 = vpop.f32.mrf.mxu1  ;;  %v3563_v60 = vpop.f32.mrf.mxu0  ;;  %v2711_v20 = vadd.f32 %v3531_v13, %v3526_v0  ;;  %v2714_v13 = vadd.f32 %v3538_v43, %v3533_v55 }
 0x189   : > { %v3568_v10 = vadd.f32 %v2659_v28, %v3427_v17 }
 0x18a   : > { %v2661_v51 = vpop.f32.mrf.mxu1  ;;  %v3570_v11 = vpop.f32.mrf.mxu0 }
 0x18b   : > { %v2662_v61 = vadd.f32 %v2661_v51, %v2660_v3 }
 0x18c   : > { %v3577_v8 = vpop.f32.mrf.mxu0  ;;  %v2817_v31 = vpop.f32.mrf.mxu1 }
 0x18d   : > { %v3580_v48 = vadd.f32 %v2662_v61, %v3429_v23  ;;  %v1829_v17 = vadd.f32 %v2817_v31, %v1668_v7  ;;  %v2693_v7 = vadd.f32 %v3493_v30, %v3489_v25  ;;  %v2696_v25 = vadd.f32 %v3499_v42, %v3495_v36 }
 0x18e   : > { %v3584_v33 = vpop.f32.mrf.mxu0  ;;  %v1820_v28 = vpop.f32.mrf.mxu1 }
 0x18f   : > { %v1949_v52 = vmax.f32 %v1829_v17, 0.0  ;;  %v1821_v19 = vadd.f32 %v1820_v28, %v1660_v6  ;;  %v1676_v17 = vadd.f32 %v2693_v7, %v3443_v4  ;;  %v2705_v4 = vadd.f32 %v3517_v16, %v3513_v21 }
 0x190   : > { %v3594_v23 = vpop.f32.mrf.mxu0  ;;  %v2818_v32 = vpop.f32.mrf.mxu1  ;;  %v1700_v21 = vadd.f32 %v2711_v20, %v3455_v44  ;;  %v2708_v16 = vadd.f32 %v3524_v47, %v3519_v22  ;;  %v2723_v44 = vadd.f32 %v3559_v45, %v3554_v2  ;;  %v2726_v45 = vadd.f32 %v3570_v11, %v3563_v60 }
 0x191   : > { %v2409_v53 = vpack.c.bf16 %v1949_v52, %v1949_v52  ;;  %v1947_v56 = vmax.f32 %v1821_v19, 0.0  ;;  %v1832_v51 = vadd.f32 %v2818_v32, %v1671_v57  ;;  %v1687_v52 = vadd.f32 %v2702_v58, %v3449_v29 }
 0x192   : > { %v3601_v61 = vpop.f32.mrf.mxu0  ;;  %v1823_v54 = vpop.f32.mrf.mxu1  ;;  %v1679_v32 = vadd.f32 %v2696_v25, %v3445_v12  ;;  %v1703_v25 = vadd.f32 %v2714_v13, %v3457_v50 }
 0x193   : > { %2110 = vst.msk [vmem:[%s3592_s29 + $0x8] sm:$0xf] %vm2107_vm0, %v2409_v53  ;;  %v2407_v3 = vpack.c.bf16 %v1947_v56, %v1947_v56  ;;  %v1950_v37 = vmax.f32 %v1832_v51, 0.0  ;;  %v1824_v46 = vadd.f32 %v1823_v54, %v1663_v63 }
 0x194   : > { %v3608_v30 = vpop.f32.mrf.mxu0  ;;  %v2821_v5 = vpop.f32.mrf.mxu1 }
 0x195   : > { %2108 = vst.msk [vmem:[%s3592_s29] sm:$0xf] %vm2107_vm0, %v2407_v3  ;;  %v2410_v1 = vpack.c.bf16 %v1950_v37, %v1950_v37  ;;  %v1948_v9 = vmax.f32 %v1824_v46, 0.0  ;;  %v1845_v31 = vadd.f32 %v2821_v5, %v1684_v41  ;;  %v1692_v37 = vadd.f32 %v2705_v4, %v3451_v39 }
 0x196   : > { %v3613_v6 = vpop.f32.mrf.mxu0  ;;  %v1836_v28 = vpop.f32.mrf.mxu1  ;;  %v2717_v39 = vadd.f32 %v3545_v62, %v3540_v24  ;;  %v1716_v24 = vadd.f32 %v2723_v44, %v3463_v38  ;;  %v2720_v62 = vadd.f32 %v3552_v35, %v3547_v40 }
 0x197   : > { %2111 = vst.msk [vmem:[%s3592_s29 + $0xc] sm:$0xf] %vm2107_vm0, %v2410_v1  ;;  %v2408_v36 = vpack.c.bf16 %v1948_v9, %v1948_v9  ;;  %v1953_v42 = vmax.f32 %v1845_v31, 0.0  ;;  %v1837_v14 = vadd.f32 %v1836_v28, %v1676_v17  ;;  %v1695_v31 = vadd.f32 %v2708_v16, %v3453_v49 }
 0x198   : > { %v3620_v19 = vpop.f32.mrf.mxu0  ;;  %v2822_v57 = vpop.f32.mrf.mxu1  ;;  %v2735_v38 = vadd.f32 %v3613_v6, %v3608_v30 }
 0x199   : > { %2109 = vst.msk [vmem:[%s3592_s29 + $0x4] sm:$0xf] %vm2107_vm0, %v2408_v36  ;;  %v2413_v29 = vpack.c.bf16 %v1953_v42, %v1953_v42  ;;  %v1951_v63 = vmax.f32 %v1837_v14, 0.0  ;;  %v1848_v0 = vadd.f32 %v2822_v57, %v1687_v52 }
 0x19a   : > { %v3629_v7 = vpop.f32.mrf.mxu0  ;;  %v1839_v53 = vpop.f32.mrf.mxu1 }
 0x19b   : > { %2114 = vst.msk [vmem:[%s3592_s29 + $0x18] sm:$0xf] %vm2107_vm0, %v2413_v29  ;;  %v2411_v56 = vpack.c.bf16 %v1951_v63, %v1951_v63  ;;  %v1954_v12 = vmax.f32 %v1848_v0, 0.0  ;;  %v1840_v51 = vadd.f32 %v1839_v53, %v1679_v32  ;;  %v1708_v32 = vadd.f32 %v2717_v39, %v3459_v15 }
 0x19c   : > { %v3636_v58 = vpop.f32.mrf.mxu0  ;;  %v2825_v54 = vpop.f32.mrf.mxu1  ;;  %v1719_v63 = vadd.f32 %v2726_v45, %v3467_v34  ;;  %v2729_v15 = vadd.f32 %v3584_v33, %v3577_v8  ;;  %v2738_v30 = vadd.f32 %v3629_v7, %v3620_v19  ;;  %v2732_v8 = vadd.f32 %v3601_v61, %v3594_v23 }
 0x19d   : > { %2112 = vst.msk [vmem:[%s3592_s29 + $0x10] sm:$0xf] %vm2107_vm0, %v2411_v56  ;;  %v2414_v55 = vpack.c.bf16 %v1954_v12, %v1954_v12  ;;  %v1952_v43 = vmax.f32 %v1840_v51, 0.0  ;;  %v1861_v3 = vadd.f32 %v2825_v54, %v1700_v21  ;;  %v1711_v56 = vadd.f32 %v2720_v62, %v3461_v26 }
 0x19e   : > { %v3641_v46 = vpop.f32.mrf.mxu0  ;;  %v1852_v41 = vpop.f32.mrf.mxu1  ;;  %v1735_v44 = vadd.f32 %v2738_v30, %v3491_v27 }
 0x19f   : > { %2115 = vst.msk [vmem:[%s3592_s29 + $0x1c] sm:$0xf] %vm2107_vm0, %v2414_v55  ;;  %v2412_v22 = vpack.c.bf16 %v1952_v43, %v1952_v43  ;;  %v1957_v47 = vmax.f32 %v1861_v3, 0.0  ;;  %v1853_v5 = vadd.f32 %v1852_v41, %v1692_v37  ;;  %v1732_v55 = vadd.f32 %v2735_v38, %v3485_v18 }
 0x1a0   : > { %v3648_v1 = vpop.f32.mrf.mxu0  ;;  %v2826_v9 = vpop.f32.mrf.mxu1  ;;  %v1724_v37 = vadd.f32 %v2729_v15, %v3473_v59  ;;  %v2741_v39 = vadd.f32 %v3641_v46, %v3636_v58 }
 0x1a1   : > { %2113 = vst.msk [vmem:[%s3592_s29 + $0x14] sm:$0xf] %vm2107_vm0, %v2412_v22  ;;  %v2417_v50 = vpack.c.bf16 %v1957_v47, %v1957_v47  ;;  %v1955_v17 = vmax.f32 %v1853_v5, 0.0  ;;  %v1864_v2 = vadd.f32 %v2826_v9, %v1703_v25  ;;  %v3758_v9 = vld [vmem:[#allocation2_spill] sm:$0xff] }
 0x1a2   : > { %v3657_v28 = vpop.f32.mrf.mxu0  ;;  %v1855_v52 = vpop.f32.mrf.mxu1 }
 0x1a3   : > { %2118 = vst.msk [vmem:[%s3592_s29 + $0x28] sm:$0xf] %vm2107_vm0, %v2417_v50  ;;  %v2415_v20 = vpack.c.bf16 %v1955_v17, %v1955_v17  ;;  %v1958_v49 = vmax.f32 %v1864_v2, 0.0  ;;  %v1856_v36 = vadd.f32 %v1855_v52, %v1695_v31  ;;  %v1727_v31 = vadd.f32 %v2732_v8, %v3758_v9 }
 0x1a4   : > { %v2745_v42 = vpop.f32.mrf.mxu0  ;;  %v2829_v14 = vpop.f32.mrf.mxu1  ;;  %v2744_v58 = vadd.f32 %v3657_v28, %v3648_v1 }
 0x1a5   : > { %2116 = vst.msk [vmem:[%s3592_s29 + $0x20] sm:$0xf] %vm2107_vm0, %v2415_v20  ;;  %v2418_v57 = vpack.c.bf16 %v1958_v49, %v1958_v49  ;;  %v1956_v60 = vmax.f32 %v1856_v36, 0.0  ;;  %v1877_v11 = vadd.f32 %v2829_v14, %v1716_v24  ;;  %v3759_v36 = vld [vmem:[#allocation5_spill] sm:$0xff] }
 0x1a6   : > { %v2746_v4 = vpop.f32.mrf.mxu0  ;;  %v1868_v29 = vpop.f32.mrf.mxu1 }
 0x1a7   : > { %2119 = vst.msk [vmem:[%s3592_s29 + $0x2c] sm:$0xf] %vm2107_vm0, %v2418_v57  ;;  %v2416_v40 = vpack.c.bf16 %v1956_v60, %v1956_v60  ;;  %v1961_v35 = vmax.f32 %v1877_v11, 0.0  ;;  %v1869_v0 = vadd.f32 %v1868_v29, %v1708_v32  ;;  %v2747_v22 = vadd.f32 %v2746_v4, %v2745_v42  ;;  %v3760_v60 = vld [vmem:[#allocation3_spill] sm:$0xff]  ;;  %v3761_v29 = vld [vmem:[#allocation6_spill] sm:$0xff] }
 0x1a8   : > { %v2748_v13 = vpop.f32.mrf.mxu0  ;;  %v2830_v53 = vpop.f32.mrf.mxu1  ;;  %v1740_v11 = vadd.f32 %v2741_v39, %v3760_v60 }
 0x1a9   : > { %2117 = vst.msk [vmem:[%s3592_s29 + $0x24] sm:$0xf] %vm2107_vm0, %v2416_v40  ;;  %v2421_v34 = vpack.c.bf16 %v1961_v35, %v1961_v35  ;;  %v1959_v12 = vmax.f32 %v1869_v0, 0.0  ;;  %v1880_v51 = vadd.f32 %v2830_v53, %v1719_v63  ;;  %v1748_v24 = vadd.f32 %v2747_v22, %v3759_v36 }
 0x1aa   : > { %v2749_v6 = vpop.f32.mrf.mxu0  ;;  %v1871_v21 = vpop.f32.mrf.mxu1 }
 0x1ab   : > { %2122 = vst.msk [vmem:[%s3592_s29 + $0x38] sm:$0xf] %vm2107_vm0, %v2421_v34  ;;  %v2419_v16 = vpack.c.bf16 %v1959_v12, %v1959_v12  ;;  %v1962_v54 = vmax.f32 %v1880_v51, 0.0  ;;  %v1872_v26 = vadd.f32 %v1871_v21, %v1711_v56  ;;  %v2750_v17 = vadd.f32 %v2749_v6, %v2748_v13  ;;  %v3762_v13 = vld [vmem:[#allocation4_spill] sm:$0xff]  ;;  %v3763_v6 = vld [vmem:[#allocation9_spill] sm:$0xff] }
 0x1ac   : > { %v2751_v33 = vpop.f32.mrf.mxu0  ;;  %v2833_v43 = vpop.f32.mrf.mxu1  ;;  %v1743_v53 = vadd.f32 %v2744_v58, %v3762_v13 }
 0x1ad   : > { %2120 = vst.msk [vmem:[%s3592_s29 + $0x30] sm:$0xf] %vm2107_vm0, %v2419_v16  ;;  %v2422_v3 = vpack.c.bf16 %v1962_v54, %v1962_v54  ;;  %v1960_v19 = vmax.f32 %v1872_v26, 0.0  ;;  %v1893_v7 = vadd.f32 %v2833_v43, %v1732_v55  ;;  %v1751_v63 = vadd.f32 %v2750_v17, %v3761_v29 }
 0x1ae   : > { %v2752_v41 = vpop.f32.mrf.mxu0  ;;  %v1884_v25 = vpop.f32.mrf.mxu1 }
 0x1af   : > { %2123 = vst.msk [vmem:[%s3592_s29 + $0x3c] sm:$0xf] %vm2107_vm0, %v2422_v3  ;;  %v2420_v18 = vpack.c.bf16 %v1960_v19, %v1960_v19  ;;  %v1965_v23 = vmax.f32 %v1893_v7, 0.0  ;;  %v1885_v61 = vadd.f32 %v1884_v25, %v1724_v37  ;;  %v2753_v56 = vadd.f32 %v2752_v41, %v2751_v33  ;;  %v3764_v37 = vld [vmem:[#allocation7_spill] sm:$0xff] }
 0x1b0   : > { %v2754_v47 = vpop.f32.mrf.mxu0  ;;  %v2834_v5 = vpop.f32.mrf.mxu1 }
 0x1b1   : > { %2121 = vst.msk [vmem:[%s3592_s29 + $0x34] sm:$0xf] %vm2107_vm0, %v2420_v18  ;;  %v2425_v59 = vpack.c.bf16 %v1965_v23, %v1965_v23  ;;  %v1963_v50 = vmax.f32 %v1885_v61, 0.0  ;;  %v1896_v27 = vadd.f32 %v2834_v5, %v1735_v44  ;;  %v1756_v41 = vadd.f32 %v2753_v56, %v3764_v37  ;;  %v3765_v61 = vld [vmem:[#allocation10_spill] sm:$0xff] }
 0x1b2   : > { %v2755_v2 = vpop.f32.mrf.mxu0  ;;  %v1887_v45 = vpop.f32.mrf.mxu1 }
 0x1b3   : > { %2126 = vst.msk [vmem:[%s3592_s29 + $0x48] sm:$0xf] %vm2107_vm0, %v2425_v59  ;;  %v2423_v52 = vpack.c.bf16 %v1963_v50, %v1963_v50  ;;  %v1966_v20 = vmax.f32 %v1896_v27, 0.0  ;;  %v1888_v49 = vadd.f32 %v1887_v45, %v1727_v31  ;;  %v2756_v8 = vadd.f32 %v2755_v2, %v2754_v47  ;;  %v3766_v31 = vld [vmem:[#allocation8_spill] sm:$0xff] }
 0x1b4   : > { %v2757_v46 = vpop.f32.mrf.mxu0  ;;  %v2837_v62 = vpop.f32.mrf.mxu1 }
 0x1b5   : > { %2124 = vst.msk [vmem:[%s3592_s29 + $0x40] sm:$0xf] %vm2107_vm0, %v2423_v52  ;;  %v2426_v42 = vpack.c.bf16 %v1966_v20, %v1966_v20  ;;  %v1964_v14 = vmax.f32 %v1888_v49, 0.0  ;;  %v1909_v57 = vadd.f32 %v2837_v62, %v1748_v24  ;;  %v1759_v39 = vadd.f32 %v2756_v8, %v3766_v31 }
 0x1b6   : > { %v2758_v32 = vpop.f32.mrf.mxu0  ;;  %v1900_v4 = vpop.f32.mrf.mxu1 }
 0x1b7   : > { %2127 = vst.msk [vmem:[%s3592_s29 + $0x4c] sm:$0xf] %vm2107_vm0, %v2426_v42  ;;  %v2424_v38 = vpack.c.bf16 %v1964_v14, %v1964_v14  ;;  %v1969_v40 = vmax.f32 %v1909_v57, 0.0  ;;  %v2759_v1 = vadd.f32 %v2758_v32, %v2757_v46  ;;  %v1901_v28 = vadd.f32 %v1900_v4, %v1740_v11  ;;  %v3767_v42 = vld [vmem:[#allocation11_spill] sm:$0xff] }
 0x1b8   : > { %v2760_v35 = vpop.f32.mrf.mxu0  ;;  %v2838_v0 = vpop.f32.mrf.mxu1 }
 0x1b9   : > { %2125 = vst.msk [vmem:[%s3592_s29 + $0x44] sm:$0xf] %vm2107_vm0, %v2424_v38  ;;  %v2429_v15 = vpack.c.bf16 %v1969_v40, %v1969_v40  ;;  %v1967_v34 = vmax.f32 %v1901_v28, 0.0  ;;  %v1912_v12 = vadd.f32 %v2838_v0, %v1751_v63  ;;  %v1764_v21 = vadd.f32 %v2759_v1, %v3763_v6  ;;  %v3768_v1 = vld [vmem:[#allocation12_spill] sm:$0xff] }
 0x1ba   : > { %v2761_v51 = vpop.f32.mrf.mxu0  ;;  %v1903_v30 = vpop.f32.mrf.mxu1 }
 0x1bb   : > { %2130 = vst.msk [vmem:[%s3592_s29 + $0x58] sm:$0xf] %vm2107_vm0, %v2429_v15  ;;  %v2427_v16 = vpack.c.bf16 %v1967_v34, %v1967_v34  ;;  %v1970_v54 = vmax.f32 %v1912_v12, 0.0  ;;  %v2762_v26 = vadd.f32 %v2761_v51, %v2760_v35  ;;  %v1904_v55 = vadd.f32 %v1903_v30, %v1743_v53 }
 0x1bc   : > { %v2763_v43 = vpop.f32.mrf.mxu0  ;;  %v2841_v33 = vpop.f32.mrf.mxu1 }
 0x1bd   : > { %2128 = vst.msk [vmem:[%s3592_s29 + $0x50] sm:$0xf] %vm2107_vm0, %v2427_v16  ;;  %v2430_v3 = vpack.c.bf16 %v1970_v54, %v1970_v54  ;;  %v1968_v19 = vmax.f32 %v1904_v55, 0.0  ;;  %v1925_v7 = vadd.f32 %v2841_v33, %v1764_v21  ;;  %v1767_v47 = vadd.f32 %v2762_v26, %v3765_v61 }
 0x1be   : > { %v2764_v25 = vpop.f32.mrf.mxu0  ;;  %v1916_v44 = vpop.f32.mrf.mxu1 }
 0x1bf   : > { %2131 = vst.msk [vmem:[%s3592_s29 + $0x5c] sm:$0xf] %vm2107_vm0, %v2430_v3  ;;  %v2428_v22 = vpack.c.bf16 %v1968_v19, %v1968_v19  ;;  %v1973_v18 = vmax.f32 %v1925_v7, 0.0  ;;  %v1917_v23 = vadd.f32 %v1916_v44, %v1756_v41  ;;  %v2765_v50 = vadd.f32 %v2764_v25, %v2763_v43 }
 0x1c0   : > { %v2766_v5 = vpop.f32.mrf.mxu0  ;;  %v2842_v9 = vpop.f32.mrf.mxu1 }
 0x1c1   : > { %2129 = vst.msk [vmem:[%s3592_s29 + $0x54] sm:$0xf] %vm2107_vm0, %v2428_v22  ;;  %v2433_v59 = vpack.c.bf16 %v1973_v18, %v1973_v18  ;;  %v1971_v27 = vmax.f32 %v1917_v23, 0.0  ;;  %v1928_v17 = vadd.f32 %v2842_v9, %v1767_v47  ;;  %v1772_v14 = vadd.f32 %v2765_v50, %v3767_v42 }
 0x1c2   : > { %v2767_v2 = vpop.f32.mrf.mxu0  ;;  %v1919_v45 = vpop.f32.mrf.mxu1 }
 0x1c3   : > { %2134 = vst.msk [vmem:[%s3592_s29 + $0x68] sm:$0xf] %vm2107_vm0, %v2433_v59  ;;  %v2431_v52 = vpack.c.bf16 %v1971_v27, %v1971_v27  ;;  %v1974_v20 = vmax.f32 %v1928_v17, 0.0  ;;  %v1920_v49 = vadd.f32 %v1919_v45, %v1759_v39  ;;  %v2768_v46 = vadd.f32 %v2767_v2, %v2766_v5 }
 0x1c4   : > { %v2769_v36 = vpop.f32.mrf.mxu0  ;;  %v2845_v24 = vpop.f32.mrf.mxu1 }
 0x1c5   : > { %2132 = vst.msk [vmem:[%s3592_s29 + $0x60] sm:$0xf] %vm2107_vm0, %v2431_v52  ;;  %v2434_v58 = vpack.c.bf16 %v1974_v20, %v1974_v20  ;;  %v1972_v62 = vmax.f32 %v1920_v49, 0.0  ;;  %v1775_v28 = vadd.f32 %v2768_v46, %v3768_v1 }
 0x1c6   : > { %v2770_v57 = vpop.f32.mrf.mxu0  ;;  %v1932_v60 = vpop.f32.mrf.mxu1 }
 0x1c7   : > { %2135 = vst.msk [vmem:[%s3592_s29 + $0x6c] sm:$0xf] %vm2107_vm0, %v2434_v58  ;;  %v2432_v11 = vpack.c.bf16 %v1972_v62, %v1972_v62  ;;  %v2771_v32 = vadd.f32 %v2770_v57, %v2769_v36  ;;  %v1933_v4 = vadd.f32 %v1932_v60, %v1772_v14 }
 0x1c8   : > { %v2772_v29 = vpop.f32.mrf.mxu0  ;;  %v2846_v63 = vpop.f32.mrf.mxu1 }
 0x1c9   : > { %2133 = vst.msk [vmem:[%s3592_s29 + $0x64] sm:$0xf] %vm2107_vm0, %v2432_v11  ;;  %v1780_v38 = vadd.f32 %v2771_v32, %v3568_v10  ;;  %v1975_v40 = vmax.f32 %v1933_v4, 0.0 }
 0x1ca   : > { %v2773_v35 = vpop.f32.mrf.mxu0  ;;  %v1935_v0 = vpop.f32.mrf.mxu1 }
 0x1cb   : > { %v1941_v13 = vadd.f32 %v2845_v24, %v1780_v38  ;;  %v2435_v53 = vpack.c.bf16 %v1975_v40, %v1975_v40  ;;  %v2774_v56 = vadd.f32 %v2773_v35, %v2772_v29  ;;  %v1936_v15 = vadd.f32 %v1935_v0, %v1775_v28 }
 0x1cd   : > { %v1977_v34 = vmax.f32 %v1941_v13, 0.0  ;;  %2136 = vst.msk [vmem:[%s3592_s29 + $0x70] sm:$0xf] %vm2107_vm0, %v2435_v53  ;;  %v1783_v12 = vadd.f32 %v2774_v56, %v3580_v48  ;;  %v1976_v51 = vmax.f32 %v1936_v15, 0.0 }
 0x1cf   : > { %v2437_v30 = vpack.c.bf16 %v1977_v34, %v1977_v34  ;;  %v1944_v10 = vadd.f32 %v2846_v63, %v1783_v12  ;;  %v2436_v6 = vpack.c.bf16 %v1976_v51, %v1976_v51 }
 0x1d1   : > { %2138 = vst.msk [vmem:[%s3592_s29 + $0x78] sm:$0xf] %vm2107_vm0, %v2437_v30  ;;  %v1978_v21 = vmax.f32 %v1944_v10, 0.0  ;;  %2137 = vst.msk [vmem:[%s3592_s29 + $0x74] sm:$0xf] %vm2107_vm0, %v2436_v6 }
 0x1d3   : > { %v2438_v16 = vpack.c.bf16 %v1978_v21, %v1978_v21 }
 0x1d5   : > { %2139 = vst.msk [vmem:[%s3592_s29 + $0x7c] sm:$0xf] %vm2107_vm0, %v2438_v16 }
 0x1d6 PF: > { %s12_s9 = sadd.s32 1, %s3094_s9  }
 0x1d7   : > { %p9_p4 = scmp.ge.s32.totalorder %s12_s9, 10  }
 0x1d9   :  { %11 = sbr.rel (!%p9_p4) target bundleno = 1 (0x1), region = 58 }

// kernel: voxel_backbone8x_forward.17
= control target key start
LH: loop header
LB: loop body
LE: loop exit
PB: predicated region body
PF: predicated region fallthrough
CT: control target
= control target key end

     0   :  { %s2055_s9 = smov 0   ;;  %s2524_s0 = inlined_call_operand.vmem [shape: bf16[896,64], index: 0, kind: input, shape index: {}]   ;;  %s2525_s1 = inlined_call_operand.vmem [shape: bf16[256,896], index: 1, kind: input, shape index: {}]   ;;  %s2526_s2 = inlined_call_operand.vmem [shape: bf16[256,64], index: 2, kind: output, shape index: {}]  }
   0x1 LB: > { %s1492_s10 = sadd.s32 4294967295, %s2038_s9   ;;  %p1496_p0 = scmp.ge.s32.totalorder %s2038_s9, 1  ;;  %s2038_s9 = sphi %s2055_s9, %s12_s9  }
   0x2   : > { %p114_p1 = scmp.lt.s32.totalorder %s2038_s9, 3 }
   0x4   : > { %p115_p2 = pnand %p1496_p0, %p114_p1 }
   0x6   : > { %118 = sbr.rel (%p115_p2) target bundleno = 375 (0x177), region = 28 }
   0xb   : > { %v1896_v0 = vld [vmem:[%s2524_s0 + $0x78] sm:$0xff]   ;;  %v1900_v4 = vld [vmem:[%s2524_s0 + $0x70] sm:$0xff]   ;;  %v1904_v8 = vld [vmem:[%s2524_s0 + $0x68] sm:$0xff]   ;;  %s1497_s15 = sshll.u32 %s1492_s10, 4  ;;  %vm1419_vm0 = vcmask 519168  }
   0xc   : > { %v1897_v1 = vld [vmem:[%s2524_s0 + $0xf8] sm:$0xff]   ;;  %1647 = vmatprep.subr.bf16.mxu0 %v1896_v0  ;;  %v1901_v5 = vld [vmem:[%s2524_s0 + $0xf0] sm:$0xff]   ;;  %v1905_v9 = vld [vmem:[%s2524_s0 + $0xe8] sm:$0xff]   ;;  %p138_p3 = scmp.lt.s32.totalorder %s1497_s15, 31 }
   0xd   : > { %v1898_v2 = vld [vmem:[%s2524_s0 + $0x38] sm:$0xff]   ;;  %1711 = vmatprep.subr.bf16.mxu1 %v1897_v1  ;;  %v1902_v6 = vld [vmem:[%s2524_s0 + $0x30] sm:$0xff]   ;;  %v1906_v10 = vld [vmem:[%s2524_s0 + $0x28] sm:$0xff]  }
   0xe   : > { %v1899_v3 = vld [vmem:[%s2524_s0 + $0xb8] sm:$0xff]   ;;  %1648 = vmatpush3.bf16.msra.mxu0 %v1898_v2  ;;  %v1903_v7 = vld [vmem:[%s2524_s0 + $0xb0] sm:$0xff]   ;;  %v1907_v11 = vld [vmem:[%s2524_s0 + $0xa8] sm:$0xff]   ;;  %s2556_s15 = smov (!%p138_p3, %s1497_s15), 31 }
   0xf   : > { %1712 = vmatpush3.bf16.msra.mxu1 %v1899_v3  ;;  %1649 = vmatprep.subr.bf16.mxu0 %v1900_v4  ;;  %v1908_v12 = vld [vmem:[%s2524_s0 + $0x60] sm:$0xff]   ;;  %v1912_v16 = vld [vmem:[%s2524_s0 + $0x58] sm:$0xff]   ;;  %v1916_v20 = vld [vmem:[%s2524_s0 + $0x50] sm:$0xff]   ;;  %s1887_s11 = smul.u32 28, %s2556_s15 }
  0x10   : > { %1713 = vmatprep.subr.bf16.mxu1 %v1901_v5  ;;  %v1909_v13 = vld [vmem:[%s2524_s0 + $0xe0] sm:$0xff]   ;;  %v1913_v17 = vld [vmem:[%s2524_s0 + $0xd8] sm:$0xff]   ;;  %v1917_v21 = vld [vmem:[%s2524_s0 + $0xd0] sm:$0xff]  }
  0x11   : > { %v1910_v14 = vld [vmem:[%s2524_s0 + $0x20] sm:$0xff]   ;;  %v1914_v18 = vld [vmem:[%s2524_s0 + $0x18] sm:$0xff]   ;;  %v1918_v22 = vld [vmem:[%s2524_s0 + $0x10] sm:$0xff]   ;;  %s2161_s23 = scalar_lea.vmem %s2525_s1, %s1887_s11 }
  0x12   : > { %1650 = vmatpush3.bf16.msra.mxu0 %v1902_v6  ;;  %v1911_v15 = vld [vmem:[%s2524_s0 + $0xa0] sm:$0xff]   ;;  %v1915_v19 = vld [vmem:[%s2524_s0 + $0x98] sm:$0xff]   ;;  %v1919_v23 = vld [vmem:[%s2524_s0 + $0x90] sm:$0xff]  }
  0x13   : > { %1714 = vmatpush3.bf16.msra.mxu1 %v1903_v7  ;;  %1651 = vmatprep.subr.bf16.mxu0 %v1904_v8  ;;  %v1920_v24 = vld [vmem:[%s2524_s0 + $0x48] sm:$0xff]   ;;  %v1924_v28 = vld [vmem:[%s2524_s0 + $0x40] sm:$0xff]   ;;  %v1934_v36 = vld [vmem:[%s2524_s0 + $0x178] sm:$0xff]  }
  0x14   : > { %1715 = vmatprep.subr.bf16.mxu1 %v1905_v9  ;;  %v1921_v25 = vld [vmem:[%s2524_s0 + $0xc8] sm:$0xff]   ;;  %v1925_v29 = vld [vmem:[%s2524_s0 + $0xc0] sm:$0xff]   ;;  %v1935_v37 = vld [vmem:[%s2524_s0 + $0x138] sm:$0xff]  }
  0x15   : > { %v1922_v26 = vld [vmem:[%s2524_s0 + $0x8] sm:$0xff]   ;;  %v1926_v30 = vld [vmem:[%s2524_s0] sm:$0xff]   ;;  %v1936_v38 = vld [vmem:[%s2161_s23 + $0x3c] ss:$28 sps:$4 sm:$0xff]  }
  0x16   : > { %1652 = vmatpush3.bf16.msra.mxu0 %v1906_v10  ;;  %v1923_v27 = vld [vmem:[%s2524_s0 + $0x88] sm:$0xff]   ;;  %v1927_v31 = vld [vmem:[%s2524_s0 + $0x80] sm:$0xff]   ;;  %v1940_v40 = vld [vmem:[%s2161_s23 + $0x38] ss:$28 sps:$4 sm:$0xff]  }
  0x17   : > { %1716 = vmatpush3.bf16.msra.mxu1 %v1907_v11  ;;  %1653 = vmatprep.subr.bf16.mxu0 %v1908_v12  ;;  %v1928_v32 = vld [vmem:[%s2161_s23] ss:$28 sps:$4 sm:$0xff]   ;;  %v1931_v34 = vld [vmem:[%s2161_s23 + $0x8] ss:$28 sps:$4 sm:$0xff]   ;;  %v1942_v42 = vld [vmem:[%s2524_s0 + $0x170] sm:$0xff]  }
  0x18   : > { %1717 = vmatprep.subr.bf16.mxu1 %v1909_v13  ;;  %v1930_v33 = vld [vmem:[%s2161_s23 + $0x4] ss:$28 sps:$4 sm:$0xff]   ;;  %v1933_v35 = vld [vmem:[%s2161_s23 + $0xc] ss:$28 sps:$4 sm:$0xff]   ;;  %v1943_v43 = vld [vmem:[%s2524_s0 + $0x130] sm:$0xff]  }
  0x19   : > { %983 = vmatprep.mubr.bf16.mxu0 %v1930_v33  ;;  %1080 = vmatprep.mubr.bf16.mxu1 %v1933_v35  ;;  %v1938_v39 = vld [vmem:[%s2161_s23 + $0x44] ss:$28 sps:$4 sm:$0xff]   ;;  %v1944_v44 = vld [vmem:[%s2161_s23 + $0x74] ss:$28 sps:$4 sm:$0xff]   ;;  %v1946_v45 = vld [vmem:[%s2161_s23 + $0x7c] ss:$28 sps:$4 sm:$0xff]  }
  0x1a   : > { %1654 = vmatpush3.bf16.msra.mxu0 %v1910_v14  ;;  %v1941_v41 = vld [vmem:[%s2161_s23 + $0x40] ss:$28 sps:$4 sm:$0xff]   ;;  %v1950_v46 = vld [vmem:[%s2524_s0 + $0x168] sm:$0xff]   ;;  %v1949_v49 = vld [vmem:[%s2161_s23 + $0x78] ss:$28 sps:$4 sm:$0xff]  }
  0x1b   : > { %1718 = vmatpush3.bf16.msra.mxu1 %v1911_v15  ;;  %1655 = vmatprep.subr.bf16.mxu0 %v1912_v16  ;;  %v1951_v47 = vld [vmem:[%s2524_s0 + $0x128] sm:$0xff]   ;;  %v1954_v51 = vld [vmem:[%s2161_s23 + $0xb4] ss:$28 sps:$4 sm:$0xff]   ;;  %v1958_v52 = vld [vmem:[%s2524_s0 + $0x160] sm:$0xff]  }
  0x1c   : > { %1719 = vmatprep.subr.bf16.mxu1 %v1913_v17  ;;  %v1948_v48 = vld [vmem:[%s2161_s23 + $0x70] ss:$28 sps:$4 sm:$0xff]   ;;  %v1959_v53 = vld [vmem:[%s2524_s0 + $0x120] sm:$0xff]   ;;  %v1966_v55 = vld [vmem:[%s2524_s0 + $0x158] sm:$0xff]  }
  0x1d   : > { %v1952_v50 = vld [vmem:[%s2161_s23 + $0xac] ss:$28 sps:$4 sm:$0xff]   ;;  %v1967_v57 = vld [vmem:[%s2524_s0 + $0x118] sm:$0xff]   ;;  %v1960_v59 = vld [vmem:[%s2161_s23 + $0xe4] ss:$28 sps:$4 sm:$0xff]  }
  0x1e   : > { %1656 = vmatpush3.bf16.msra.mxu0 %v1914_v18  ;;  %v1956_v54 = vld [vmem:[%s2161_s23 + $0xa8] ss:$28 sps:$4 sm:$0xff]   ;;  %v1957_v56 = vld [vmem:[%s2161_s23 + $0xb0] ss:$28 sps:$4 sm:$0xff]   ;;  %v1968_v58 = vld [vmem:[%s2524_s0 + $0x1b8] sm:$0xff]  }
  0x1f   : > { %1720 = vmatpush3.bf16.msra.mxu1 %v1915_v19  ;;  %1657 = vmatprep.subr.bf16.mxu0 %v1916_v20  ;;  %v1962_v60 = vld [vmem:[%s2161_s23 + $0xec] ss:$28 sps:$4 sm:$0xff]   ;;  %v1975_v61 = vld [vmem:[%s2524_s0 + $0x150] sm:$0xff]   ;;  %v1964_v1 = vld [vmem:[%s2161_s23 + $0xe0] ss:$28 sps:$4 sm:$0xff]  }
  0x20   : > { %1721 = vmatprep.subr.bf16.mxu1 %v1917_v21  ;;  %v1976_v62 = vld [vmem:[%s2524_s0 + $0x1b0] sm:$0xff]   ;;  %v1978_v0 = vld [vmem:[%s2524_s0 + $0x1a8] sm:$0xff]   ;;  %v1969_v3 = vld [vmem:[%s2161_s23 + $0x11c] ss:$28 sps:$4 sm:$0xff]  }
  0x21   : > { %v1977_v63 = vld [vmem:[%s2524_s0 + $0x110] sm:$0xff]   ;;  %v1965_v2 = vld [vmem:[%s2161_s23 + $0xe8] ss:$28 sps:$4 sm:$0xff]   ;;  %v1988_v8 = vld [vmem:[%s2524_s0 + $0x198] sm:$0xff]  }
  0x22   : > { %1658 = vmatpush3.bf16.msra.mxu0 %v1918_v22  ;;  %v1971_v4 = vld [vmem:[%s2161_s23 + $0x124] ss:$28 sps:$4 sm:$0xff]   ;;  %v1985_v5 = vld [vmem:[%s2524_s0 + $0x148] sm:$0xff]   ;;  %v1973_v9 = vld [vmem:[%s2161_s23 + $0x118] ss:$28 sps:$4 sm:$0xff]  }
  0x23   : > { %1722 = vmatpush3.bf16.msra.mxu1 %v1919_v23  ;;  %1659 = vmatprep.subr.bf16.mxu0 %v1920_v24  ;;  %v1986_v6 = vld [vmem:[%s2524_s0 + $0x1a0] sm:$0xff]   ;;  %v1987_v7 = vld [vmem:[%s2524_s0 + $0x108] sm:$0xff]   ;;  %v1979_v11 = vld [vmem:[%s2161_s23 + $0x154] ss:$28 sps:$4 sm:$0xff]  }
  0x24   : > { %1723 = vmatprep.subr.bf16.mxu1 %v1921_v25  ;;  %v1974_v10 = vld [vmem:[%s2161_s23 + $0x120] ss:$28 sps:$4 sm:$0xff]   ;;  %v1996_v14 = vld [vmem:[%s2524_s0 + $0x190] sm:$0xff]   ;;  %v1998_v16 = vld [vmem:[%s2524_s0 + $0x188] sm:$0xff]  }
  0x25   : > { %v1981_v12 = vld [vmem:[%s2161_s23 + $0x15c] ss:$28 sps:$4 sm:$0xff]   ;;  %v1995_v13 = vld [vmem:[%s2524_s0 + $0x140] sm:$0xff]   ;;  %v1983_v17 = vld [vmem:[%s2161_s23 + $0x150] ss:$28 sps:$4 sm:$0xff]  }
  0x26   : > { %1660 = vmatpush3.bf16.msra.mxu0 %v1922_v26  ;;  %v1997_v15 = vld [vmem:[%s2524_s0 + $0x100] sm:$0xff]   ;;  %v1984_v18 = vld [vmem:[%s2161_s23 + $0x158] ss:$28 sps:$4 sm:$0xff]   ;;  %v1989_v19 = vld [vmem:[%s2161_s23 + $0x18c] ss:$28 sps:$4 sm:$0xff]  }
  0x27   : > { %1724 = vmatpush3.bf16.msra.mxu1 %v1923_v27  ;;  %1661 = vmatprep.subr.bf16.mxu0 %v1924_v28  ;;  %v1991_v20 = vld [vmem:[%s2161_s23 + $0x194] ss:$28 sps:$4 sm:$0xff]   ;;  %v2002_v21 = vld [vmem:[%s2524_s0 + $0x180] sm:$0xff]   ;;  %v2005_v28 = vld [vmem:[%s2161_s23 + $0x4c] ss:$28 sps:$4 sm:$0xff]  }
  0x28   : > { %1725 = vmatprep.subr.bf16.mxu1 %v1925_v29  ;;  %v1993_v22 = vld [vmem:[%s2161_s23 + $0x188] ss:$28 sps:$4 sm:$0xff]   ;;  %v1994_v23 = vld [vmem:[%s2161_s23 + $0x190] ss:$28 sps:$4 sm:$0xff]   ;;  %v2003_v25 = vld [vmem:[%s2161_s23 + $0x18] ss:$28 sps:$4 sm:$0xff]  }
  0x29   : > { %v2001_v24 = vld [vmem:[%s2161_s23 + $0x14] ss:$28 sps:$4 sm:$0xff]   ;;  %v2011_v29 = vld [vmem:[%s2161_s23 + $0x88] ss:$28 sps:$4 sm:$0xff]   ;;  %v2013_v35 = vld [vmem:[%s2161_s23 + $0xbc] ss:$28 sps:$4 sm:$0xff]  }
  0x2a   : > { %1662 = vmatpush3.bf16.msra.mxu0 %v1926_v30  ;;  %v1999_v26 = vld [vmem:[%s2161_s23 + $0x10] ss:$28 sps:$4 sm:$0xff]   ;;  %v2007_v30 = vld [vmem:[%s2161_s23 + $0x48] ss:$28 sps:$4 sm:$0xff]   ;;  %v2019_v33 = vld [vmem:[%s2161_s23 + $0xf8] ss:$28 sps:$4 sm:$0xff]  }
  0x2b   : > { %1726 = vmatpush3.bf16.msra.mxu1 %v1927_v31  ;;  %1775 = vmatprep.subr.bf16.mxu0 %v1934_v36  ;;  %v2004_v27 = vld [vmem:[%s2161_s23 + $0x50] ss:$28 sps:$4 sm:$0xff]   ;;  %v2008_v31 = vld [vmem:[%s2161_s23 + $0x84] ss:$28 sps:$4 sm:$0xff]  }
  0x2c   : > { %1855 = vmatprep.subr.bf16.mxu1 %v1968_v58  ;;  %v2020_v36 = vld [vmem:[%s2161_s23 + $0x130] ss:$28 sps:$4 sm:$0xff]  }
  0x2d   : > { %984 = vmatmul.mubr.bf16.vlgmr.msra.gmra.mxu0 %v1928_v32  ;;  %v2012_v32 = vld [vmem:[%s2161_s23 + $0xc0] ss:$28 sps:$4 sm:$0xff]  }
  0x2e   : > { %1081 = vmatmul.mubr.bf16.vlgmr.msra.gmra.mxu1 %v1931_v34  ;;  %1776 = vmatpush3.bf16.msra.mxu0 %v1935_v37  ;;  %v2010_v34 = vld [vmem:[%s2161_s23 + $0x80] ss:$28 sps:$4 sm:$0xff]   ;;  %v2027_v37 = vld [vmem:[%s2161_s23 + $0x168] ss:$28 sps:$4 sm:$0xff]  }
  0x2f   : > { %991 = vmatprep.mubr.bf16.mxu0 %v1936_v38  ;;  %1088 = vmatprep.mubr.bf16.mxu1 %v1938_v39  ;;  %v2015_v38 = vld [vmem:[%s2161_s23 + $0xb8] ss:$28 sps:$4 sm:$0xff]  }
  0x30   : > { %1777 = vmatprep.subr.bf16.mxu0 %v1942_v42  ;;  %1856 = vmatpush3.bf16.msra.mxu1 %v1968_v58  ;;  %v2016_v39 = vld [vmem:[%s2161_s23 + $0xf4] ss:$28 sps:$4 sm:$0xff]   ;;  %v2021_v42 = vld [vmem:[%s2161_s23 + $0x12c] ss:$28 sps:$4 sm:$0xff]  }
  0x31   : > { %1857 = vmatprep.subr.bf16.mxu1 %v1976_v62 }
  0x32   : > { %1778 = vmatpush3.bf16.msra.mxu0 %v1943_v43  ;;  %v2023_v43 = vld [vmem:[%s2161_s23 + $0x128] ss:$28 sps:$4 sm:$0xff]  }
  0x33   : > { %1779 = vmatprep.subr.bf16.mxu0 %v1950_v46  ;;  %v2029_v46 = vld [vmem:[%s2161_s23 + $0x19c] ss:$28 sps:$4 sm:$0xff]  }
  0x34   : > { %1858 = vmatpush3.bf16.msra.mxu1 %v1976_v62 }
  0x35   : > { %992 = vmatmul.mubr.bf16.gmra.mxu0 %v1940_v40  ;;  %1859 = vmatprep.subr.bf16.mxu1 %v1978_v0  ;;  %v2028_v40 = vld [vmem:[%s2161_s23 + $0x1a0] ss:$28 sps:$4 sm:$0xff]  }
  0x36   : > { %1089 = vmatmul.mubr.bf16.gmra.mxu1 %v1941_v41  ;;  %999 = vmatprep.mubr.bf16.mxu0 %v1944_v44  ;;  %v2018_v41 = vld [vmem:[%s2161_s23 + $0xf0] ss:$28 sps:$4 sm:$0xff]   ;;  %v2024_v44 = vld [vmem:[%s2161_s23 + $0x164] ss:$28 sps:$4 sm:$0xff]  }
  0x37   : > { %1096 = vmatprep.mubr.bf16.mxu1 %v1946_v45  ;;  %1780 = vmatpush3.bf16.msra.mxu0 %v1951_v47  ;;  %v2026_v45 = vld [vmem:[%s2161_s23 + $0x160] ss:$28 sps:$4 sm:$0xff]   ;;  %v2031_v47 = vld [vmem:[%s2161_s23 + $0x198] ss:$28 sps:$4 sm:$0xff]   ;;  %s1500_s23 = sshll.u32 %s2556_s15, 2 }
  0x38   : > { %1781 = vmatprep.subr.bf16.mxu0 %v1958_v52  ;;  %1860 = vmatpush3.bf16.msra.mxu1 %v1978_v0  ;;  %s2437_s27 = scalar_lea.vmem %s2526_s2, %s1500_s23 }
  0x39   : > { %1861 = vmatprep.subr.bf16.mxu1 %v1986_v6 }
  0x3b   : > { %1782 = vmatpush3.bf16.msra.mxu0 %v1959_v53 }
  0x3c   : > { %1783 = vmatprep.subr.bf16.mxu0 %v1966_v55  ;;  %1862 = vmatpush3.bf16.msra.mxu1 %v1986_v6 }
  0x3d   : > { %1000 = vmatmul.mubr.bf16.gmra.mxu0 %v1948_v48  ;;  %1863 = vmatprep.subr.bf16.mxu1 %v1988_v8 }
  0x3e   : > { %1097 = vmatmul.mubr.bf16.gmra.mxu1 %v1949_v49  ;;  %1007 = vmatprep.mubr.bf16.mxu0 %v1952_v50 }
  0x3f   : > { %1104 = vmatprep.mubr.bf16.mxu1 %v1954_v51  ;;  %1784 = vmatpush3.bf16.msra.mxu0 %v1967_v57 }
  0x40   : > { %1785 = vmatprep.subr.bf16.mxu0 %v1975_v61  ;;  %1864 = vmatpush3.bf16.msra.mxu1 %v1988_v8 }
  0x41   : > { %1865 = vmatprep.subr.bf16.mxu1 %v1996_v14 }
  0x43   : > { %1786 = vmatpush3.bf16.msra.mxu0 %v1977_v63 }
  0x44   : > { %1787 = vmatprep.subr.bf16.mxu0 %v1985_v5  ;;  %1866 = vmatpush3.bf16.msra.mxu1 %v1996_v14 }
  0x45   : > { %1008 = vmatmul.mubr.bf16.gmra.mxu0 %v1956_v54  ;;  %1867 = vmatprep.subr.bf16.mxu1 %v1998_v16 }
  0x46   : > { %1105 = vmatmul.mubr.bf16.gmra.mxu1 %v1957_v56  ;;  %1015 = vmatprep.mubr.bf16.mxu0 %v1960_v59 }
  0x47   : > { %1112 = vmatprep.mubr.bf16.mxu1 %v1962_v60  ;;  %1788 = vmatpush3.bf16.msra.mxu0 %v1987_v7 }
  0x48   : > { %1789 = vmatprep.subr.bf16.mxu0 %v1995_v13  ;;  %1868 = vmatpush3.bf16.msra.mxu1 %v1998_v16 }
  0x49   : > { %1869 = vmatprep.subr.bf16.mxu1 %v2002_v21 }
  0x4b   : > { %1790 = vmatpush3.bf16.msra.mxu0 %v1997_v15 }
  0x4c   : > { %1870 = vmatpush3.bf16.msra.mxu1 %v2002_v21 }
  0x4d   : > { %1016 = vmatmul.mubr.bf16.gmra.mxu0 %v1964_v1 }
  0x4e   : > { %1113 = vmatmul.mubr.bf16.gmra.mxu1 %v1965_v2  ;;  %1023 = vmatprep.mubr.bf16.mxu0 %v1969_v3 }
  0x4f   : > { %1120 = vmatprep.mubr.bf16.mxu1 %v1971_v4 }
  0x55   : > { %1024 = vmatmul.mubr.bf16.gmra.mxu0 %v1973_v9 }
  0x56   : > { %1121 = vmatmul.mubr.bf16.gmra.mxu1 %v1974_v10  ;;  %1031 = vmatprep.mubr.bf16.mxu0 %v1979_v11 }
  0x57   : > { %1128 = vmatprep.mubr.bf16.mxu1 %v1981_v12 }
  0x5d   : > { %1032 = vmatmul.mubr.bf16.gmra.mxu0 %v1983_v17 }
  0x5e   : > { %1129 = vmatmul.mubr.bf16.gmra.mxu1 %v1984_v18  ;;  %1039 = vmatprep.mubr.bf16.mxu0 %v1989_v19 }
  0x5f   : > { %1136 = vmatprep.mubr.bf16.mxu1 %v1991_v20 }
  0x65   : > { %1040 = vmatmul.mubr.bf16.gmra.mxu0 %v1993_v22 }
  0x66   : > { %1137 = vmatmul.mubr.bf16.gmra.mxu1 %v1994_v23  ;;  %1177 = vmatprep.mubr.bf16.mxu0 %v2001_v24 }
  0x67   : > { %1871 = vmatprep.mubr.bf16.mxu1 %v2003_v25 }
  0x6d   : > { %1178 = vmatmul.mubr.bf16.vlgmr.msra.gmra.mxu0 %v1999_v26 }
  0x6e   : > { %1872 = vmatmul.mubr.bf16.vlgmr.msra.gmra.mxu1 %v2004_v27  ;;  %1185 = vmatprep.mubr.bf16.mxu0 %v2005_v28 }
  0x6f   : > { %1875 = vmatprep.mubr.bf16.mxu1 %v2011_v29 }
  0x75   : > { %1186 = vmatmul.mubr.bf16.gmra.mxu0 %v2007_v30 }
  0x76   : > { %1193 = vmatprep.mubr.bf16.mxu0 %v2008_v31  ;;  %1876 = vmatmul.mubr.bf16.gmra.mxu1 %v2012_v32 }
  0x77   : > { %1879 = vmatprep.mubr.bf16.mxu1 %v2019_v33 }
  0x7d   : > { %1194 = vmatmul.mubr.bf16.gmra.mxu0 %v2010_v34 }
  0x7e   : > { %1201 = vmatprep.mubr.bf16.mxu0 %v2013_v35  ;;  %1880 = vmatmul.mubr.bf16.gmra.mxu1 %v2020_v36 }
  0x7f   : > { %1883 = vmatprep.mubr.bf16.mxu1 %v2027_v37 }
  0x85   : > { %1202 = vmatmul.mubr.bf16.gmra.mxu0 %v2015_v38 }
  0x86   : > { %1209 = vmatprep.mubr.bf16.mxu0 %v2016_v39  ;;  %1884 = vmatmul.mubr.bf16.gmra.mxu1 %v2028_v40 }
  0x8d   : > { %1210 = vmatmul.mubr.bf16.gmra.mxu0 %v2018_v41 }
  0x8e   : > { %1217 = vmatprep.mubr.bf16.mxu0 %v2021_v42 }
  0x95   : > { %1218 = vmatmul.mubr.bf16.gmra.mxu0 %v2023_v43 }
  0x96   : > { %1225 = vmatprep.mubr.bf16.mxu0 %v2024_v44 }
  0x9d   : > { %1226 = vmatmul.mubr.bf16.gmra.mxu0 %v2026_v45 }
  0x9e   : > { %1233 = vmatprep.mubr.bf16.mxu0 %v2029_v46 }
  0xa5   : > { %1234 = vmatmul.mubr.bf16.gmra.mxu0 %v2031_v47 }
  0xed   : > { %v2297_v48 = vpop.f32.mrf.mxu0 }
  0xee   : > { %v2299_v49 = vpop.f32.mrf.mxu1 }
  0xef   : > { %v1664_v50 = vpop.f32.mrf.mxu0 }
  0xf0   : > { %v1728_v51 = vpop.f32.mrf.mxu1  ;;  %v1665_v47 = vadd.f32 %v1664_v50, %v2297_v48 }
  0xf1   : > { %v2301_v52 = vpop.f32.mrf.mxu0 }
  0xf2   : > { %v2303_v53 = vpop.f32.mrf.mxu1 }
  0xf3   : > { %v2305_v54 = vpop.f32.mrf.mxu0 }
  0xf4   : > { %v2307_v55 = vpop.f32.mrf.mxu1 }
  0xf5   : > { %v2309_v56 = vpop.f32.mrf.mxu0 }
  0xf6   : > { %v2311_v57 = vpop.f32.mrf.mxu1 }
  0xf7   : > { %v2313_v58 = vpop.f32.mrf.mxu0 }
  0xf8   : > { %v2315_v59 = vpop.f32.mrf.mxu1 }
  0xf9   : > { %v2317_v60 = vpop.f32.mrf.mxu0  ;;  %v1735_v50 = vadd.f32 %v2315_v59, %v2311_v57 }
  0xfa   : > { %v2319_v61 = vpop.f32.mrf.mxu1 }
  0xfb   : > { %v2321_v62 = vpop.f32.mrf.mxu0 }
  0xfc   : > { %v2323_v63 = vpop.f32.mrf.mxu1 }
  0xfd   : > { %v2325_v0 = vpop.f32.mrf.mxu0  ;;  %v1738_v57 = vadd.f32 %v2323_v63, %v2319_v61 }
  0xfe   : > { %v2327_v1 = vpop.f32.mrf.mxu1 }
  0xff   : > { %v2329_v2 = vpop.f32.mrf.mxu0 }
 0x100   : > { %v2331_v3 = vpop.f32.mrf.mxu1 }
 0x101   : > { %v2333_v4 = vpop.f32.mrf.mxu0 }
 0x102   : > { %v2335_v5 = vpop.f32.mrf.mxu1 }
 0x103   : > { %v2337_v6 = vpop.f32.mrf.mxu0 }
 0x104   : > { %v2339_v7 = vpop.f32.mrf.mxu1 }
 0x105   : > { %v2341_v8 = vpop.f32.mrf.mxu0 }
 0x106   : > { %v2343_v9 = vpop.f32.mrf.mxu1 }
 0x107   : > { %v2345_v10 = vpop.f32.mrf.mxu0 }
 0x108   : > { %v2347_v11 = vpop.f32.mrf.mxu1 }
 0x109   : > { %v2349_v12 = vpop.f32.mrf.mxu0 }
 0x10a   : > { %v2351_v13 = vpop.f32.mrf.mxu1 }
 0x10b   : > { %v2353_v14 = vpop.f32.mrf.mxu0 }
 0x10c   : > { %v2355_v15 = vpop.f32.mrf.mxu1 }
 0x10d   : > { %v2357_v16 = vpop.f32.mrf.mxu0 }
 0x10e   : > { %v2359_v17 = vpop.f32.mrf.mxu1 }
 0x10f   : > { %v2361_v18 = vpop.f32.mrf.mxu0 }
 0x110   : > { %v2363_v19 = vpop.f32.mrf.mxu1 }
 0x111   : > { %v2365_v20 = vpop.f32.mrf.mxu0 }
 0x112   : > { %v2367_v21 = vpop.f32.mrf.mxu1 }
 0x113   : > { %v2369_v22 = vpop.f32.mrf.mxu0 }
 0x114   : > { %v2371_v23 = vpop.f32.mrf.mxu1 }
 0x115   : > { %v2373_v24 = vpop.f32.mrf.mxu0 }
 0x116   : > { %v2375_v25 = vpop.f32.mrf.mxu1 }
 0x117   : > { %v2377_v26 = vpop.f32.mrf.mxu0 }
 0x118   : > { %v2379_v27 = vpop.f32.mrf.mxu1 }
 0x119   : > { %v2381_v28 = vpop.f32.mrf.mxu0 }
 0x11a   : > { %v2383_v29 = vpop.f32.mrf.mxu1 }
 0x11b   : > { %v2385_v30 = vpop.f32.mrf.mxu0 }
 0x11c   : > { %v2387_v31 = vpop.f32.mrf.mxu1 }
 0x11d   : > { %v2389_v32 = vpop.f32.mrf.mxu0 }
 0x11e   : > { %v2391_v33 = vpop.f32.mrf.mxu1 }
 0x11f   : > { %2527 = vst [vmem:[#allocation2_spill] sm:$0xff] %v2391_v33  ;;  %v2393_v34 = vpop.f32.mrf.mxu0 }
 0x120   : > { %v2395_v35 = vpop.f32.mrf.mxu1 }
 0x121   : > { %2528 = vst [vmem:[#allocation3_spill] sm:$0xff] %v2395_v35  ;;  %v2397_v36 = vpop.f32.mrf.mxu0 }
 0x122   : > { %2529 = vst [vmem:[#allocation4_spill] sm:$0xff] %v2397_v36  ;;  %v2399_v37 = vpop.f32.mrf.mxu1 }
 0x123   : > { %2530 = vst [vmem:[#allocation5_spill] sm:$0xff] %v2399_v37  ;;  %v2401_v38 = vpop.f32.mrf.mxu0  ;;  %v1729_v37 = vadd.f32 %v1728_v51, %v2299_v49  ;;  %v1671_v49 = vadd.f32 %v2313_v58, %v2309_v56 }
 0x124   : > { %2531 = vst [vmem:[#allocation6_spill] sm:$0xff] %v2401_v38  ;;  %v2403_v39 = vpop.f32.mrf.mxu1 }
 0x125   : > { %2532 = vst [vmem:[#allocation7_spill] sm:$0xff] %v2403_v39  ;;  %v2405_v40 = vpop.f32.mrf.mxu0  ;;  %v1083_v36 = vadd.f32 %v1729_v37, %v1665_v47 }
 0x126   : > { %2533 = vst [vmem:[#allocation8_spill] sm:$0xff] %v2405_v40  ;;  %v2407_v41 = vpop.f32.mrf.mxu1 }
 0x127   : > { %2534 = vst [vmem:[#allocation9_spill] sm:$0xff] %v2407_v41  ;;  %v2409_v42 = vpop.f32.mrf.mxu0 }
 0x128   : > { %2535 = vst [vmem:[#allocation10_spill] sm:$0xff] %v2409_v42  ;;  %v2411_v43 = vpop.f32.mrf.mxu1 }
 0x129   : > { %2536 = vst [vmem:[#allocation11_spill] sm:$0xff] %v2411_v43  ;;  %v2413_v44 = vpop.f32.mrf.mxu0  ;;  %v1668_v43 = vadd.f32 %v2305_v54, %v2301_v52 }
 0x12a   : > { %2537 = vst [vmem:[#allocation12_spill] sm:$0xff] %v2413_v44  ;;  %v2415_v45 = vpop.f32.mrf.mxu1  ;;  %v1732_v44 = vadd.f32 %v2307_v55, %v2303_v53  ;;  %v1091_v55 = vadd.f32 %v1735_v50, %v1671_v49 }
 0x12b   : > { %2538 = vst [vmem:[#allocation13_spill] sm:$0xff] %v2415_v45  ;;  %v2417_v46 = vpop.f32.mrf.mxu0 }
 0x12c   : > { %2539 = vst [vmem:[#allocation14_spill] sm:$0xff] %v2417_v46  ;;  %v2421_v38 = vpop.f32.mrf.mxu1 }
 0x12d   : > { %2540 = vst [vmem:[#allocation15_spill] sm:$0xff] %v2421_v38  ;;  %v1791_v39 = vpop.f32.mrf.mxu0  ;;  %v1086_v38 = vadd.f32 %v1732_v44, %v1668_v43 }
 0x12e   : > { %v1873_v40 = vpop.f32.mrf.mxu1 }
 0x12f   : > { %v1792_v41 = vpop.f32.mrf.mxu0 }
 0x130   : > { %v1793_v45 = vadd.f32 %v1792_v41, %v1791_v39  ;;  %v1276_v42 = vpop.f32.mrf.mxu1  ;;  %v1677_v41 = vadd.f32 %v2329_v2, %v2325_v0 }
 0x131   : > { %v1794_v46 = vpop.f32.mrf.mxu0 }
 0x132   : > { %v1180_v35 = vadd.f32 %v1793_v45, %v1083_v36  ;;  %v1874_v48 = vpop.f32.mrf.mxu1  ;;  %v1674_v36 = vadd.f32 %v2321_v62, %v2317_v60 }
 0x133   : > { %v1795_v51 = vpop.f32.mrf.mxu0 }
 0x134   : > { %v1796_v37 = vadd.f32 %v1795_v51, %v1794_v46  ;;  %v1277_v47 = vadd.f32 %v1276_v42, %v1180_v35  ;;  %v1279_v54 = vpop.f32.mrf.mxu1  ;;  %v1741_v42 = vadd.f32 %v2331_v3, %v2327_v1  ;;  %v1094_v44 = vadd.f32 %v1738_v57, %v1674_v36 }
 0x135   : > { %v1797_v52 = vpop.f32.mrf.mxu0  ;;  %v1744_v1 = vadd.f32 %v2339_v7, %v2335_v5 }
 0x136   : > { %v1339_v33 = vmax.f32 %v1277_v47, 0.0  ;;  %v1183_v53 = vadd.f32 %v1796_v37, %v1086_v38  ;;  %v1877_v39 = vpop.f32.mrf.mxu1  ;;  %v1099_v51 = vadd.f32 %v1741_v42, %v1677_v41  ;;  %v1680_v37 = vadd.f32 %v2337_v6, %v2333_v4 }
 0x137   : > { %v1798_v56 = vpop.f32.mrf.mxu0  ;;  %v1747_v4 = vadd.f32 %v2347_v11, %v2343_v9  ;;  %v1750_v9 = vadd.f32 %v2355_v15, %v2351_v13 }
 0x138   : > { %v1631_v58 = vpack.c.bf16 %v1339_v33, %v1339_v33  ;;  %v1799_v59 = vadd.f32 %v1798_v56, %v1797_v52  ;;  %v1280_v35 = vadd.f32 %v1279_v54, %v1183_v53  ;;  %v1292_v46 = vpop.f32.mrf.mxu1  ;;  %v1102_v36 = vadd.f32 %v1744_v1, %v1680_v37 }
 0x139   : > { %v1800_v38 = vpop.f32.mrf.mxu0 }
 0x13a   : > { %1420 = vst.msk [vmem:[%s2437_s27] sm:$0xf] %vm1419_vm0, %v1631_v58  ;;  %v1188_v60 = vadd.f32 %v1799_v59, %v1091_v55  ;;  %v1340_v62 = vmax.f32 %v1280_v35, 0.0  ;;  %v1878_v52 = vpop.f32.mrf.mxu1  ;;  %v1683_v55 = vadd.f32 %v2345_v10, %v2341_v8 }
 0x13b   : > { %v1801_v43 = vpop.f32.mrf.mxu0 }
 0x13c   : > { %v1285_v45 = vadd.f32 %v1873_v40, %v1188_v60  ;;  %v1632_v61 = vpack.c.bf16 %v1340_v62, %v1340_v62  ;;  %v1802_v63 = vadd.f32 %v1801_v43, %v1800_v38  ;;  %v1295_v57 = vpop.f32.mrf.mxu1  ;;  %v1107_v35 = vadd.f32 %v1747_v4, %v1683_v55 }
 0x13d   : > { %v1803_v33 = vpop.f32.mrf.mxu0  ;;  %v1686_v38 = vadd.f32 %v2353_v14, %v2349_v12  ;;  %v1753_v12 = vadd.f32 %v2363_v19, %v2359_v17  ;;  %v1756_v17 = vadd.f32 %v2371_v23, %v2367_v21 }
 0x13e   : > { %v1341_v49 = vmax.f32 %v1285_v45, 0.0  ;;  %1421 = vst.msk [vmem:[%s2437_s27 + $0x4] sm:$0xf] %vm1419_vm0, %v1632_v61  ;;  %v1191_v50 = vadd.f32 %v1802_v63, %v1094_v44  ;;  %v1881_v41 = vpop.f32.mrf.mxu1  ;;  %v1689_v44 = vadd.f32 %v2361_v18, %v2357_v16 }
 0x13f   : > { %v1804_v0 = vpop.f32.mrf.mxu0  ;;  %v1110_v45 = vadd.f32 %v1750_v9, %v1686_v38 }
 0x140   : > { %v1633_v2 = vpack.c.bf16 %v1341_v49, %v1341_v49  ;;  %v1288_v3 = vadd.f32 %v1874_v48, %v1191_v50  ;;  %v1805_v40 = vadd.f32 %v1804_v0, %v1803_v33  ;;  %v1308_v33 = vpop.f32.mrf.mxu1  ;;  %v1115_v50 = vadd.f32 %v1753_v12, %v1689_v44  ;;  %v2546_v44 = vld [vmem:[#allocation7_spill] sm:$0xff] }
 0x141   : > { %v1806_v47 = vpop.f32.mrf.mxu0 }
 0x142   : > { %1422 = vst.msk [vmem:[%s2437_s27 + $0x8] sm:$0xf] %vm1419_vm0, %v1633_v2  ;;  %v1342_v54 = vmax.f32 %v1288_v3, 0.0  ;;  %v1196_v53 = vadd.f32 %v1805_v40, %v1099_v51  ;;  %v1692_v51 = vadd.f32 %v2369_v22, %v2365_v20  ;;  %v1882_v0 = vpop.f32.mrf.mxu1  ;;  %v1695_v3 = vadd.f32 %v2377_v26, %v2373_v24 }
 0x143   : > { %v1807_v6 = vpop.f32.mrf.mxu0  ;;  %v1759_v20 = vadd.f32 %v2379_v27, %v2375_v25  ;;  %v1762_v25 = vadd.f32 %v2387_v31, %v2383_v29 }
 0x144   : > { %v1634_v56 = vpack.c.bf16 %v1342_v54, %v1342_v54  ;;  %v1808_v5 = vadd.f32 %v1807_v6, %v1806_v47  ;;  %v1293_v7 = vadd.f32 %v1292_v46, %v1196_v53  ;;  %v1118_v40 = vadd.f32 %v1756_v17, %v1692_v51  ;;  %v1311_v54 = vpop.f32.mrf.mxu1  ;;  %v2550_v51 = vld [vmem:[#allocation11_spill] sm:$0xff] }
 0x145   : > { %v1809_v48 = vpop.f32.mrf.mxu0  ;;  %v1123_v4 = vadd.f32 %v1759_v20, %v1695_v3  ;;  %v1698_v6 = vadd.f32 %v2385_v30, %v2381_v28 }
 0x146   : > { %1423 = vst.msk [vmem:[%s2437_s27 + $0xc] sm:$0xf] %vm1419_vm0, %v1634_v56  ;;  %v1343_v58 = vmax.f32 %v1293_v7, 0.0  ;;  %v1199_v59 = vadd.f32 %v1808_v5, %v1102_v36  ;;  %v1885_v5 = vpop.f32.mrf.mxu1 }
 0x147   : > { %v1810_v8 = vpop.f32.mrf.mxu0 }
 0x148   : > { %v1635_v10 = vpack.c.bf16 %v1343_v58, %v1343_v58  ;;  %v1811_v11 = vadd.f32 %v1810_v8, %v1809_v48  ;;  %v1296_v60 = vadd.f32 %v1295_v57, %v1199_v59  ;;  %v1701_v57 = vadd.f32 %v2393_v34, %v2389_v32  ;;  %v2541_v58 = vld [vmem:[#allocation2_spill] sm:$0xff]  ;;  %v2542_v59 = vld [vmem:[#allocation3_spill] sm:$0xff]  ;;  %v1324_v9 = vpop.f32.mrf.mxu1  ;;  %v2545_v34 = vld [vmem:[#allocation5_spill] sm:$0xff] }
 0x149   : > { %v1812_v62 = vpop.f32.mrf.mxu0  ;;  %v1765_v28 = vadd.f32 %v2542_v59, %v2541_v58  ;;  %v1768_v12 = vadd.f32 %v2546_v44, %v2545_v34 }
 0x14a   : > { %1424 = vst.msk [vmem:[%s2437_s27 + $0x10] sm:$0xf] %vm1419_vm0, %v1635_v10  ;;  %v1204_v42 = vadd.f32 %v1811_v11, %v1107_v35  ;;  %v1344_v43 = vmax.f32 %v1296_v60, 0.0  ;;  %v1126_v35 = vadd.f32 %v1762_v25, %v1698_v6 }
 0x14b   : > { %v1813_v14 = vpop.f32.mrf.mxu0  ;;  %v1131_v60 = vadd.f32 %v1765_v28, %v1701_v57 }
 0x14c   : > { %v1301_v61 = vadd.f32 %v1877_v39, %v1204_v42  ;;  %v1636_v13 = vpack.c.bf16 %v1344_v43, %v1344_v43  ;;  %v1814_v15 = vadd.f32 %v1813_v14, %v1812_v62  ;;  %v2543_v62 = vld [vmem:[#allocation4_spill] sm:$0xff]  ;;  %v2544_v42 = vld [vmem:[#allocation6_spill] sm:$0xff] }
 0x14d   : > { %v1815_v63 = vpop.f32.mrf.mxu0  ;;  %v1704_v43 = vadd.f32 %v2544_v42, %v2543_v62 }
 0x14e   : > { %v1345_v46 = vmax.f32 %v1301_v61, 0.0  ;;  %1425 = vst.msk [vmem:[%s2437_s27 + $0x14] sm:$0xf] %vm1419_vm0, %v1636_v13  ;;  %v1207_v49 = vadd.f32 %v1814_v15, %v1110_v45  ;;  %v1886_v13 = vpop.f32.mrf.mxu1 }
 0x14f   : > { %v1816_v16 = vpop.f32.mrf.mxu0 }
 0x150   : > { %v1637_v18 = vpack.c.bf16 %v1345_v46, %v1345_v46  ;;  %v1304_v19 = vadd.f32 %v1878_v52, %v1207_v49  ;;  %v1817_v39 = vadd.f32 %v1816_v16, %v1815_v63  ;;  %v2548_v46 = vld [vmem:[#allocation10_spill] sm:$0xff] }
 0x151   : > { %v1818_v37 = vpop.f32.mrf.mxu0 }
 0x152   : > { %1426 = vst.msk [vmem:[%s2437_s27 + $0x18] sm:$0xf] %vm1419_vm0, %v1637_v18  ;;  %v1346_v1 = vmax.f32 %v1304_v19, 0.0  ;;  %v1212_v2 = vadd.f32 %v1817_v39, %v1115_v50  ;;  %v2549_v50 = vld [vmem:[#allocation9_spill] sm:$0xff]  ;;  %v1134_v18 = vadd.f32 %v1768_v12, %v1704_v43 }
 0x153   : > { %v1819_v22 = vpop.f32.mrf.mxu0  ;;  %v1771_v16 = vadd.f32 %v2550_v51, %v2549_v50 }
 0x154   : > { %v1638_v47 = vpack.c.bf16 %v1346_v1, %v1346_v1  ;;  %v1820_v21 = vadd.f32 %v1819_v22, %v1818_v37  ;;  %v1309_v23 = vadd.f32 %v1308_v33, %v1212_v2  ;;  %v2547_v33 = vld [vmem:[#allocation8_spill] sm:$0xff]  ;;  %v1327_v1 = vpop.f32.mrf.mxu1 }
 0x155   : > { %v1821_v52 = vpop.f32.mrf.mxu0  ;;  %v1707_v49 = vadd.f32 %v2548_v46, %v2547_v33  ;;  %v2551_v22 = vld [vmem:[#allocation12_spill] sm:$0xff] }
 0x156   : > { %1427 = vst.msk [vmem:[%s2437_s27 + $0x1c] sm:$0xf] %vm1419_vm0, %v1638_v47  ;;  %v1347_v53 = vmax.f32 %v1309_v23, 0.0  ;;  %v1215_v55 = vadd.f32 %v1820_v21, %v1118_v40  ;;  %v2552_v40 = vld [vmem:[#allocation14_spill] sm:$0xff]  ;;  %v2553_v23 = vld [vmem:[#allocation13_spill] sm:$0xff] }
 0x157   : > { %v1822_v24 = vpop.f32.mrf.mxu0  ;;  %v1139_v20 = vadd.f32 %v1771_v16, %v1707_v49  ;;  %v1710_v47 = vadd.f32 %v2552_v40, %v2551_v22 }
 0x158   : > { %v1639_v26 = vpack.c.bf16 %v1347_v53, %v1347_v53  ;;  %v1823_v27 = vadd.f32 %v1822_v24, %v1821_v52  ;;  %v1312_v36 = vadd.f32 %v1311_v54, %v1215_v55  ;;  %v2554_v52 = vld [vmem:[#allocation15_spill] sm:$0xff] }
 0x159   : > { %v1824_v56 = vpop.f32.mrf.mxu0  ;;  %v1774_v54 = vadd.f32 %v2554_v52, %v2553_v23 }
 0x15a   : > { %1428 = vst.msk [vmem:[%s2437_s27 + $0x20] sm:$0xf] %vm1419_vm0, %v1639_v26  ;;  %v1220_v7 = vadd.f32 %v1823_v27, %v1123_v4  ;;  %v1348_v48 = vmax.f32 %v1312_v36, 0.0 }
 0x15b   : > { %v1825_v30 = vpop.f32.mrf.mxu0  ;;  %v1142_v27 = vadd.f32 %v1774_v54, %v1710_v47 }
 0x15c   : > { %v1317_v38 = vadd.f32 %v1881_v41, %v1220_v7  ;;  %v1640_v29 = vpack.c.bf16 %v1348_v48, %v1348_v48  ;;  %v1826_v31 = vadd.f32 %v1825_v30, %v1824_v56 }
 0x15d   : > { %v1827_v8 = vpop.f32.mrf.mxu0 }
 0x15e   : > { %v1349_v10 = vmax.f32 %v1317_v38, 0.0  ;;  %1429 = vst.msk [vmem:[%s2437_s27 + $0x24] sm:$0xf] %vm1419_vm0, %v1640_v29  ;;  %v1223_v11 = vadd.f32 %v1826_v31, %v1126_v35 }
 0x15f   : > { %v1828_v32 = vpop.f32.mrf.mxu0 }
 0x160   : > { %v1641_v14 = vpack.c.bf16 %v1349_v10, %v1349_v10  ;;  %v1320_v45 = vadd.f32 %v1882_v0, %v1223_v11  ;;  %v1829_v41 = vadd.f32 %v1828_v32, %v1827_v8 }
 0x161   : > { %v1830_v61 = vpop.f32.mrf.mxu0 }
 0x162   : > { %1430 = vst.msk [vmem:[%s2437_s27 + $0x28] sm:$0xf] %vm1419_vm0, %v1641_v14  ;;  %v1350_v15 = vmax.f32 %v1320_v45, 0.0  ;;  %v1228_v63 = vadd.f32 %v1829_v41, %v1131_v60 }
 0x163   : > { %v1831_v17 = vpop.f32.mrf.mxu0 }
 0x164   : > { %v1642_v19 = vpack.c.bf16 %v1350_v15, %v1350_v15  ;;  %v1832_v39 = vadd.f32 %v1831_v17, %v1830_v61  ;;  %v1325_v37 = vadd.f32 %v1324_v9, %v1228_v63 }
 0x165   : > { %v1833_v0 = vpop.f32.mrf.mxu0 }
 0x166   : > { %1431 = vst.msk [vmem:[%s2437_s27 + $0x2c] sm:$0xf] %vm1419_vm0, %v1642_v19  ;;  %v1351_v2 = vmax.f32 %v1325_v37, 0.0  ;;  %v1231_v3 = vadd.f32 %v1832_v39, %v1134_v18 }
 0x167   : > { %v1834_v21 = vpop.f32.mrf.mxu0 }
 0x168   : > { %v1643_v53 = vpack.c.bf16 %v1351_v2, %v1351_v2  ;;  %v1835_v55 = vadd.f32 %v1834_v21, %v1833_v0  ;;  %v1328_v4 = vadd.f32 %v1327_v1, %v1231_v3 }
 0x169   : > { %v1836_v6 = vpop.f32.mrf.mxu0 }
 0x16a   : > { %1432 = vst.msk [vmem:[%s2437_s27 + $0x30] sm:$0xf] %vm1419_vm0, %v1643_v53  ;;  %v1236_v24 = vadd.f32 %v1835_v55, %v1139_v20  ;;  %v1352_v25 = vmax.f32 %v1328_v4, 0.0 }
 0x16b   : > { %v1837_v26 = vpop.f32.mrf.mxu0 }
 0x16c   : > { %v1333_v36 = vadd.f32 %v1885_v5, %v1236_v24  ;;  %v1644_v56 = vpack.c.bf16 %v1352_v25, %v1352_v25  ;;  %v1838_v7 = vadd.f32 %v1837_v26, %v1836_v6 }
 0x16e   : > { %v1353_v48 = vmax.f32 %v1333_v36, 0.0  ;;  %1433 = vst.msk [vmem:[%s2437_s27 + $0x34] sm:$0xf] %vm1419_vm0, %v1644_v56  ;;  %v1239_v57 = vadd.f32 %v1838_v7, %v1142_v27 }
 0x170   : > { %v1645_v58 = vpack.c.bf16 %v1353_v48, %v1353_v48  ;;  %v1336_v59 = vadd.f32 %v1886_v13, %v1239_v57 }
 0x172   : > { %1434 = vst.msk [vmem:[%s2437_s27 + $0x38] sm:$0xf] %vm1419_vm0, %v1645_v58  ;;  %v1354_v28 = vmax.f32 %v1336_v59, 0.0 }
 0x174   : > { %v1646_v30 = vpack.c.bf16 %v1354_v28, %v1354_v28 }
 0x176   : > { %1435 = vst.msk [vmem:[%s2437_s27 + $0x3c] sm:$0xf] %vm1419_vm0, %v1646_v30 }
 0x177 PF: > { %s12_s9 = sadd.s32 1, %s2038_s9  }
 0x178   : > { %p9_p4 = scmp.ge.s32.totalorder %s12_s9, 4  }
 0x17a   :  { %11 = sbr.rel (!%p9_p4) target bundleno = 1 (0x1), region = 58 }

// kernel: voxel_backbone8x_forward.18
= control target key start
LH: loop header
LB: loop body
LE: loop exit
PB: predicated region body
PF: predicated region fallthrough
CT: control target
= control target key end

     0   :  { %s3594_s9 = smov 0   ;;  %s4369_s0 = inlined_call_operand.vmem [shape: bf16[1792,64], index: 0, kind: input, shape index: {}]   ;;  %s4370_s1 = inlined_call_operand.vmem [shape: bf16[256,1792], index: 1, kind: input, shape index: {}]   ;;  %s4371_s2 = inlined_call_operand.vmem [shape: bf16[256,64], index: 2, kind: output, shape index: {}]  }
   0x1 LB: > { %s2551_s10 = sadd.s32 4294967295, %s3577_s9   ;;  %p2555_p0 = scmp.ge.s32.totalorder %s3577_s9, 1  ;;  %s3577_s9 = sphi %s3594_s9, %s12_s9  }
   0x2   : > { %p114_p1 = scmp.lt.s32.totalorder %s3577_s9, 3 }
   0x4   : > { %p115_p2 = pnand %p2555_p0, %p114_p1 }
   0x6   : > { %118 = sbr.rel (%p115_p2) target bundleno = 470 (0x1d6), region = 28 }
   0xb   : > { %v3291_v0 = vld [vmem:[%s4369_s0 + $0x78] sm:$0xff]   ;;  %s2556_s13 = sshll.u32 %s2551_s10, 4  ;;  %v3293_v2 = vld [vmem:[%s4369_s0 + $0x70] sm:$0xff]   ;;  %v3295_v4 = vld [vmem:[%s4369_s0 + $0x68] sm:$0xff]   ;;  %vm2478_vm0 = vcmask 519168  }
   0xc   : > { %v3292_v1 = vld [vmem:[%s4369_s0 + $0x38] sm:$0xff]   ;;  %2818 = vmatprep.subr.bf16.mxu0 %v3291_v0  ;;  %3266 = vmatprep.subr.bf16.mxu1 %v3291_v0  ;;  %p138_p3 = scmp.lt.s32.totalorder %s2556_s13, 31  ;;  %v3294_v3 = vld [vmem:[%s4369_s0 + $0x30] sm:$0xff]   ;;  %v3296_v5 = vld [vmem:[%s4369_s0 + $0x28] sm:$0xff]  }
   0xd   : > { %2819 = vmatpush3.bf16.msra.mxu0 %v3292_v1  ;;  %3274 = vmatpush3.bf16.msra.mxu1 %v3292_v1  ;;  %v3297_v6 = vld [vmem:[%s4369_s0 + $0x60] sm:$0xff]   ;;  %v3299_v8 = vld [vmem:[%s4369_s0 + $0x58] sm:$0xff]   ;;  %v3301_v10 = vld [vmem:[%s4369_s0 + $0x50] sm:$0xff]  }
   0xe   : > { %2820 = vmatprep.subr.bf16.mxu0 %v3293_v2  ;;  %3267 = vmatprep.subr.bf16.mxu1 %v3293_v2  ;;  %s4433_s13 = smov (!%p138_p3, %s2556_s13), 31  ;;  %v3298_v7 = vld [vmem:[%s4369_s0 + $0x20] sm:$0xff]   ;;  %v3300_v9 = vld [vmem:[%s4369_s0 + $0x18] sm:$0xff]   ;;  %v3302_v13 = vld [vmem:[%s4369_s0 + $0x10] sm:$0xff]  }
   0xf   : > { %s3282_s26 = smul.u32 56, %s4433_s13  ;;  %v3303_v14 = vld [vmem:[%s4369_s0 + $0x48] sm:$0xff]   ;;  %v3305_v16 = vld [vmem:[%s4369_s0 + $0x40] sm:$0xff]   ;;  %v3313_v20 = vld [vmem:[%s4369_s0 + $0xf8] sm:$0xff]  }
  0x10   : > { %v3304_v15 = vld [vmem:[%s4369_s0 + $0x8] sm:$0xff]   ;;  %v3306_v17 = vld [vmem:[%s4369_s0] sm:$0xff]   ;;  %v3314_v21 = vld [vmem:[%s4369_s0 + $0x178] sm:$0xff]  }
  0x11   : > { %2821 = vmatpush3.bf16.msra.mxu0 %v3294_v3  ;;  %3275 = vmatpush3.bf16.msra.mxu1 %v3294_v3  ;;  %s3635_s5 = scalar_lea.vmem %s4370_s1, %s3282_s26  ;;  %v3315_v22 = vld [vmem:[%s4369_s0 + $0xb8] sm:$0xff]   ;;  %v3317_v24 = vld [vmem:[%s4369_s0 + $0xf0] sm:$0xff]   ;;  %v3327_v30 = vld [vmem:[%s4369_s0 + $0xe8] sm:$0xff]  }
  0x12   : > { %2822 = vmatprep.subr.bf16.mxu0 %v3295_v4  ;;  %3268 = vmatprep.subr.bf16.mxu1 %v3295_v4  ;;  %v3309_v11 = vld [vmem:[%s3635_s5 + $0x4] ss:$56 sps:$4 sm:$0xff]   ;;  %v3307_v18 = vld [vmem:[%s3635_s5] ss:$56 sps:$4 sm:$0xff]   ;;  %v3318_v25 = vld [vmem:[%s4369_s0 + $0x170] sm:$0xff]  }
  0x13   : > { %v3312_v12 = vld [vmem:[%s3635_s5 + $0x1c4] ss:$56 sps:$4 sm:$0xff]   ;;  %1751 = vmatprep.mubr.bf16.mxu0 %v3309_v11  ;;  %v3310_v19 = vld [vmem:[%s3635_s5 + $0x1c0] ss:$56 sps:$4 sm:$0xff]   ;;  %v3321_v26 = vld [vmem:[%s3635_s5 + $0x74] ss:$56 sps:$4 sm:$0xff]  }
  0x14   : > { %1783 = vmatprep.mubr.bf16.mxu1 %v3312_v12  ;;  %v3316_v23 = vld [vmem:[%s4369_s0 + $0x138] sm:$0xff]   ;;  %v3319_v27 = vld [vmem:[%s4369_s0 + $0xb0] sm:$0xff]   ;;  %v3328_v32 = vld [vmem:[%s4369_s0 + $0x168] sm:$0xff]  }
  0x15   : > { %2823 = vmatpush3.bf16.msra.mxu0 %v3296_v5  ;;  %3276 = vmatpush3.bf16.msra.mxu1 %v3296_v5  ;;  %v3323_v28 = vld [vmem:[%s3635_s5 + $0x234] ss:$56 sps:$4 sm:$0xff]   ;;  %v3325_v31 = vld [vmem:[%s3635_s5 + $0x70] ss:$56 sps:$4 sm:$0xff]   ;;  %v3331_v36 = vld [vmem:[%s4369_s0 + $0xe0] sm:$0xff]  }
  0x16   : > { %2824 = vmatprep.subr.bf16.mxu0 %v3297_v6  ;;  %3269 = vmatprep.subr.bf16.mxu1 %v3297_v6  ;;  %v3320_v29 = vld [vmem:[%s4369_s0 + $0x130] sm:$0xff]   ;;  %v3329_v34 = vld [vmem:[%s4369_s0 + $0xa8] sm:$0xff]   ;;  %v3332_v37 = vld [vmem:[%s4369_s0 + $0x160] sm:$0xff]  }
  0x17   : > { %v3326_v33 = vld [vmem:[%s3635_s5 + $0x230] ss:$56 sps:$4 sm:$0xff]   ;;  %v3335_v38 = vld [vmem:[%s3635_s5 + $0xe4] ss:$56 sps:$4 sm:$0xff]   ;;  %v3339_v43 = vld [vmem:[%s3635_s5 + $0xe0] ss:$56 sps:$4 sm:$0xff]  }
  0x18   : > { %v3330_v35 = vld [vmem:[%s4369_s0 + $0x128] sm:$0xff]   ;;  %v3333_v39 = vld [vmem:[%s4369_s0 + $0xa0] sm:$0xff]   ;;  %v3341_v42 = vld [vmem:[%s4369_s0 + $0xd8] sm:$0xff]  }
  0x19   : > { %2825 = vmatpush3.bf16.msra.mxu0 %v3298_v7  ;;  %3277 = vmatpush3.bf16.msra.mxu1 %v3298_v7  ;;  %v3337_v40 = vld [vmem:[%s3635_s5 + $0x2a4] ss:$56 sps:$4 sm:$0xff]   ;;  %v3340_v44 = vld [vmem:[%s3635_s5 + $0x2a0] ss:$56 sps:$4 sm:$0xff]   ;;  %v3345_v48 = vld [vmem:[%s4369_s0 + $0xd0] sm:$0xff]  }
  0x1a   : > { %2826 = vmatprep.subr.bf16.mxu0 %v3299_v8  ;;  %3270 = vmatprep.subr.bf16.mxu1 %v3299_v8  ;;  %v3334_v41 = vld [vmem:[%s4369_s0 + $0x120] sm:$0xff]   ;;  %v3342_v45 = vld [vmem:[%s4369_s0 + $0x158] sm:$0xff]   ;;  %v3346_v49 = vld [vmem:[%s4369_s0 + $0x150] sm:$0xff]  }
  0x1b   : > { %v3343_v46 = vld [vmem:[%s4369_s0 + $0x98] sm:$0xff]   ;;  %v3349_v50 = vld [vmem:[%s3635_s5 + $0x154] ss:$56 sps:$4 sm:$0xff]   ;;  %v3353_v55 = vld [vmem:[%s3635_s5 + $0x150] ss:$56 sps:$4 sm:$0xff]  }
  0x1c   : > { %v3344_v47 = vld [vmem:[%s4369_s0 + $0x118] sm:$0xff]   ;;  %v3351_v51 = vld [vmem:[%s3635_s5 + $0x314] ss:$56 sps:$4 sm:$0xff]   ;;  %v3354_v56 = vld [vmem:[%s3635_s5 + $0x310] ss:$56 sps:$4 sm:$0xff]  }
  0x1d   : > { %2827 = vmatpush3.bf16.msra.mxu0 %v3300_v9  ;;  %3278 = vmatpush3.bf16.msra.mxu1 %v3300_v9  ;;  %v3347_v52 = vld [vmem:[%s4369_s0 + $0x90] sm:$0xff]   ;;  %v3355_v54 = vld [vmem:[%s4369_s0 + $0xc8] sm:$0xff]   ;;  %v3359_v60 = vld [vmem:[%s4369_s0 + $0xc0] sm:$0xff]  }
  0x1e   : > { %2828 = vmatprep.subr.bf16.mxu0 %v3301_v10  ;;  %3271 = vmatprep.subr.bf16.mxu1 %v3301_v10  ;;  %v3348_v53 = vld [vmem:[%s4369_s0 + $0x110] sm:$0xff]   ;;  %v3356_v57 = vld [vmem:[%s4369_s0 + $0x148] sm:$0xff]   ;;  %v3360_v61 = vld [vmem:[%s4369_s0 + $0x140] sm:$0xff]  }
  0x1f   : > { %v3357_v58 = vld [vmem:[%s4369_s0 + $0x88] sm:$0xff]   ;;  %v3361_v62 = vld [vmem:[%s4369_s0 + $0x80] sm:$0xff]   ;;  %v3369_v4 = vld [vmem:[%s4369_s0 + $0x1f8] sm:$0xff]  }
  0x20   : > { %v3358_v59 = vld [vmem:[%s4369_s0 + $0x108] sm:$0xff]   ;;  %v3362_v63 = vld [vmem:[%s4369_s0 + $0x100] sm:$0xff]   ;;  %v3370_v5 = vld [vmem:[%s4369_s0 + $0x1b8] sm:$0xff]  }
  0x21   : > { %2829 = vmatpush3.bf16.msra.mxu0 %v3302_v13  ;;  %3279 = vmatpush3.bf16.msra.mxu1 %v3302_v13  ;;  %v3365_v0 = vld [vmem:[%s3635_s5 + $0xc] ss:$56 sps:$4 sm:$0xff]   ;;  %v3363_v1 = vld [vmem:[%s3635_s5 + $0x8] ss:$56 sps:$4 sm:$0xff]   ;;  %v3371_v6 = vld [vmem:[%s4369_s0 + $0x278] sm:$0xff]  }
  0x22   : > { %2830 = vmatprep.subr.bf16.mxu0 %v3303_v14  ;;  %3272 = vmatprep.subr.bf16.mxu1 %v3303_v14  ;;  %v3366_v2 = vld [vmem:[%s3635_s5 + $0x10] ss:$56 sps:$4 sm:$0xff]   ;;  %v3368_v3 = vld [vmem:[%s3635_s5 + $0x14] ss:$56 sps:$4 sm:$0xff]   ;;  %v3372_v7 = vld [vmem:[%s4369_s0 + $0x238] sm:$0xff]  }
  0x23   : > { %v3373_v8 = vld [vmem:[%s3635_s5 + $0x7c] ss:$56 sps:$4 sm:$0xff]   ;;  %v3377_v10 = vld [vmem:[%s3635_s5 + $0x78] ss:$56 sps:$4 sm:$0xff]  }
  0x24   : > { %v3375_v9 = vld [vmem:[%s3635_s5 + $0x84] ss:$56 sps:$4 sm:$0xff]   ;;  %v3378_v11 = vld [vmem:[%s3635_s5 + $0x80] ss:$56 sps:$4 sm:$0xff]   ;;  %v3379_v12 = vld [vmem:[%s4369_s0 + $0x1f0] sm:$0xff]  }
  0x25   : > { %2831 = vmatpush3.bf16.msra.mxu0 %v3304_v15  ;;  %3280 = vmatpush3.bf16.msra.mxu1 %v3304_v15  ;;  %v3380_v13 = vld [vmem:[%s4369_s0 + $0x1b0] sm:$0xff]  }
  0x26   : > { %2832 = vmatprep.subr.bf16.mxu0 %v3305_v16  ;;  %3273 = vmatprep.subr.bf16.mxu1 %v3305_v16  ;;  %v3381_v14 = vld [vmem:[%s4369_s0 + $0x270] sm:$0xff]   ;;  %v3383_v16 = vld [vmem:[%s3635_s5 + $0xec] ss:$56 sps:$4 sm:$0xff]  }
  0x27   : > { %v3382_v15 = vld [vmem:[%s4369_s0 + $0x230] sm:$0xff]  }
  0x29   : > { %2833 = vmatpush3.bf16.msra.mxu0 %v3306_v17  ;;  %3281 = vmatpush3.bf16.msra.mxu1 %v3306_v17  ;;  %v3385_v17 = vld [vmem:[%s3635_s5 + $0xf4] ss:$56 sps:$4 sm:$0xff]  }
  0x2a   : > { %2882 = vmatprep.subr.bf16.mxu1 %v3313_v20  ;;  %2946 = vmatprep.subr.bf16.mxu0 %v3314_v21  ;;  %v3388_v20 = vld [vmem:[%s3635_s5 + $0xf0] ss:$56 sps:$4 sm:$0xff]  }
  0x2b   : > { %v3390_v21 = vld [vmem:[%s4369_s0 + $0x1a8] sm:$0xff]  }
  0x2c   : > { %1752 = vmatmul.mubr.bf16.vlgmr.msra.gmra.mxu0 %v3307_v18  ;;  %1784 = vmatmul.mubr.bf16.vlgmr.msra.gmra.mxu1 %v3310_v19  ;;  %v3389_v18 = vld [vmem:[%s4369_s0 + $0x1e8] sm:$0xff]  }
  0x2d   : > { %2883 = vmatpush3.bf16.msra.mxu1 %v3315_v22  ;;  %2947 = vmatpush3.bf16.msra.mxu0 %v3316_v23  ;;  %v3387_v19 = vld [vmem:[%s3635_s5 + $0xe8] ss:$56 sps:$4 sm:$0xff]  }
  0x2e   : > { %2884 = vmatprep.subr.bf16.mxu1 %v3317_v24  ;;  %2948 = vmatprep.subr.bf16.mxu0 %v3318_v25  ;;  %v3391_v22 = vld [vmem:[%s4369_s0 + $0x268] sm:$0xff]   ;;  %v3393_v24 = vld [vmem:[%s3635_s5 + $0x15c] ss:$56 sps:$4 sm:$0xff]  }
  0x2f   : > { %1759 = vmatprep.mubr.bf16.mxu0 %v3321_v26  ;;  %1791 = vmatprep.mubr.bf16.mxu1 %v3323_v28  ;;  %v3392_v23 = vld [vmem:[%s4369_s0 + $0x228] sm:$0xff]   ;;  %v3395_v25 = vld [vmem:[%s3635_s5 + $0x164] ss:$56 sps:$4 sm:$0xff]   ;;  %v3397_v28 = vld [vmem:[%s3635_s5 + $0x158] ss:$56 sps:$4 sm:$0xff]  }
  0x30   : > { %v3399_v26 = vld [vmem:[%s4369_s0 + $0x1e0] sm:$0xff]  }
  0x31   : > { %2885 = vmatpush3.bf16.msra.mxu1 %v3319_v27  ;;  %2949 = vmatpush3.bf16.msra.mxu0 %v3320_v29  ;;  %v3400_v27 = vld [vmem:[%s4369_s0 + $0x1a0] sm:$0xff]  }
  0x32   : > { %2886 = vmatprep.subr.bf16.mxu1 %v3327_v30  ;;  %2950 = vmatprep.subr.bf16.mxu0 %v3328_v32  ;;  %v3401_v29 = vld [vmem:[%s4369_s0 + $0x260] sm:$0xff]  }
  0x33   : > { %v3402_v30 = vld [vmem:[%s4369_s0 + $0x220] sm:$0xff]  }
  0x34   : > { %1760 = vmatmul.mubr.bf16.gmra.mxu0 %v3325_v31  ;;  %1792 = vmatmul.mubr.bf16.gmra.mxu1 %v3326_v33  ;;  %v3398_v31 = vld [vmem:[%s3635_s5 + $0x160] ss:$56 sps:$4 sm:$0xff]   ;;  %v3403_v32 = vld [vmem:[%s3635_s5 + $0x1cc] ss:$56 sps:$4 sm:$0xff]  }
  0x35   : > { %2887 = vmatpush3.bf16.msra.mxu1 %v3329_v34  ;;  %2951 = vmatpush3.bf16.msra.mxu0 %v3330_v35  ;;  %v3405_v33 = vld [vmem:[%s3635_s5 + $0x1d4] ss:$56 sps:$4 sm:$0xff]   ;;  %v3409_v34 = vld [vmem:[%s4369_s0 + $0x1d8] sm:$0xff]  }
  0x36   : > { %2888 = vmatprep.subr.bf16.mxu1 %v3331_v36  ;;  %2952 = vmatprep.subr.bf16.mxu0 %v3332_v37  ;;  %v3410_v35 = vld [vmem:[%s4369_s0 + $0x198] sm:$0xff]  }
  0x37   : > { %1767 = vmatprep.mubr.bf16.mxu0 %v3335_v38  ;;  %1799 = vmatprep.mubr.bf16.mxu1 %v3337_v40  ;;  %v3411_v36 = vld [vmem:[%s4369_s0 + $0x258] sm:$0xff]   ;;  %v3407_v38 = vld [vmem:[%s3635_s5 + $0x1c8] ss:$56 sps:$4 sm:$0xff]  }
  0x38   : > { %v3412_v37 = vld [vmem:[%s4369_s0 + $0x218] sm:$0xff]  }
  0x39   : > { %2889 = vmatpush3.bf16.msra.mxu1 %v3333_v39  ;;  %2953 = vmatpush3.bf16.msra.mxu0 %v3334_v41  ;;  %v3408_v39 = vld [vmem:[%s3635_s5 + $0x1d0] ss:$56 sps:$4 sm:$0xff]   ;;  %v3413_v40 = vld [vmem:[%s3635_s5 + $0x23c] ss:$56 sps:$4 sm:$0xff]  }
  0x3a   : > { %2890 = vmatprep.subr.bf16.mxu1 %v3341_v42  ;;  %2954 = vmatprep.subr.bf16.mxu0 %v3342_v45  ;;  %v3415_v41 = vld [vmem:[%s3635_s5 + $0x244] ss:$56 sps:$4 sm:$0xff]   ;;  %v3419_v42 = vld [vmem:[%s4369_s0 + $0x1d0] sm:$0xff]  }
  0x3b   : > { %v3422_v45 = vld [vmem:[%s4369_s0 + $0x210] sm:$0xff]  }
  0x3c   : > { %1768 = vmatmul.mubr.bf16.gmra.mxu0 %v3339_v43  ;;  %1800 = vmatmul.mubr.bf16.gmra.mxu1 %v3340_v44  ;;  %v3420_v43 = vld [vmem:[%s4369_s0 + $0x190] sm:$0xff]  }
  0x3d   : > { %2891 = vmatpush3.bf16.msra.mxu1 %v3343_v46  ;;  %2955 = vmatpush3.bf16.msra.mxu0 %v3344_v47  ;;  %v3421_v44 = vld [vmem:[%s4369_s0 + $0x250] sm:$0xff]   ;;  %v3418_v47 = vld [vmem:[%s3635_s5 + $0x240] ss:$56 sps:$4 sm:$0xff]  }
  0x3e   : > { %2892 = vmatprep.subr.bf16.mxu1 %v3345_v48  ;;  %2956 = vmatprep.subr.bf16.mxu0 %v3346_v49  ;;  %v3417_v46 = vld [vmem:[%s3635_s5 + $0x238] ss:$56 sps:$4 sm:$0xff]   ;;  %v3423_v48 = vld [vmem:[%s3635_s5 + $0x2ac] ss:$56 sps:$4 sm:$0xff]  }
  0x3f   : > { %1775 = vmatprep.mubr.bf16.mxu0 %v3349_v50  ;;  %1807 = vmatprep.mubr.bf16.mxu1 %v3351_v51  ;;  %v3425_v49 = vld [vmem:[%s3635_s5 + $0x2b4] ss:$56 sps:$4 sm:$0xff]  }
  0x40   : > { %v3429_v50 = vld [vmem:[%s4369_s0 + $0x1c8] sm:$0xff]  }
  0x41   : > { %2893 = vmatpush3.bf16.msra.mxu1 %v3347_v52  ;;  %2957 = vmatpush3.bf16.msra.mxu0 %v3348_v53  ;;  %v3430_v51 = vld [vmem:[%s4369_s0 + $0x188] sm:$0xff]  }
  0x42   : > { %2894 = vmatprep.subr.bf16.mxu1 %v3355_v54  ;;  %2958 = vmatprep.subr.bf16.mxu0 %v3356_v57  ;;  %v3431_v52 = vld [vmem:[%s4369_s0 + $0x248] sm:$0xff]   ;;  %v3433_v57 = vld [vmem:[%s3635_s5 + $0x31c] ss:$56 sps:$4 sm:$0xff]  }
  0x43   : > { %v3432_v53 = vld [vmem:[%s4369_s0 + $0x208] sm:$0xff]  }
  0x44   : > { %1776 = vmatmul.mubr.bf16.gmra.mxu0 %v3353_v55  ;;  %1808 = vmatmul.mubr.bf16.gmra.mxu1 %v3354_v56  ;;  %v3427_v54 = vld [vmem:[%s3635_s5 + $0x2a8] ss:$56 sps:$4 sm:$0xff]  }
  0x45   : > { %2895 = vmatpush3.bf16.msra.mxu1 %v3357_v58  ;;  %2959 = vmatpush3.bf16.msra.mxu0 %v3358_v59  ;;  %v3428_v55 = vld [vmem:[%s3635_s5 + $0x2b0] ss:$56 sps:$4 sm:$0xff]   ;;  %v3439_v56 = vld [vmem:[%s4369_s0 + $0x1c0] sm:$0xff]  }
  0x46   : > { %2896 = vmatprep.subr.bf16.mxu1 %v3359_v60  ;;  %2960 = vmatprep.subr.bf16.mxu0 %v3360_v61  ;;  %v3435_v58 = vld [vmem:[%s3635_s5 + $0x324] ss:$56 sps:$4 sm:$0xff]  }
  0x47   : > { %1848 = vmatprep.mubr.bf16.mxu1 %v3365_v0  ;;  %1945 = vmatprep.mubr.bf16.mxu0 %v3368_v3  ;;  %v3440_v59 = vld [vmem:[%s4369_s0 + $0x180] sm:$0xff]  }
  0x48   : > { %v3441_v60 = vld [vmem:[%s4369_s0 + $0x240] sm:$0xff]  }
  0x49   : > { %2897 = vmatpush3.bf16.msra.mxu1 %v3361_v62  ;;  %2961 = vmatpush3.bf16.msra.mxu0 %v3362_v63  ;;  %v3442_v61 = vld [vmem:[%s4369_s0 + $0x200] sm:$0xff]   ;;  %v3449_v62 = vld [vmem:[%s4369_s0 + $0x2f8] sm:$0xff]  }
  0x4a   : > { %3010 = vmatprep.subr.bf16.mxu1 %v3369_v4  ;;  %3074 = vmatprep.subr.bf16.mxu0 %v3371_v6  ;;  %v3437_v63 = vld [vmem:[%s3635_s5 + $0x318] ss:$56 sps:$4 sm:$0xff]   ;;  %v3448_v3 = vld [vmem:[%s3635_s5 + $0x24] ss:$56 sps:$4 sm:$0xff]  }
  0x4b   : > { %v3438_v0 = vld [vmem:[%s3635_s5 + $0x320] ss:$56 sps:$4 sm:$0xff]  }
  0x4c   : > { %1849 = vmatmul.mubr.bf16.vlgmr.msra.gmra.mxu1 %v3363_v1  ;;  %1946 = vmatmul.mubr.bf16.vlgmr.msra.gmra.mxu0 %v3366_v2  ;;  %v3451_v1 = vld [vmem:[%s4369_s0 + $0x378] sm:$0xff]  }
  0x4d   : > { %3011 = vmatpush3.bf16.msra.mxu1 %v3370_v5  ;;  %3075 = vmatpush3.bf16.msra.mxu0 %v3372_v7  ;;  %v3445_v2 = vld [vmem:[%s3635_s5 + $0x1c] ss:$56 sps:$4 sm:$0xff]   ;;  %v3443_v4 = vld [vmem:[%s3635_s5 + $0x18] ss:$56 sps:$4 sm:$0xff]  }
  0x4e   : > { %1856 = vmatprep.mubr.bf16.mxu1 %v3373_v8  ;;  %1953 = vmatprep.mubr.bf16.mxu0 %v3375_v9  ;;  %v3446_v5 = vld [vmem:[%s3635_s5 + $0x20] ss:$56 sps:$4 sm:$0xff]   ;;  %v3453_v8 = vld [vmem:[%s3635_s5 + $0x8c] ss:$56 sps:$4 sm:$0xff]  }
  0x4f   : > { %3012 = vmatprep.subr.bf16.mxu1 %v3379_v12  ;;  %3076 = vmatprep.subr.bf16.mxu0 %v3381_v14  ;;  %v3450_v6 = vld [vmem:[%s4369_s0 + $0x2b8] sm:$0xff]   ;;  %v3455_v9 = vld [vmem:[%s3635_s5 + $0x94] ss:$56 sps:$4 sm:$0xff]  }
  0x50   : > { %v3452_v7 = vld [vmem:[%s4369_s0 + $0x338] sm:$0xff]   ;;  %v3461_v12 = vld [vmem:[%s4369_s0 + $0x370] sm:$0xff]   ;;  %v3469_v14 = vld [vmem:[%s4369_s0 + $0x2e8] sm:$0xff]  }
  0x51   : > { %3013 = vmatpush3.bf16.msra.mxu1 %v3380_v13  ;;  %3077 = vmatpush3.bf16.msra.mxu0 %v3382_v15  ;;  %v3462_v13 = vld [vmem:[%s4369_s0 + $0x330] sm:$0xff]   ;;  %v3457_v15 = vld [vmem:[%s3635_s5 + $0x88] ss:$56 sps:$4 sm:$0xff]  }
  0x52   : > { %3014 = vmatprep.subr.bf16.mxu1 %v3389_v18  ;;  %3078 = vmatprep.subr.bf16.mxu0 %v3391_v22  ;;  %v3463_v18 = vld [vmem:[%s3635_s5 + $0xfc] ss:$56 sps:$4 sm:$0xff]   ;;  %v3479_v22 = vld [vmem:[%s4369_s0 + $0x2e0] sm:$0xff]  }
  0x54   : > { %1857 = vmatmul.mubr.bf16.gmra.mxu1 %v3377_v10  ;;  %1954 = vmatmul.mubr.bf16.gmra.mxu0 %v3378_v11  ;;  %v3459_v10 = vld [vmem:[%s4369_s0 + $0x2f0] sm:$0xff]  }
  0x55   : > { %1864 = vmatprep.mubr.bf16.mxu1 %v3383_v16  ;;  %1961 = vmatprep.mubr.bf16.mxu0 %v3385_v17  ;;  %v3460_v11 = vld [vmem:[%s4369_s0 + $0x2b0] sm:$0xff]   ;;  %v3471_v17 = vld [vmem:[%s4369_s0 + $0x368] sm:$0xff]  }
  0x56   : > { %3015 = vmatpush3.bf16.msra.mxu1 %v3390_v21  ;;  %3079 = vmatpush3.bf16.msra.mxu0 %v3392_v23  ;;  %v3458_v16 = vld [vmem:[%s3635_s5 + $0x90] ss:$56 sps:$4 sm:$0xff]   ;;  %v3481_v23 = vld [vmem:[%s4369_s0 + $0x360] sm:$0xff]  }
  0x57   : > { %3016 = vmatprep.subr.bf16.mxu1 %v3399_v26  ;;  %3080 = vmatprep.subr.bf16.mxu0 %v3401_v29  ;;  %v3472_v21 = vld [vmem:[%s4369_s0 + $0x328] sm:$0xff]   ;;  %v3480_v26 = vld [vmem:[%s4369_s0 + $0x2a0] sm:$0xff]  }
  0x58   : > { %v3475_v29 = vld [vmem:[%s3635_s5 + $0x174] ss:$56 sps:$4 sm:$0xff]  }
  0x5a   : > { %3017 = vmatpush3.bf16.msra.mxu1 %v3400_v27  ;;  %3081 = vmatpush3.bf16.msra.mxu0 %v3402_v30  ;;  %v3482_v27 = vld [vmem:[%s4369_s0 + $0x320] sm:$0xff]   ;;  %v3489_v30 = vld [vmem:[%s4369_s0 + $0x2d8] sm:$0xff]  }
  0x5b   : > { %3018 = vmatprep.subr.bf16.mxu1 %v3409_v34  ;;  %3082 = vmatprep.subr.bf16.mxu0 %v3411_v36  ;;  %v3477_v34 = vld [vmem:[%s3635_s5 + $0x168] ss:$56 sps:$4 sm:$0xff]   ;;  %v3499_v36 = vld [vmem:[%s4369_s0 + $0x2d0] sm:$0xff]  }
  0x5c   : > { %1865 = vmatmul.mubr.bf16.gmra.mxu1 %v3387_v19  ;;  %1962 = vmatmul.mubr.bf16.gmra.mxu0 %v3388_v20  ;;  %v3465_v19 = vld [vmem:[%s3635_s5 + $0x104] ss:$56 sps:$4 sm:$0xff]   ;;  %v3470_v20 = vld [vmem:[%s4369_s0 + $0x2a8] sm:$0xff]  }
  0x5d   : > { %1872 = vmatprep.mubr.bf16.mxu1 %v3393_v24  ;;  %1969 = vmatprep.mubr.bf16.mxu0 %v3395_v25  ;;  %v3467_v24 = vld [vmem:[%s3635_s5 + $0xf8] ss:$56 sps:$4 sm:$0xff]  }
  0x5e   : > { %3019 = vmatpush3.bf16.msra.mxu1 %v3410_v35  ;;  %3083 = vmatpush3.bf16.msra.mxu0 %v3412_v37  ;;  %v3468_v25 = vld [vmem:[%s3635_s5 + $0x100] ss:$56 sps:$4 sm:$0xff]   ;;  %v3478_v35 = vld [vmem:[%s3635_s5 + $0x170] ss:$56 sps:$4 sm:$0xff]   ;;  %v3483_v37 = vld [vmem:[%s3635_s5 + $0x1dc] ss:$56 sps:$4 sm:$0xff]  }
  0x5f   : > { %3020 = vmatprep.subr.bf16.mxu1 %v3419_v42  ;;  %3084 = vmatprep.subr.bf16.mxu0 %v3421_v44  ;;  %v3509_v42 = vld [vmem:[%s4369_s0 + $0x2c8] sm:$0xff]   ;;  %v3488_v44 = vld [vmem:[%s3635_s5 + $0x1e0] ss:$56 sps:$4 sm:$0xff]  }
  0x62   : > { %3021 = vmatpush3.bf16.msra.mxu1 %v3420_v43  ;;  %3085 = vmatpush3.bf16.msra.mxu0 %v3422_v45  ;;  %v3487_v43 = vld [vmem:[%s3635_s5 + $0x1d8] ss:$56 sps:$4 sm:$0xff]   ;;  %v3510_v45 = vld [vmem:[%s4369_s0 + $0x288] sm:$0xff]  }
  0x63   : > { %3022 = vmatprep.subr.bf16.mxu1 %v3429_v50  ;;  %3086 = vmatprep.subr.bf16.mxu0 %v3431_v52  ;;  %v3519_v50 = vld [vmem:[%s4369_s0 + $0x2c0] sm:$0xff]  }
  0x64   : > { %1873 = vmatmul.mubr.bf16.gmra.mxu1 %v3397_v28  ;;  %1970 = vmatmul.mubr.bf16.gmra.mxu0 %v3398_v31  ;;  %v3473_v28 = vld [vmem:[%s3635_s5 + $0x16c] ss:$56 sps:$4 sm:$0xff]   ;;  %v3490_v31 = vld [vmem:[%s4369_s0 + $0x298] sm:$0xff]  }
  0x65   : > { %1880 = vmatprep.mubr.bf16.mxu1 %v3403_v32  ;;  %1977 = vmatprep.mubr.bf16.mxu0 %v3405_v33  ;;  %v3491_v32 = vld [vmem:[%s4369_s0 + $0x358] sm:$0xff]   ;;  %v3521_v52 = vld [vmem:[%s4369_s0 + $0x340] sm:$0xff]  }
  0x66   : > { %3023 = vmatpush3.bf16.msra.mxu1 %v3430_v51  ;;  %3087 = vmatpush3.bf16.msra.mxu0 %v3432_v53  ;;  %v3492_v33 = vld [vmem:[%s4369_s0 + $0x318] sm:$0xff]   ;;  %v3520_v51 = vld [vmem:[%s4369_s0 + $0x280] sm:$0xff]  }
  0x67   : > { %3024 = vmatprep.subr.bf16.mxu1 %v3439_v56  ;;  %3088 = vmatprep.subr.bf16.mxu0 %v3441_v60  ;;  %v3522_v53 = vld [vmem:[%s4369_s0 + $0x300] sm:$0xff]   ;;  %v3503_v56 = vld [vmem:[%s3635_s5 + $0x2bc] ss:$56 sps:$4 sm:$0xff]  }
  0x68   : > { %v3513_v60 = vld [vmem:[%s3635_s5 + $0x32c] ss:$56 sps:$4 sm:$0xff]  }
  0x6a   : > { %3025 = vmatpush3.bf16.msra.mxu1 %v3440_v59  ;;  %3089 = vmatpush3.bf16.msra.mxu0 %v3442_v61  ;;  %v3508_v59 = vld [vmem:[%s3635_s5 + $0x2c0] ss:$56 sps:$4 sm:$0xff]   ;;  %v3515_v61 = vld [vmem:[%s3635_s5 + $0x334] ss:$56 sps:$4 sm:$0xff]  }
  0x6b   : > { %3138 = vmatprep.subr.bf16.mxu1 %v3449_v62  ;;  %3202 = vmatprep.subr.bf16.mxu0 %v3451_v1  ;;  %v3517_v62 = vld [vmem:[%s3635_s5 + $0x328] ss:$56 sps:$4 sm:$0xff]   ;;  %v3528_v1 = vld [vmem:[%s3635_s5 + $0x34] ss:$56 sps:$4 sm:$0xff]  }
  0x6c   : > { %1881 = vmatmul.mubr.bf16.gmra.mxu1 %v3407_v38  ;;  %1978 = vmatmul.mubr.bf16.gmra.mxu0 %v3408_v39  ;;  %v3485_v38 = vld [vmem:[%s3635_s5 + $0x1e4] ss:$56 sps:$4 sm:$0xff]   ;;  %v3500_v39 = vld [vmem:[%s4369_s0 + $0x290] sm:$0xff]  }
  0x6d   : > { %1888 = vmatprep.mubr.bf16.mxu1 %v3413_v40  ;;  %1985 = vmatprep.mubr.bf16.mxu0 %v3415_v41  ;;  %v3501_v40 = vld [vmem:[%s4369_s0 + $0x350] sm:$0xff]  }
  0x6e   : > { %v3502_v41 = vld [vmem:[%s4369_s0 + $0x310] sm:$0xff]  }
  0x74   : > { %1889 = vmatmul.mubr.bf16.gmra.mxu1 %v3417_v46  ;;  %1986 = vmatmul.mubr.bf16.gmra.mxu0 %v3418_v47  ;;  %v3493_v46 = vld [vmem:[%s3635_s5 + $0x24c] ss:$56 sps:$4 sm:$0xff]  }
  0x75   : > { %1896 = vmatprep.mubr.bf16.mxu1 %v3423_v48  ;;  %1993 = vmatprep.mubr.bf16.mxu0 %v3425_v49  ;;  %v3511_v47 = vld [vmem:[%s4369_s0 + $0x348] sm:$0xff]  }
  0x76   : > { %v3512_v48 = vld [vmem:[%s4369_s0 + $0x308] sm:$0xff]  }
  0x77   : > { %v3495_v49 = vld [vmem:[%s3635_s5 + $0x254] ss:$56 sps:$4 sm:$0xff]  }
  0x7c   : > { %1897 = vmatmul.mubr.bf16.gmra.mxu1 %v3427_v54  ;;  %1994 = vmatmul.mubr.bf16.gmra.mxu0 %v3428_v55  ;;  %v3497_v54 = vld [vmem:[%s3635_s5 + $0x248] ss:$56 sps:$4 sm:$0xff]  }
  0x7d   : > { %1904 = vmatprep.mubr.bf16.mxu1 %v3433_v57  ;;  %2001 = vmatprep.mubr.bf16.mxu0 %v3435_v58  ;;  %v3498_v55 = vld [vmem:[%s3635_s5 + $0x250] ss:$56 sps:$4 sm:$0xff]   ;;  %v3505_v57 = vld [vmem:[%s3635_s5 + $0x2c4] ss:$56 sps:$4 sm:$0xff]  }
  0x7e   : > { %v3507_v58 = vld [vmem:[%s3635_s5 + $0x2b8] ss:$56 sps:$4 sm:$0xff]  }
  0x84   : > { %1905 = vmatmul.mubr.bf16.gmra.mxu1 %v3437_v63  ;;  %2002 = vmatmul.mubr.bf16.gmra.mxu0 %v3438_v0  ;;  %v3518_v63 = vld [vmem:[%s3635_s5 + $0x330] ss:$56 sps:$4 sm:$0xff]   ;;  %v3525_v0 = vld [vmem:[%s3635_s5 + $0x2c] ss:$56 sps:$4 sm:$0xff]  }
  0x85   : > { %2042 = vmatprep.mubr.bf16.mxu1 %v3445_v2  ;;  %2139 = vmatprep.mubr.bf16.mxu0 %v3448_v3  ;;  %v3523_v2 = vld [vmem:[%s3635_s5 + $0x28] ss:$56 sps:$4 sm:$0xff]  }
  0x86   : > { %v3526_v3 = vld [vmem:[%s3635_s5 + $0x30] ss:$56 sps:$4 sm:$0xff]  }
  0x8c   : > { %2043 = vmatmul.mubr.bf16.vlgmr.msra.gmra.mxu1 %v3443_v4  ;;  %2140 = vmatmul.mubr.bf16.vlgmr.msra.gmra.mxu0 %v3446_v5  ;;  %v3529_v4 = vld [vmem:[%s3635_s5 + $0x9c] ss:$56 sps:$4 sm:$0xff]  }
  0x8d   : > { %3139 = vmatpush3.bf16.msra.mxu1 %v3450_v6  ;;  %3203 = vmatpush3.bf16.msra.mxu0 %v3452_v7  ;;  %v3531_v5 = vld [vmem:[%s3635_s5 + $0xa4] ss:$56 sps:$4 sm:$0xff]   ;;  %v3533_v6 = vld [vmem:[%s3635_s5 + $0x98] ss:$56 sps:$4 sm:$0xff]  }
  0x8e   : > { %2050 = vmatprep.mubr.bf16.mxu1 %v3453_v8  ;;  %2147 = vmatprep.mubr.bf16.mxu0 %v3455_v9  ;;  %v3534_v7 = vld [vmem:[%s3635_s5 + $0xa0] ss:$56 sps:$4 sm:$0xff]   ;;  %v3535_v8 = vld [vmem:[%s3635_s5 + $0x10c] ss:$56 sps:$4 sm:$0xff]  }
  0x8f   : > { %3140 = vmatprep.subr.bf16.mxu1 %v3459_v10  ;;  %3204 = vmatprep.subr.bf16.mxu0 %v3461_v12  ;;  %v3537_v9 = vld [vmem:[%s3635_s5 + $0x114] ss:$56 sps:$4 sm:$0xff]   ;;  %v3539_v10 = vld [vmem:[%s3635_s5 + $0x108] ss:$56 sps:$4 sm:$0xff]  }
  0x90   : > { %v3541_v12 = vld [vmem:[%s3635_s5 + $0x17c] ss:$56 sps:$4 sm:$0xff]  }
  0x91   : > { %3141 = vmatpush3.bf16.msra.mxu1 %v3460_v11  ;;  %3205 = vmatpush3.bf16.msra.mxu0 %v3462_v13  ;;  %v3540_v11 = vld [vmem:[%s3635_s5 + $0x110] ss:$56 sps:$4 sm:$0xff]   ;;  %v3543_v13 = vld [vmem:[%s3635_s5 + $0x184] ss:$56 sps:$4 sm:$0xff]  }
  0x92   : > { %3142 = vmatprep.subr.bf16.mxu1 %v3469_v14  ;;  %3206 = vmatprep.subr.bf16.mxu0 %v3471_v17  ;;  %v3545_v14 = vld [vmem:[%s3635_s5 + $0x178] ss:$56 sps:$4 sm:$0xff]   ;;  %v3549_v17 = vld [vmem:[%s3635_s5 + $0x1f4] ss:$56 sps:$4 sm:$0xff]  }
  0x94   : > { %2051 = vmatmul.mubr.bf16.gmra.mxu1 %v3457_v15  ;;  %2148 = vmatmul.mubr.bf16.gmra.mxu0 %v3458_v16  ;;  %v3546_v15 = vld [vmem:[%s3635_s5 + $0x180] ss:$56 sps:$4 sm:$0xff]   ;;  %v3547_v16 = vld [vmem:[%s3635_s5 + $0x1ec] ss:$56 sps:$4 sm:$0xff]  }
  0x95   : > { %2058 = vmatprep.mubr.bf16.mxu1 %v3463_v18  ;;  %2155 = vmatprep.mubr.bf16.mxu0 %v3465_v19  ;;  %v3551_v18 = vld [vmem:[%s3635_s5 + $0x1e8] ss:$56 sps:$4 sm:$0xff]  }
  0x96   : > { %3143 = vmatpush3.bf16.msra.mxu1 %v3470_v20  ;;  %3207 = vmatpush3.bf16.msra.mxu0 %v3472_v21  ;;  %v3552_v19 = vld [vmem:[%s3635_s5 + $0x1f0] ss:$56 sps:$4 sm:$0xff]   ;;  %v3553_v20 = vld [vmem:[%s3635_s5 + $0x25c] ss:$56 sps:$4 sm:$0xff]  }
  0x97   : > { %3144 = vmatprep.subr.bf16.mxu1 %v3479_v22  ;;  %3208 = vmatprep.subr.bf16.mxu0 %v3481_v23  ;;  %v3555_v21 = vld [vmem:[%s3635_s5 + $0x264] ss:$56 sps:$4 sm:$0xff]  }
  0x9a   : > { %3145 = vmatpush3.bf16.msra.mxu1 %v3480_v26  ;;  %3209 = vmatpush3.bf16.msra.mxu0 %v3482_v27 }
  0x9b   : > { %3146 = vmatprep.subr.bf16.mxu1 %v3489_v30  ;;  %3210 = vmatprep.subr.bf16.mxu0 %v3491_v32  ;;  %v3557_v30 = vld [vmem:[%s3635_s5 + $0x258] ss:$56 sps:$4 sm:$0xff]   ;;  %v3559_v32 = vld [vmem:[%s3635_s5 + $0x2cc] ss:$56 sps:$4 sm:$0xff]  }
  0x9c   : > { %2059 = vmatmul.mubr.bf16.gmra.mxu1 %v3467_v24  ;;  %2156 = vmatmul.mubr.bf16.gmra.mxu0 %v3468_v25 }
  0x9d   : > { %2066 = vmatprep.mubr.bf16.mxu1 %v3473_v28  ;;  %2163 = vmatprep.mubr.bf16.mxu0 %v3475_v29 }
  0x9e   : > { %3147 = vmatpush3.bf16.msra.mxu1 %v3490_v31  ;;  %3211 = vmatpush3.bf16.msra.mxu0 %v3492_v33  ;;  %v3558_v31 = vld [vmem:[%s3635_s5 + $0x260] ss:$56 sps:$4 sm:$0xff]   ;;  %v3561_v33 = vld [vmem:[%s3635_s5 + $0x2d4] ss:$56 sps:$4 sm:$0xff]  }
  0x9f   : > { %3148 = vmatprep.subr.bf16.mxu1 %v3499_v36  ;;  %3212 = vmatprep.subr.bf16.mxu0 %v3501_v40 }
  0xa2   : > { %3149 = vmatpush3.bf16.msra.mxu1 %v3500_v39  ;;  %3213 = vmatpush3.bf16.msra.mxu0 %v3502_v41 }
  0xa3   : > { %3150 = vmatprep.subr.bf16.mxu1 %v3509_v42  ;;  %3214 = vmatprep.subr.bf16.mxu0 %v3511_v47  ;;  %v3564_v47 = vld [vmem:[%s3635_s5 + $0x2d0] ss:$56 sps:$4 sm:$0xff]  }
  0xa4   : > { %2067 = vmatmul.mubr.bf16.gmra.mxu1 %v3477_v34  ;;  %2164 = vmatmul.mubr.bf16.gmra.mxu0 %v3478_v35 }
  0xa5   : > { %2074 = vmatprep.mubr.bf16.mxu1 %v3483_v37  ;;  %2171 = vmatprep.mubr.bf16.mxu0 %v3485_v38 }
  0xa6   : > { %3151 = vmatpush3.bf16.msra.mxu1 %v3510_v45  ;;  %3215 = vmatpush3.bf16.msra.mxu0 %v3512_v48  ;;  %v3565_v48 = vld [vmem:[%s3635_s5 + $0x33c] ss:$56 sps:$4 sm:$0xff]  }
  0xa7   : > { %3152 = vmatprep.subr.bf16.mxu1 %v3519_v50  ;;  %3216 = vmatprep.subr.bf16.mxu0 %v3521_v52 }
  0xaa   : > { %3153 = vmatpush3.bf16.msra.mxu1 %v3520_v51  ;;  %3217 = vmatpush3.bf16.msra.mxu0 %v3522_v53 }
  0xac   : > { %2075 = vmatmul.mubr.bf16.gmra.mxu1 %v3487_v43  ;;  %2172 = vmatmul.mubr.bf16.gmra.mxu0 %v3488_v44 }
  0xad   : > { %2082 = vmatprep.mubr.bf16.mxu1 %v3493_v46  ;;  %2179 = vmatprep.mubr.bf16.mxu0 %v3495_v49  ;;  %v3563_v46 = vld [vmem:[%s3635_s5 + $0x2c8] ss:$56 sps:$4 sm:$0xff]   ;;  %v3567_v49 = vld [vmem:[%s3635_s5 + $0x344] ss:$56 sps:$4 sm:$0xff]  }
  0xb4   : > { %2083 = vmatmul.mubr.bf16.gmra.mxu1 %v3497_v54  ;;  %2180 = vmatmul.mubr.bf16.gmra.mxu0 %v3498_v55 }
  0xb5   : > { %2090 = vmatprep.mubr.bf16.mxu1 %v3503_v56  ;;  %2187 = vmatprep.mubr.bf16.mxu0 %v3505_v57 }
  0xbc   : > { %2091 = vmatmul.mubr.bf16.gmra.mxu1 %v3507_v58  ;;  %2188 = vmatmul.mubr.bf16.gmra.mxu0 %v3508_v59 }
  0xbd   : > { %2098 = vmatprep.mubr.bf16.mxu1 %v3513_v60  ;;  %2195 = vmatprep.mubr.bf16.mxu0 %v3515_v61 }
  0xc4   : > { %2099 = vmatmul.mubr.bf16.gmra.mxu1 %v3517_v62  ;;  %2196 = vmatmul.mubr.bf16.gmra.mxu0 %v3518_v63  ;;  %v3569_v62 = vld [vmem:[%s3635_s5 + $0x338] ss:$56 sps:$4 sm:$0xff]  }
  0xc5   : > { %2236 = vmatprep.mubr.bf16.mxu1 %v3525_v0  ;;  %2333 = vmatprep.mubr.bf16.mxu0 %v3528_v1  ;;  %v3570_v63 = vld [vmem:[%s3635_s5 + $0x340] ss:$56 sps:$4 sm:$0xff]   ;;  %s2559_s5 = sshll.u32 %s4433_s13, 2 }
  0xc6   : > { %s4271_s16 = scalar_lea.vmem %s4371_s2, %s2559_s5 }
  0xcc   : > { %2237 = vmatmul.mubr.bf16.vlgmr.msra.gmra.mxu1 %v3523_v2  ;;  %2334 = vmatmul.mubr.bf16.vlgmr.msra.gmra.mxu0 %v3526_v3 }
  0xcd   : > { %2244 = vmatprep.mubr.bf16.mxu1 %v3529_v4  ;;  %2341 = vmatprep.mubr.bf16.mxu0 %v3531_v5 }
  0xd4   : > { %2245 = vmatmul.mubr.bf16.gmra.mxu1 %v3533_v6  ;;  %2342 = vmatmul.mubr.bf16.gmra.mxu0 %v3534_v7 }
  0xd5   : > { %2252 = vmatprep.mubr.bf16.mxu1 %v3535_v8  ;;  %2349 = vmatprep.mubr.bf16.mxu0 %v3537_v9 }
  0xdc   : > { %2253 = vmatmul.mubr.bf16.gmra.mxu1 %v3539_v10  ;;  %2350 = vmatmul.mubr.bf16.gmra.mxu0 %v3540_v11 }
  0xdd   : > { %2260 = vmatprep.mubr.bf16.mxu1 %v3541_v12  ;;  %2357 = vmatprep.mubr.bf16.mxu0 %v3543_v13 }
  0xe4   : > { %2261 = vmatmul.mubr.bf16.gmra.mxu1 %v3545_v14  ;;  %2358 = vmatmul.mubr.bf16.gmra.mxu0 %v3546_v15 }
  0xe5   : > { %2268 = vmatprep.mubr.bf16.mxu1 %v3547_v16  ;;  %2365 = vmatprep.mubr.bf16.mxu0 %v3549_v17 }
  0xec   : > { %v2834_v22 = vpop.f32.mrf.mxu0  ;;  %v2858_v23 = vpop.f32.mrf.mxu1  ;;  %2269 = vmatmul.mubr.bf16.gmra.mxu1 %v3551_v18  ;;  %2366 = vmatmul.mubr.bf16.gmra.mxu0 %v3552_v19 }
  0xed   : > { %2276 = vmatprep.mubr.bf16.mxu1 %v3553_v20  ;;  %2373 = vmatprep.mubr.bf16.mxu0 %v3555_v21 }
  0xee   : > { %v2835_v24 = vpop.f32.mrf.mxu0  ;;  %v2859_v25 = vpop.f32.mrf.mxu1 }
  0xef   : > { %v4048_v26 = vadd.f32 %v2835_v24, %v2834_v22  ;;  %v4050_v27 = vadd.f32 %v2859_v25, %v2858_v23 }
  0xf0   : > { %v2837_v28 = vpop.f32.mrf.mxu0  ;;  %v2861_v29 = vpop.f32.mrf.mxu1 }
  0xf2   : > { %v2838_v34 = vpop.f32.mrf.mxu0  ;;  %v2862_v35 = vpop.f32.mrf.mxu1 }
  0xf3   : > { %v4056_v36 = vadd.f32 %v2838_v34, %v2837_v28  ;;  %v4058_v37 = vadd.f32 %v2862_v35, %v2861_v29 }
  0xf4   : > { %v2840_v38 = vpop.f32.mrf.mxu0  ;;  %v2864_v39 = vpop.f32.mrf.mxu1  ;;  %2277 = vmatmul.mubr.bf16.gmra.mxu1 %v3557_v30  ;;  %2374 = vmatmul.mubr.bf16.gmra.mxu0 %v3558_v31 }
  0xf5   : > { %2284 = vmatprep.mubr.bf16.mxu1 %v3559_v32  ;;  %2381 = vmatprep.mubr.bf16.mxu0 %v3561_v33 }
  0xf6   : > { %v2841_v40 = vpop.f32.mrf.mxu0  ;;  %v2865_v41 = vpop.f32.mrf.mxu1 }
  0xf7   : > { %v4060_v42 = vadd.f32 %v2841_v40, %v2840_v38  ;;  %v4062_v43 = vadd.f32 %v2865_v41, %v2864_v39 }
  0xf8   : > { %v2843_v44 = vpop.f32.mrf.mxu0  ;;  %v2867_v45 = vpop.f32.mrf.mxu1 }
  0xfa   : > { %v2844_v50 = vpop.f32.mrf.mxu0  ;;  %v2868_v51 = vpop.f32.mrf.mxu1 }
  0xfb   : > { %v4068_v52 = vadd.f32 %v2844_v50, %v2843_v44  ;;  %v4070_v53 = vadd.f32 %v2868_v51, %v2867_v45 }
  0xfc   : > { %v2846_v54 = vpop.f32.mrf.mxu0  ;;  %v2870_v55 = vpop.f32.mrf.mxu1  ;;  %2285 = vmatmul.mubr.bf16.gmra.mxu1 %v3563_v46  ;;  %2382 = vmatmul.mubr.bf16.gmra.mxu0 %v3564_v47 }
  0xfd   : > { %2292 = vmatprep.mubr.bf16.mxu1 %v3565_v48  ;;  %2389 = vmatprep.mubr.bf16.mxu0 %v3567_v49 }
  0xfe   : > { %v2847_v56 = vpop.f32.mrf.mxu0  ;;  %v2871_v57 = vpop.f32.mrf.mxu1 }
  0xff   : > { %v4072_v58 = vadd.f32 %v2847_v56, %v2846_v54  ;;  %v4074_v59 = vadd.f32 %v2871_v57, %v2870_v55 }
 0x100   : > { %v2849_v60 = vpop.f32.mrf.mxu0  ;;  %v2873_v61 = vpop.f32.mrf.mxu1 }
 0x102   : > { %v2850_v0 = vpop.f32.mrf.mxu0  ;;  %v2874_v1 = vpop.f32.mrf.mxu1 }
 0x103   : > { %v4078_v2 = vadd.f32 %v2850_v0, %v2849_v60  ;;  %v4080_v3 = vadd.f32 %v2874_v1, %v2873_v61 }
 0x104   : > { %v2852_v4 = vpop.f32.mrf.mxu0  ;;  %v2876_v5 = vpop.f32.mrf.mxu1  ;;  %2293 = vmatmul.mubr.bf16.gmra.mxu1 %v3569_v62  ;;  %2390 = vmatmul.mubr.bf16.gmra.mxu0 %v3570_v63 }
 0x106   : > { %v2853_v6 = vpop.f32.mrf.mxu0  ;;  %v2877_v7 = vpop.f32.mrf.mxu1 }
 0x107   : > { %v4082_v8 = vadd.f32 %v2853_v6, %v2852_v4  ;;  %v4084_v9 = vadd.f32 %v2877_v7, %v2876_v5 }
 0x108   : > { %v2855_v10 = vpop.f32.mrf.mxu0  ;;  %v2879_v11 = vpop.f32.mrf.mxu1 }
 0x10a   : > { %v2856_v12 = vpop.f32.mrf.mxu0  ;;  %v2880_v13 = vpop.f32.mrf.mxu1 }
 0x10b   : > { %v4086_v14 = vadd.f32 %v2856_v12, %v2855_v10  ;;  %v4088_v15 = vadd.f32 %v2880_v13, %v2879_v11 }
 0x10c   : > { %v2898_v16 = vpop.f32.mrf.mxu1  ;;  %v2962_v17 = vpop.f32.mrf.mxu0 }
 0x10e   : > { %v2899_v18 = vpop.f32.mrf.mxu1  ;;  %v2963_v19 = vpop.f32.mrf.mxu0 }
 0x10f   : > { %v2900_v20 = vadd.f32 %v2899_v18, %v2898_v16  ;;  %v2964_v21 = vadd.f32 %v2963_v19, %v2962_v17 }
 0x110   : > { %v2901_v22 = vpop.f32.mrf.mxu1  ;;  %v2965_v23 = vpop.f32.mrf.mxu0 }
 0x111   : > { %v1851_v24 = vadd.f32 %v2900_v20, %v4048_v26 }
 0x112   : > { %v2902_v25 = vpop.f32.mrf.mxu1  ;;  %v2966_v28 = vpop.f32.mrf.mxu0 }
 0x113   : > { %v4091_v29 = vadd.f32 %v2964_v21, %v1851_v24  ;;  %v2903_v30 = vadd.f32 %v2902_v25, %v2901_v22  ;;  %v2967_v31 = vadd.f32 %v2966_v28, %v2965_v23 }
 0x114   : > { %v2904_v32 = vpop.f32.mrf.mxu1  ;;  %v2968_v33 = vpop.f32.mrf.mxu0 }
 0x115   : > { %v1854_v34 = vadd.f32 %v2903_v30, %v4056_v36 }
 0x116   : > { %v2905_v35 = vpop.f32.mrf.mxu1  ;;  %v2969_v38 = vpop.f32.mrf.mxu0 }
 0x117   : > { %v4094_v39 = vadd.f32 %v2967_v31, %v1854_v34  ;;  %v2906_v40 = vadd.f32 %v2905_v35, %v2904_v32  ;;  %v2970_v41 = vadd.f32 %v2969_v38, %v2968_v33 }
 0x118   : > { %v2907_v44 = vpop.f32.mrf.mxu1  ;;  %v2971_v45 = vpop.f32.mrf.mxu0 }
 0x119   : > { %v1859_v26 = vadd.f32 %v2906_v40, %v4060_v42 }
 0x11a   : > { %v2908_v46 = vpop.f32.mrf.mxu1  ;;  %v2972_v47 = vpop.f32.mrf.mxu0 }
 0x11b   : > { %v4097_v48 = vadd.f32 %v2970_v41, %v1859_v26  ;;  %v2909_v49 = vadd.f32 %v2908_v46, %v2907_v44  ;;  %v2973_v50 = vadd.f32 %v2972_v47, %v2971_v45 }
 0x11c   : > { %v2910_v51 = vpop.f32.mrf.mxu1  ;;  %v2974_v54 = vpop.f32.mrf.mxu0 }
 0x11d   : > { %v1862_v36 = vadd.f32 %v2909_v49, %v4068_v52 }
 0x11e   : > { %v2911_v55 = vpop.f32.mrf.mxu1  ;;  %v2975_v56 = vpop.f32.mrf.mxu0 }
 0x11f   : > { %v4100_v57 = vadd.f32 %v2973_v50, %v1862_v36  ;;  %v2912_v60 = vadd.f32 %v2911_v55, %v2910_v51  ;;  %v2976_v61 = vadd.f32 %v2975_v56, %v2974_v54 }
 0x120   : > { %v2913_v62 = vpop.f32.mrf.mxu1  ;;  %v2977_v63 = vpop.f32.mrf.mxu0 }
 0x121   : > { %v1867_v42 = vadd.f32 %v2912_v60, %v4072_v58 }
 0x122   : > { %v2914_v0 = vpop.f32.mrf.mxu1  ;;  %v2978_v1 = vpop.f32.mrf.mxu0 }
 0x123   : > { %v4103_v4 = vadd.f32 %v2976_v61, %v1867_v42  ;;  %v2915_v5 = vadd.f32 %v2914_v0, %v2913_v62  ;;  %v2979_v6 = vadd.f32 %v2978_v1, %v2977_v63 }
 0x124   : > { %v2916_v7 = vpop.f32.mrf.mxu1  ;;  %v2980_v10 = vpop.f32.mrf.mxu0 }
 0x125   : > { %v1870_v52 = vadd.f32 %v2915_v5, %v4078_v2 }
 0x126   : > { %v2917_v11 = vpop.f32.mrf.mxu1  ;;  %v2981_v12 = vpop.f32.mrf.mxu0 }
 0x127   : > { %v4106_v13 = vadd.f32 %v2979_v6, %v1870_v52  ;;  %v2918_v16 = vadd.f32 %v2917_v11, %v2916_v7  ;;  %v2982_v17 = vadd.f32 %v2981_v12, %v2980_v10 }
 0x128   : > { %v2919_v18 = vpop.f32.mrf.mxu1  ;;  %v2983_v19 = vpop.f32.mrf.mxu0 }
 0x129   : > { %v1875_v58 = vadd.f32 %v2918_v16, %v4082_v8 }
 0x12a   : > { %v2920_v20 = vpop.f32.mrf.mxu1  ;;  %v2984_v21 = vpop.f32.mrf.mxu0 }
 0x12b   : > { %v4109_v22 = vadd.f32 %v2982_v17, %v1875_v58  ;;  %v2921_v23 = vadd.f32 %v2920_v20, %v2919_v18  ;;  %v2985_v24 = vadd.f32 %v2984_v21, %v2983_v19 }
 0x12c   : > { %v2922_v25 = vpop.f32.mrf.mxu1  ;;  %v2986_v28 = vpop.f32.mrf.mxu0 }
 0x12d   : > { %v1878_v2 = vadd.f32 %v2921_v23, %v4086_v14 }
 0x12e   : > { %v2923_v30 = vpop.f32.mrf.mxu1  ;;  %v2987_v31 = vpop.f32.mrf.mxu0 }
 0x12f   : > { %v4112_v32 = vadd.f32 %v2985_v24, %v1878_v2  ;;  %v2924_v33 = vadd.f32 %v2923_v30, %v2922_v25  ;;  %v2988_v34 = vadd.f32 %v2987_v31, %v2986_v28 }
 0x130   : > { %v2925_v35 = vpop.f32.mrf.mxu1  ;;  %v2989_v38 = vpop.f32.mrf.mxu0 }
 0x131   : > { %v1883_v8 = vadd.f32 %v2924_v33, %v4050_v27 }
 0x132   : > { %v2926_v40 = vpop.f32.mrf.mxu1  ;;  %v2990_v41 = vpop.f32.mrf.mxu0 }
 0x133   : > { %v4115_v44 = vadd.f32 %v2988_v34, %v1883_v8  ;;  %v2927_v45 = vadd.f32 %v2926_v40, %v2925_v35  ;;  %v2991_v26 = vadd.f32 %v2990_v41, %v2989_v38 }
 0x134   : > { %v2928_v46 = vpop.f32.mrf.mxu1  ;;  %v2992_v47 = vpop.f32.mrf.mxu0 }
 0x135   : > { %v1886_v14 = vadd.f32 %v2927_v45, %v4058_v37 }
 0x136   : > { %v2929_v49 = vpop.f32.mrf.mxu1  ;;  %v2993_v50 = vpop.f32.mrf.mxu0 }
 0x137   : > { %v4118_v51 = vadd.f32 %v2991_v26, %v1886_v14  ;;  %v2930_v54 = vadd.f32 %v2929_v49, %v2928_v46  ;;  %v2994_v36 = vadd.f32 %v2993_v50, %v2992_v47 }
 0x138   : > { %v2931_v55 = vpop.f32.mrf.mxu1  ;;  %v2995_v56 = vpop.f32.mrf.mxu0 }
 0x139   : > { %v1891_v27 = vadd.f32 %v2930_v54, %v4062_v43 }
 0x13a   : > { %v2932_v60 = vpop.f32.mrf.mxu1  ;;  %v2996_v61 = vpop.f32.mrf.mxu0 }
 0x13b   : > { %v4121_v62 = vadd.f32 %v2994_v36, %v1891_v27  ;;  %v2933_v63 = vadd.f32 %v2932_v60, %v2931_v55  ;;  %v2997_v42 = vadd.f32 %v2996_v61, %v2995_v56 }
 0x13c   : > { %v2934_v0 = vpop.f32.mrf.mxu1  ;;  %v2998_v1 = vpop.f32.mrf.mxu0 }
 0x13d   : > { %4372 = vst [vmem:[#allocation2_spill] sm:$0xff] %v4121_v62  ;;  %v1894_v37 = vadd.f32 %v2933_v63, %v4070_v53 }
 0x13e   : > { %v2935_v5 = vpop.f32.mrf.mxu1  ;;  %v2999_v6 = vpop.f32.mrf.mxu0 }
 0x13f   : > { %v4124_v7 = vadd.f32 %v2997_v42, %v1894_v37  ;;  %v2936_v10 = vadd.f32 %v2935_v5, %v2934_v0  ;;  %v3000_v52 = vadd.f32 %v2999_v6, %v2998_v1 }
 0x140   : > { %v2937_v11 = vpop.f32.mrf.mxu1  ;;  %v3001_v12 = vpop.f32.mrf.mxu0 }
 0x141   : > { %4373 = vst [vmem:[#allocation3_spill] sm:$0xff] %v4124_v7  ;;  %v1899_v43 = vadd.f32 %v2936_v10, %v4074_v59 }
 0x142   : > { %v2938_v16 = vpop.f32.mrf.mxu1  ;;  %v3002_v17 = vpop.f32.mrf.mxu0 }
 0x143   : > { %v4127_v18 = vadd.f32 %v3000_v52, %v1899_v43  ;;  %v2939_v19 = vadd.f32 %v2938_v16, %v2937_v11  ;;  %v3003_v58 = vadd.f32 %v3002_v17, %v3001_v12 }
 0x144   : > { %v2940_v20 = vpop.f32.mrf.mxu1  ;;  %v3004_v21 = vpop.f32.mrf.mxu0 }
 0x145   : > { %4374 = vst [vmem:[#allocation4_spill] sm:$0xff] %v4127_v18  ;;  %v1902_v53 = vadd.f32 %v2939_v19, %v4080_v3 }
 0x146   : > { %v2941_v23 = vpop.f32.mrf.mxu1  ;;  %v3005_v24 = vpop.f32.mrf.mxu0 }
 0x147   : > { %v4130_v25 = vadd.f32 %v3003_v58, %v1902_v53  ;;  %v2942_v28 = vadd.f32 %v2941_v23, %v2940_v20  ;;  %v3006_v2 = vadd.f32 %v3005_v24, %v3004_v21 }
 0x148   : > { %v2943_v30 = vpop.f32.mrf.mxu1  ;;  %v3007_v31 = vpop.f32.mrf.mxu0 }
 0x149   : > { %4375 = vst [vmem:[#allocation5_spill] sm:$0xff] %v4130_v25  ;;  %v1907_v59 = vadd.f32 %v2942_v28, %v4084_v9 }
 0x14a   : > { %v2944_v33 = vpop.f32.mrf.mxu1  ;;  %v3008_v34 = vpop.f32.mrf.mxu0 }
 0x14b   : > { %v4133_v35 = vadd.f32 %v3006_v2, %v1907_v59  ;;  %v2945_v38 = vadd.f32 %v2944_v33, %v2943_v30  ;;  %v3009_v8 = vadd.f32 %v3008_v34, %v3007_v31 }
 0x14c   : > { %v3026_v40 = vpop.f32.mrf.mxu1  ;;  %v4135_v41 = vpop.f32.mrf.mxu0 }
 0x14d   : > { %4376 = vst [vmem:[#allocation6_spill] sm:$0xff] %v4133_v35  ;;  %v1910_v3 = vadd.f32 %v2945_v38, %v4088_v15 }
 0x14e   : > { %v3027_v45 = vpop.f32.mrf.mxu1  ;;  %v4138_v26 = vpop.f32.mrf.mxu0 }
 0x14f   : > { %v4140_v46 = vadd.f32 %v3009_v8, %v1910_v3 }
 0x150   : > { %v3029_v47 = vpop.f32.mrf.mxu1  ;;  %v4142_v14 = vpop.f32.mrf.mxu0 }
 0x151   : > { %4377 = vst [vmem:[#allocation7_spill] sm:$0xff] %v4140_v46 }
 0x152   : > { %v3030_v9 = vpop.f32.mrf.mxu1  ;;  %v4144_v49 = vpop.f32.mrf.mxu0 }
 0x154   : > { %v3032_v50 = vpop.f32.mrf.mxu1  ;;  %v4146_v54 = vpop.f32.mrf.mxu0 }
 0x156   : > { %v3033_v36 = vpop.f32.mrf.mxu1  ;;  %v4148_v55 = vpop.f32.mrf.mxu0 }
 0x158   : > { %v4150_v56 = vpop.f32.mrf.mxu1  ;;  %v4152_v15 = vpop.f32.mrf.mxu0 }
 0x15a   : > { %v4154_v27 = vpop.f32.mrf.mxu1  ;;  %v4156_v60 = vpop.f32.mrf.mxu0 }
 0x15c   : > { %v4158_v61 = vpop.f32.mrf.mxu1  ;;  %v4160_v63 = vpop.f32.mrf.mxu0 }
 0x15e   : > { %v4162_v42 = vpop.f32.mrf.mxu1  ;;  %v4164_v0 = vpop.f32.mrf.mxu0 }
 0x160   : > { %v4166_v1 = vpop.f32.mrf.mxu1  ;;  %v4168_v37 = vpop.f32.mrf.mxu0 }
 0x162   : > { %v4170_v5 = vpop.f32.mrf.mxu1  ;;  %v4172_v6 = vpop.f32.mrf.mxu0 }
 0x164   : > { %v4174_v10 = vpop.f32.mrf.mxu1  ;;  %v4176_v52 = vpop.f32.mrf.mxu0 }
 0x166   : > { %v4178_v11 = vpop.f32.mrf.mxu1  ;;  %v4180_v12 = vpop.f32.mrf.mxu0 }
 0x168   : > { %v4182_v43 = vpop.f32.mrf.mxu1  ;;  %v4184_v16 = vpop.f32.mrf.mxu0 }
 0x16a   : > { %v4186_v17 = vpop.f32.mrf.mxu1  ;;  %v4188_v19 = vpop.f32.mrf.mxu0 }
 0x16c   : > { %v4190_v58 = vpop.f32.mrf.mxu1  ;;  %v4192_v20 = vpop.f32.mrf.mxu0 }
 0x16e   : > { %v4194_v21 = vpop.f32.mrf.mxu1  ;;  %v4196_v53 = vpop.f32.mrf.mxu0 }
 0x170   : > { %v4198_v23 = vpop.f32.mrf.mxu1  ;;  %v4200_v24 = vpop.f32.mrf.mxu0 }
 0x171   : > { %4378 = vst [vmem:[#allocation8_spill] sm:$0xff] %v4200_v24 }
 0x172   : > { %v4202_v28 = vpop.f32.mrf.mxu1  ;;  %v4204_v2 = vpop.f32.mrf.mxu0 }
 0x173   : > { %4379 = vst [vmem:[#allocation9_spill] sm:$0xff] %v4204_v2 }
 0x174   : > { %v4206_v30 = vpop.f32.mrf.mxu1  ;;  %v4208_v31 = vpop.f32.mrf.mxu0 }
 0x175   : > { %4380 = vst [vmem:[#allocation10_spill] sm:$0xff] %v4208_v31 }
 0x176   : > { %v4210_v59 = vpop.f32.mrf.mxu1  ;;  %v4212_v33 = vpop.f32.mrf.mxu0 }
 0x177   : > { %4381 = vst [vmem:[#allocation11_spill] sm:$0xff] %v4212_v33 }
 0x178   : > { %v4214_v34 = vpop.f32.mrf.mxu1  ;;  %v4216_v38 = vpop.f32.mrf.mxu0 }
 0x179   : > { %4382 = vst [vmem:[#allocation12_spill] sm:$0xff] %v4214_v34  ;;  %4383 = vst [vmem:[#allocation13_spill] sm:$0xff] %v4216_v38 }
 0x17a   : > { %v4218_v8 = vpop.f32.mrf.mxu1  ;;  %v4220_v3 = vpop.f32.mrf.mxu0 }
 0x17b   : > { %4384 = vst [vmem:[#allocation14_spill] sm:$0xff] %v4218_v8  ;;  %4385 = vst [vmem:[#allocation15_spill] sm:$0xff] %v4220_v3 }
 0x17c   : > { %v4222_v46 = vpop.f32.mrf.mxu1  ;;  %v4224_v35 = vpop.f32.mrf.mxu0 }
 0x17d   : > { %4386 = vst [vmem:[#allocation16_spill] sm:$0xff] %v4222_v46  ;;  %4387 = vst [vmem:[#allocation17_spill] sm:$0xff] %v4224_v35  ;;  %v3028_v35 = vadd.f32 %v3027_v45, %v3026_v40 }
 0x17e   : > { %v4226_v25 = vpop.f32.mrf.mxu1  ;;  %v4228_v18 = vpop.f32.mrf.mxu0 }
 0x17f   : > { %4388 = vst [vmem:[#allocation18_spill] sm:$0xff] %v4226_v25  ;;  %4389 = vst [vmem:[#allocation19_spill] sm:$0xff] %v4228_v18 }
 0x180   : > { %v4230_v7 = vpop.f32.mrf.mxu1  ;;  %v4232_v31 = vpop.f32.mrf.mxu0 }
 0x181   : > { %4390 = vst [vmem:[#allocation20_spill] sm:$0xff] %v4230_v7  ;;  %4391 = vst [vmem:[#allocation21_spill] sm:$0xff] %v4232_v31 }
 0x182   : > { %v4234_v33 = vpop.f32.mrf.mxu1  ;;  %v4236_v34 = vpop.f32.mrf.mxu0 }
 0x183   : > { %4392 = vst [vmem:[#allocation22_spill] sm:$0xff] %v4234_v33  ;;  %4393 = vst [vmem:[#allocation23_spill] sm:$0xff] %v4236_v34  ;;  %v2045_v33 = vadd.f32 %v3028_v35, %v4091_v29  ;;  %v3031_v34 = vadd.f32 %v3030_v9, %v3029_v47 }
 0x184   : > { %v4238_v38 = vpop.f32.mrf.mxu1  ;;  %v4240_v8 = vpop.f32.mrf.mxu0 }
 0x185   : > { %4394 = vst [vmem:[#allocation24_spill] sm:$0xff] %v4238_v38  ;;  %4395 = vst [vmem:[#allocation25_spill] sm:$0xff] %v4240_v8  ;;  %v3092_v8 = vadd.f32 %v4138_v26, %v4135_v41  ;;  %v3037_v26 = vadd.f32 %v4154_v27, %v4150_v56 }
 0x186   : > { %v4242_v3 = vpop.f32.mrf.mxu1  ;;  %v4244_v46 = vpop.f32.mrf.mxu0 }
 0x187   : > { %4396 = vst [vmem:[#allocation26_spill] sm:$0xff] %v4242_v3  ;;  %4397 = vst [vmem:[#allocation27_spill] sm:$0xff] %v4244_v46  ;;  %v3034_v3 = vadd.f32 %v3033_v36, %v3032_v50  ;;  %v2142_v45 = vadd.f32 %v3092_v8, %v2045_v33  ;;  %v3043_v8 = vadd.f32 %v4170_v5, %v4166_v1 }
 0x188   : > { %v4246_v25 = vpop.f32.mrf.mxu1  ;;  %v4248_v18 = vpop.f32.mrf.mxu0 }
 0x189   : > { %4398 = vst [vmem:[#allocation28_spill] sm:$0xff] %v4246_v25  ;;  %4399 = vst [vmem:[#allocation29_spill] sm:$0xff] %v4248_v18  ;;  %v2048_v25 = vadd.f32 %v3031_v34, %v4094_v39  ;;  %v2053_v47 = vadd.f32 %v3034_v3, %v4097_v48  ;;  %v3098_v39 = vadd.f32 %v4148_v55, %v4146_v54 }
 0x18a   : > { %v4250_v7 = vpop.f32.mrf.mxu1  ;;  %v4252_v31 = vpop.f32.mrf.mxu0  ;;  %v3040_v48 = vadd.f32 %v4162_v42, %v4158_v61  ;;  %v2056_v54 = vadd.f32 %v3037_v26, %v4100_v57  ;;  %v2064_v1 = vadd.f32 %v3043_v8, %v4106_v13 }
 0x18b   : > { %4400 = vst [vmem:[#allocation30_spill] sm:$0xff] %v4250_v7  ;;  %4401 = vst [vmem:[#allocation31_spill] sm:$0xff] %v4252_v31  ;;  %v3095_v31 = vadd.f32 %v4144_v49, %v4142_v14  ;;  %v2150_v49 = vadd.f32 %v3098_v39, %v2053_v47 }
 0x18c   : > { %v3154_v62 = vpop.f32.mrf.mxu1  ;;  %v3218_v38 = vpop.f32.mrf.mxu0 }
 0x18d   : > { %v2145_v41 = vadd.f32 %v3095_v31, %v2048_v25 }
 0x18e   : > { %v3155_v46 = vpop.f32.mrf.mxu1  ;;  %v3219_v40 = vpop.f32.mrf.mxu0 }
 0x18f   : > { %v3156_v18 = vadd.f32 %v3155_v46, %v3154_v62  ;;  %v3220_v35 = vadd.f32 %v3219_v40, %v3218_v38  ;;  %v2061_v38 = vadd.f32 %v3040_v48, %v4103_v4  ;;  %v3049_v48 = vadd.f32 %v4186_v17, %v4182_v43 }
 0x190   : > { %v3157_v2 = vpop.f32.mrf.mxu1  ;;  %v3221_v7 = vpop.f32.mrf.mxu0  ;;  %v3052_v17 = vadd.f32 %v4194_v21, %v4190_v58 }
 0x191   : > { %v2239_v29 = vadd.f32 %v3156_v18, %v2142_v45  ;;  %v2072_v43 = vadd.f32 %v3049_v48, %v4112_v32 }
 0x192   : > { %v3158_v9 = vpop.f32.mrf.mxu1  ;;  %v3222_v24 = vpop.f32.mrf.mxu0  ;;  %v2077_v58 = vadd.f32 %v3052_v17, %v4115_v44 }
 0x193   : > { %v2336_v50 = vadd.f32 %v3220_v35, %v2239_v29  ;;  %v3159_v36 = vadd.f32 %v3158_v9, %v3157_v2  ;;  %v3223_v18 = vadd.f32 %v3222_v24, %v3221_v7  ;;  %v3101_v24 = vadd.f32 %v4156_v60, %v4152_v15 }
 0x194   : > { %v3160_v62 = vpop.f32.mrf.mxu1  ;;  %v3224_v46 = vpop.f32.mrf.mxu0  ;;  %v3104_v15 = vadd.f32 %v4164_v0, %v4160_v63  ;;  %v3107_v63 = vadd.f32 %v4172_v6, %v4168_v37 }
 0x195   : > { %v2398_v33 = vmax.f32 %v2336_v50, 0.0  ;;  %v2242_v14 = vadd.f32 %v3159_v36, %v2145_v41  ;;  %v2153_v40 = vadd.f32 %v3101_v24, %v2056_v54  ;;  %v3046_v36 = vadd.f32 %v4178_v11, %v4174_v10 }
 0x196   : > { %v3161_v25 = vpop.f32.mrf.mxu1  ;;  %v3225_v56 = vpop.f32.mrf.mxu0  ;;  %v2158_v26 = vadd.f32 %v3104_v15, %v2061_v38  ;;  %v2161_v13 = vadd.f32 %v3107_v63, %v2064_v1 }
 0x197   : > { %v2802_v55 = vpack.c.bf16 %v2398_v33, %v2398_v33  ;;  %v2339_v27 = vadd.f32 %v3223_v18, %v2242_v14  ;;  %v3162_v2 = vadd.f32 %v3161_v25, %v3160_v62  ;;  %v3226_v34 = vadd.f32 %v3225_v56, %v3224_v46 }
 0x198   : > { %v3163_v31 = vpop.f32.mrf.mxu1  ;;  %v3227_v7 = vpop.f32.mrf.mxu0  ;;  %v2069_v11 = vadd.f32 %v3046_v36, %v4109_v22 }
 0x199   : > { %2479 = vst.msk [vmem:[%s4271_s16] sm:$0xf] %vm2478_vm0, %v2802_v55  ;;  %v2399_v61 = vmax.f32 %v2339_v27, 0.0  ;;  %v2247_v42 = vadd.f32 %v3162_v2, %v2150_v49  ;;  %v3110_v27 = vadd.f32 %v4180_v12, %v4176_v52  ;;  %v3113_v52 = vadd.f32 %v4188_v19, %v4184_v16 }
 0x19a   : > { %v3164_v57 = vpop.f32.mrf.mxu1  ;;  %v3228_v3 = vpop.f32.mrf.mxu0  ;;  %v3116_v16 = vadd.f32 %v4196_v53, %v4192_v20 }
 0x19b   : > { %v2803_v45 = vpack.c.bf16 %v2399_v61, %v2399_v61  ;;  %v2344_v29 = vadd.f32 %v3226_v34, %v2247_v42  ;;  %v3165_v35 = vadd.f32 %v3164_v57, %v3163_v31  ;;  %v3229_v4 = vadd.f32 %v3228_v3, %v3227_v7 }
 0x19c   : > { %v3166_v60 = vpop.f32.mrf.mxu1  ;;  %v3230_v47 = vpop.f32.mrf.mxu0  ;;  %v2166_v61 = vadd.f32 %v3110_v27, %v2069_v11  ;;  %v2174_v44 = vadd.f32 %v3116_v16, %v2077_v58 }
 0x19d   : > { %2480 = vst.msk [vmem:[%s4271_s16 + $0x4] sm:$0xf] %vm2478_vm0, %v2803_v45  ;;  %v2400_v9 = vmax.f32 %v2344_v29, 0.0  ;;  %v2250_v41 = vadd.f32 %v3165_v35, %v2153_v40  ;;  %v2169_v40 = vadd.f32 %v3113_v52, %v2072_v43  ;;  %v3055_v29 = vadd.f32 %v4202_v28, %v4198_v23  ;;  %v4409_v43 = vld [vmem:[#allocation3_spill] sm:$0xff] }
 0x19e   : > { %v3167_v5 = vpop.f32.mrf.mxu1  ;;  %v3231_v50 = vpop.f32.mrf.mxu0 }
 0x19f   : > { %v2804_v39 = vpack.c.bf16 %v2400_v9, %v2400_v9  ;;  %v2347_v62 = vadd.f32 %v3229_v4, %v2250_v41  ;;  %v3168_v46 = vadd.f32 %v3167_v5, %v3166_v60  ;;  %v3232_v49 = vadd.f32 %v3231_v50, %v3230_v47 }
 0x1a0   : > { %v3169_v0 = vpop.f32.mrf.mxu1  ;;  %v3233_v33 = vpop.f32.mrf.mxu0  ;;  %v2080_v28 = vadd.f32 %v3055_v29, %v4118_v51 }
 0x1a1   : > { %2481 = vst.msk [vmem:[%s4271_s16 + $0x8] sm:$0xf] %vm2478_vm0, %v2804_v39  ;;  %v2401_v14 = vmax.f32 %v2347_v62, 0.0  ;;  %v2255_v18 = vadd.f32 %v3168_v46, %v2158_v26  ;;  %v3058_v26 = vadd.f32 %v4210_v59, %v4206_v30  ;;  %v4402_v39 = vld [vmem:[#allocation8_spill] sm:$0xff]  ;;  %v4403_v62 = vld [vmem:[#allocation9_spill] sm:$0xff] }
 0x1a2   : > { %v3170_v25 = vpop.f32.mrf.mxu1  ;;  %v3234_v10 = vpop.f32.mrf.mxu0  ;;  %v3119_v46 = vadd.f32 %v4403_v62, %v4402_v39  ;;  %v4405_v59 = vld [vmem:[#allocation12_spill] sm:$0xff] }
 0x1a3   : > { %v2805_v56 = vpack.c.bf16 %v2401_v14, %v2401_v14  ;;  %v2352_v54 = vadd.f32 %v3232_v49, %v2255_v18  ;;  %v3171_v55 = vadd.f32 %v3170_v25, %v3169_v0  ;;  %v3235_v7 = vadd.f32 %v3234_v10, %v3233_v33  ;;  %v4404_v14 = vld [vmem:[#allocation2_spill] sm:$0xff]  ;;  %v4420_v62 = vld [vmem:[#allocation24_spill] sm:$0xff] }
 0x1a4   : > { %v3172_v37 = vpop.f32.mrf.mxu1  ;;  %v3236_v6 = vpop.f32.mrf.mxu0  ;;  %v2085_v30 = vadd.f32 %v3058_v26, %v4404_v14  ;;  %v4406_v18 = vld [vmem:[#allocation14_spill] sm:$0xff]  ;;  %v2177_v48 = vadd.f32 %v3119_v46, %v2080_v28  ;;  %v4418_v28 = vld [vmem:[#allocation19_spill] sm:$0xff] }
 0x1a5   : > { %2482 = vst.msk [vmem:[%s4271_s16 + $0xc] sm:$0xf] %vm2478_vm0, %v2805_v56  ;;  %v2402_v2 = vmax.f32 %v2352_v54, 0.0  ;;  %v2258_v31 = vadd.f32 %v3171_v55, %v2161_v13  ;;  %v3061_v49 = vadd.f32 %v4406_v18, %v4405_v59  ;;  %v4407_v56 = vld [vmem:[#allocation10_spill] sm:$0xff]  ;;  %v4408_v54 = vld [vmem:[#allocation11_spill] sm:$0xff] }
 0x1a6   : > { %v3173_v22 = vpop.f32.mrf.mxu1  ;;  %v3237_v24 = vpop.f32.mrf.mxu0  ;;  %v3122_v55 = vadd.f32 %v4408_v54, %v4407_v56  ;;  %v4421_v46 = vld [vmem:[#allocation26_spill] sm:$0xff] }
 0x1a7   : > { %v2806_v42 = vpack.c.bf16 %v2402_v2, %v2402_v2  ;;  %v2355_v34 = vadd.f32 %v3235_v7, %v2258_v31  ;;  %v3174_v38 = vadd.f32 %v3173_v22, %v3172_v37  ;;  %v3238_v32 = vadd.f32 %v3237_v24, %v3236_v6 }
 0x1a8   : > { %v3175_v12 = vpop.f32.mrf.mxu1  ;;  %v3239_v8 = vpop.f32.mrf.mxu0  ;;  %v2182_v7 = vadd.f32 %v3122_v55, %v2085_v30  ;;  %v2088_v17 = vadd.f32 %v3061_v49, %v4409_v43  ;;  %v4422_v49 = vld [vmem:[#allocation21_spill] sm:$0xff]  ;;  %v4424_v55 = vld [vmem:[#allocation6_spill] sm:$0xff] }
 0x1a9   : > { %2483 = vst.msk [vmem:[%s4271_s16 + $0x10] sm:$0xf] %vm2478_vm0, %v2806_v42  ;;  %v2403_v57 = vmax.f32 %v2355_v34, 0.0  ;;  %v2263_v3 = vadd.f32 %v3174_v38, %v2166_v61  ;;  %v4410_v61 = vld [vmem:[#allocation16_spill] sm:$0xff]  ;;  %v4411_v42 = vld [vmem:[#allocation18_spill] sm:$0xff] }
 0x1aa   : > { %v3176_v21 = vpop.f32.mrf.mxu1  ;;  %v3240_v45 = vpop.f32.mrf.mxu0  ;;  %v3064_v34 = vadd.f32 %v4411_v42, %v4410_v61  ;;  %v4428_v61 = vld [vmem:[#allocation27_spill] sm:$0xff] }
 0x1ab   : > { %v2807_v35 = vpack.c.bf16 %v2403_v57, %v2403_v57  ;;  %v2360_v15 = vadd.f32 %v3238_v32, %v2263_v3  ;;  %v3177_v60 = vadd.f32 %v3176_v21, %v3175_v12  ;;  %v3241_v4 = vadd.f32 %v3240_v45, %v3239_v8  ;;  %v4412_v8 = vld [vmem:[#allocation13_spill] sm:$0xff]  ;;  %v4413_v57 = vld [vmem:[#allocation15_spill] sm:$0xff] }
 0x1ac   : > { %v3178_v19 = vpop.f32.mrf.mxu1  ;;  %v3242_v47 = vpop.f32.mrf.mxu0  ;;  %v3125_v3 = vadd.f32 %v4413_v57, %v4412_v8 }
 0x1ad   : > { %2484 = vst.msk [vmem:[%s4271_s16 + $0x14] sm:$0xf] %vm2478_vm0, %v2807_v35  ;;  %v2404_v9 = vmax.f32 %v2360_v15, 0.0  ;;  %v2266_v41 = vadd.f32 %v3177_v60, %v2169_v40  ;;  %v4414_v35 = vld [vmem:[#allocation20_spill] sm:$0xff]  ;;  %v4415_v15 = vld [vmem:[#allocation22_spill] sm:$0xff] }
 0x1ae   : > { %v3179_v1 = vpop.f32.mrf.mxu1  ;;  %v3243_v23 = vpop.f32.mrf.mxu0  ;;  %v2185_v29 = vadd.f32 %v3125_v3, %v2088_v17  ;;  %v3067_v60 = vadd.f32 %v4415_v15, %v4414_v35 }
 0x1af   : > { %v2808_v5 = vpack.c.bf16 %v2404_v9, %v2404_v9  ;;  %v2363_v50 = vadd.f32 %v3241_v4, %v2266_v41  ;;  %v3180_v36 = vadd.f32 %v3179_v1, %v3178_v19  ;;  %v3244_v33 = vadd.f32 %v3243_v23, %v3242_v47  ;;  %v4416_v47 = vld [vmem:[#allocation4_spill] sm:$0xff]  ;;  %v4417_v23 = vld [vmem:[#allocation17_spill] sm:$0xff] }
 0x1b0   : > { %v3181_v20 = vpop.f32.mrf.mxu1  ;;  %v3245_v53 = vpop.f32.mrf.mxu0  ;;  %v2093_v9 = vadd.f32 %v3064_v34, %v4416_v47 }
 0x1b1   : > { %2485 = vst.msk [vmem:[%s4271_s16 + $0x18] sm:$0xf] %vm2478_vm0, %v2808_v5  ;;  %v2405_v63 = vmax.f32 %v2363_v50, 0.0  ;;  %v2271_v0 = vadd.f32 %v3180_v36, %v2174_v44  ;;  %v3128_v5 = vadd.f32 %v4418_v28, %v4417_v23 }
 0x1b2   : > { %v3182_v51 = vpop.f32.mrf.mxu1  ;;  %v3246_v13 = vpop.f32.mrf.mxu0 }
 0x1b3   : > { %v2809_v25 = vpack.c.bf16 %v2405_v63, %v2405_v63  ;;  %v2368_v10 = vadd.f32 %v3244_v33, %v2271_v0  ;;  %v3183_v11 = vadd.f32 %v3182_v51, %v3181_v20  ;;  %v3247_v31 = vadd.f32 %v3246_v13, %v3245_v53  ;;  %v4419_v53 = vld [vmem:[#allocation5_spill] sm:$0xff]  ;;  %v4423_v51 = vld [vmem:[#allocation23_spill] sm:$0xff] }
 0x1b4   : > { %v3184_v37 = vpop.f32.mrf.mxu1  ;;  %v3248_v6 = vpop.f32.mrf.mxu0  ;;  %v2096_v39 = vadd.f32 %v3067_v60, %v4419_v53  ;;  %v3070_v63 = vadd.f32 %v4421_v46, %v4420_v62  ;;  %v2190_v14 = vadd.f32 %v3128_v5, %v2093_v9  ;;  %v3131_v13 = vadd.f32 %v4423_v51, %v4422_v49  ;;  %v4430_v60 = vld [vmem:[#allocation29_spill] sm:$0xff] }
 0x1b5   : > { %2486 = vst.msk [vmem:[%s4271_s16 + $0x1c] sm:$0xf] %vm2478_vm0, %v2809_v25  ;;  %v2406_v27 = vmax.f32 %v2368_v10, 0.0  ;;  %v2274_v2 = vadd.f32 %v3183_v11, %v2177_v48 }
 0x1b6   : > { %v3185_v22 = vpop.f32.mrf.mxu1  ;;  %v3249_v24 = vpop.f32.mrf.mxu0  ;;  %v2193_v54 = vadd.f32 %v3131_v13, %v2096_v39 }
 0x1b7   : > { %v2810_v38 = vpack.c.bf16 %v2406_v27, %v2406_v27  ;;  %v2371_v52 = vadd.f32 %v3247_v31, %v2274_v2  ;;  %v3186_v12 = vadd.f32 %v3185_v22, %v3184_v37  ;;  %v3250_v45 = vadd.f32 %v3249_v24, %v3248_v6  ;;  %v4425_v2 = vld [vmem:[#allocation28_spill] sm:$0xff]  ;;  %v4426_v31 = vld [vmem:[#allocation30_spill] sm:$0xff]  ;;  %v4427_v24 = vld [vmem:[#allocation25_spill] sm:$0xff] }
 0x1b8   : > { %v3187_v32 = vpop.f32.mrf.mxu1  ;;  %v3251_v40 = vpop.f32.mrf.mxu0  ;;  %v2101_v37 = vadd.f32 %v3070_v63, %v4424_v55  ;;  %v3134_v42 = vadd.f32 %v4428_v61, %v4427_v24 }
 0x1b9   : > { %2487 = vst.msk [vmem:[%s4271_s16 + $0x20] sm:$0xf] %vm2478_vm0, %v2810_v38  ;;  %v2407_v58 = vmax.f32 %v2371_v52, 0.0  ;;  %v2279_v21 = vadd.f32 %v3186_v12, %v2182_v7  ;;  %v3073_v7 = vadd.f32 %v4426_v31, %v4425_v2 }
 0x1ba   : > { %v3188_v16 = vpop.f32.mrf.mxu1  ;;  %v3252_v19 = vpop.f32.mrf.mxu0  ;;  %v2198_v57 = vadd.f32 %v3134_v42, %v2101_v37 }
 0x1bb   : > { %v2811_v41 = vpack.c.bf16 %v2407_v58, %v2407_v58  ;;  %v2376_v4 = vadd.f32 %v3250_v45, %v2279_v21  ;;  %v3189_v44 = vadd.f32 %v3188_v16, %v3187_v32  ;;  %v3253_v20 = vadd.f32 %v3252_v19, %v3251_v40  ;;  %v4429_v40 = vld [vmem:[#allocation7_spill] sm:$0xff] }
 0x1bc   : > { %v3190_v26 = vpop.f32.mrf.mxu1  ;;  %v3254_v1 = vpop.f32.mrf.mxu0  ;;  %v2104_v58 = vadd.f32 %v3073_v7, %v4429_v40  ;;  %v4431_v16 = vld [vmem:[#allocation31_spill] sm:$0xff] }
 0x1bd   : > { %2488 = vst.msk [vmem:[%s4271_s16 + $0x24] sm:$0xf] %vm2478_vm0, %v2811_v41  ;;  %v2408_v50 = vmax.f32 %v2376_v4, 0.0  ;;  %v2282_v36 = vadd.f32 %v3189_v44, %v2185_v29  ;;  %v3137_v19 = vadd.f32 %v4431_v16, %v4430_v60 }
 0x1be   : > { %v3191_v0 = vpop.f32.mrf.mxu1  ;;  %v3255_v33 = vpop.f32.mrf.mxu0 }
 0x1bf   : > { %v2812_v30 = vpack.c.bf16 %v2408_v50, %v2408_v50  ;;  %v2379_v59 = vadd.f32 %v3253_v20, %v2282_v36  ;;  %v3192_v18 = vadd.f32 %v3191_v0, %v3190_v26  ;;  %v3256_v56 = vadd.f32 %v3255_v33, %v3254_v1 }
 0x1c0   : > { %v3193_v48 = vpop.f32.mrf.mxu1  ;;  %v3257_v25 = vpop.f32.mrf.mxu0  ;;  %v2201_v26 = vadd.f32 %v3137_v19, %v2104_v58 }
 0x1c1   : > { %2489 = vst.msk [vmem:[%s4271_s16 + $0x28] sm:$0xf] %vm2478_vm0, %v2812_v30  ;;  %v2409_v10 = vmax.f32 %v2379_v59, 0.0  ;;  %v2287_v11 = vadd.f32 %v3192_v18, %v2190_v14 }
 0x1c2   : > { %v3194_v6 = vpop.f32.mrf.mxu1  ;;  %v3258_v27 = vpop.f32.mrf.mxu0 }
 0x1c3   : > { %v2813_v43 = vpack.c.bf16 %v2409_v10, %v2409_v10  ;;  %v2384_v17 = vadd.f32 %v3256_v56, %v2287_v11  ;;  %v3195_v22 = vadd.f32 %v3194_v6, %v3193_v48  ;;  %v3259_v8 = vadd.f32 %v3258_v27, %v3257_v25 }
 0x1c4   : > { %v3196_v34 = vpop.f32.mrf.mxu1  ;;  %v3260_v38 = vpop.f32.mrf.mxu0 }
 0x1c5   : > { %2490 = vst.msk [vmem:[%s4271_s16 + $0x2c] sm:$0xf] %vm2478_vm0, %v2813_v43  ;;  %v2410_v52 = vmax.f32 %v2384_v17, 0.0  ;;  %v2290_v12 = vadd.f32 %v3195_v22, %v2193_v54 }
 0x1c6   : > { %v3197_v3 = vpop.f32.mrf.mxu1  ;;  %v3261_v32 = vpop.f32.mrf.mxu0 }
 0x1c7   : > { %v2814_v21 = vpack.c.bf16 %v2410_v52, %v2410_v52  ;;  %v2387_v45 = vadd.f32 %v3259_v8, %v2290_v12  ;;  %v3198_v29 = vadd.f32 %v3197_v3, %v3196_v34  ;;  %v3262_v41 = vadd.f32 %v3261_v32, %v3260_v38 }
 0x1c8   : > { %v3199_v35 = vpop.f32.mrf.mxu1  ;;  %v3263_v15 = vpop.f32.mrf.mxu0 }
 0x1c9   : > { %2491 = vst.msk [vmem:[%s4271_s16 + $0x30] sm:$0xf] %vm2478_vm0, %v2814_v21  ;;  %v2411_v47 = vmax.f32 %v2387_v45, 0.0  ;;  %v2295_v9 = vadd.f32 %v3198_v29, %v2198_v57 }
 0x1ca   : > { %v3200_v4 = vpop.f32.mrf.mxu1  ;;  %v3264_v44 = vpop.f32.mrf.mxu0 }
 0x1cb   : > { %v2815_v1 = vpack.c.bf16 %v2411_v47, %v2411_v47  ;;  %v2392_v23 = vadd.f32 %v3262_v41, %v2295_v9  ;;  %v3201_v28 = vadd.f32 %v3200_v4, %v3199_v35  ;;  %v3265_v36 = vadd.f32 %v3264_v44, %v3263_v15 }
 0x1cd   : > { %2492 = vst.msk [vmem:[%s4271_s16 + $0x34] sm:$0xf] %vm2478_vm0, %v2815_v1  ;;  %v2412_v5 = vmax.f32 %v2392_v23, 0.0  ;;  %v2298_v50 = vadd.f32 %v3201_v28, %v2201_v26 }
 0x1cf   : > { %v2816_v20 = vpack.c.bf16 %v2412_v5, %v2412_v5  ;;  %v2395_v53 = vadd.f32 %v3265_v36, %v2298_v50 }
 0x1d1   : > { %2493 = vst.msk [vmem:[%s4271_s16 + $0x38] sm:$0xf] %vm2478_vm0, %v2816_v20  ;;  %v2413_v39 = vmax.f32 %v2395_v53, 0.0 }
 0x1d3   : > { %v2817_v62 = vpack.c.bf16 %v2413_v39, %v2413_v39 }
 0x1d5   : > { %2494 = vst.msk [vmem:[%s4271_s16 + $0x3c] sm:$0xf] %vm2478_vm0, %v2817_v62 }
 0x1d6 PF: > { %s12_s9 = sadd.s32 1, %s3577_s9  }
 0x1d7   : > { %p9_p4 = scmp.ge.s32.totalorder %s12_s9, 4  }
 0x1d9   :  { %11 = sbr.rel (!%p9_p4) target bundleno = 1 (0x1), region = 58 }

// kernel: voxel_backbone8x_forward.23
= control target key start
LH: loop header
LB: loop body
LE: loop exit
PB: predicated region body
PF: predicated region fallthrough
CT: control target
= control target key end

     0   :  { %s830_s9 = smov 0   ;;  %s947_s0 = inlined_call_operand.vmem [shape: bf16[192,128], index: 0, kind: input, shape index: {}]   ;;  %s948_s1 = inlined_call_operand.vmem [shape: bf16[256,192], index: 1, kind: input, shape index: {}]   ;;  %s949_s2 = inlined_call_operand.vmem [shape: bf16[256,128], index: 2, kind: output, shape index: {}]  }
   0x1 LB: > { %s609_s10 = sadd.s32 4294967295, %s812_s9   ;;  %p613_p0 = scmp.ge.s32.totalorder %s812_s9, 1  ;;  %s812_s9 = sphi %s830_s9, %s12_s9  }
   0x2   : > { %p114_p1 = scmp.lt.s32.totalorder %s812_s9, 3 }
   0x4   : > { %p115_p2 = pnand %p613_p0, %p114_p1 }
   0x5   : > { %s614_s13 = sshll.u32 (!%p115_p2), %s609_s10, 4 }
   0x6   : > { %118 = sbr.rel (%p115_p2) target bundleno = 286 (0x11e), region = 28  ;;  %p138_p3 = scmp.lt.s32.totalorder (!%p115_p2), %s614_s13, 31 }
   0xb   : > { %v770_v0 = vld [vmem:[%s947_s0 + $0x38] sm:$0xff]   ;;  %v814_v1 = vmov 0   ;;  %v771_v2 = vld [vmem:[%s947_s0 + $0x30] sm:$0xff]   ;;  %s951_s13 = smov (!%p138_p3, %s614_s13), 31  ;;  %v772_v3 = vld [vmem:[%s947_s0 + $0x28] sm:$0xff]   ;;  %vm335_vm0 = vcmask 523264  }
   0xc   : > { %360 = vmatprep.subr.bf16.mxu0 %v814_v1  ;;  %737 = vmatprep.subr.bf16.mxu1 %v814_v1  ;;  %s673_s18 = sshll.u32 %s951_s13, 3  ;;  %v773_v4 = vld [vmem:[%s947_s0 + $0x20] sm:$0xff]   ;;  %v774_v6 = vld [vmem:[%s947_s0 + $0x18] sm:$0xff]   ;;  %v775_v8 = vld [vmem:[%s947_s0 + $0x10] sm:$0xff]   ;;  %s618_s14 = sshll.u32 %s951_s13, 2 }
   0xd   : > { %361 = vmatpush1.bf16.msra.mxu0 %v770_v0  ;;  %749 = vmatpush1.bf16.msra.mxu1 %v770_v0  ;;  %s862_s23 = scalar_lea.vmem %s948_s1, %s673_s18  ;;  %v776_v9 = vld [vmem:[%s947_s0 + $0x8] sm:$0xff]   ;;  %v777_v10 = vld [vmem:[%s947_s0] sm:$0xff]   ;;  %v778_v11 = vld [vmem:[%s947_s0 + $0x58] sm:$0xff]   ;;  %s934_s17 = scalar_lea.vmem %s949_s2, %s618_s14 }
   0xe   : > { %362 = vmatprep.subr.bf16.mxu0 %v814_v1  ;;  %738 = vmatprep.subr.bf16.mxu1 %v814_v1  ;;  %v784_v5 = vld [vmem:[%s862_s23 + $0x4] ss:$8 sps:$4 sm:$0xff]   ;;  %v779_v12 = vld [vmem:[%s947_s0 + $0x50] sm:$0xff]   ;;  %v782_v15 = vld [vmem:[%s862_s23] ss:$8 sps:$4 sm:$0xff]  }
   0xf   : > { %v787_v7 = vld [vmem:[%s862_s23 + $0x44] ss:$8 sps:$4 sm:$0xff]   ;;  %647 = vmatprep.mubr.msk.bf16.mxu0 %vm335_vm0, %v784_v5  ;;  %v785_v16 = vld [vmem:[%s862_s23 + $0x40] ss:$8 sps:$4 sm:$0xff]   ;;  %v788_v17 = vld [vmem:[%s862_s23 + $0x14] ss:$8 sps:$4 sm:$0xff]  }
  0x10   : > { %651 = vmatprep.mubr.msk.bf16.mxu1 %vm335_vm0, %v787_v7  ;;  %v780_v13 = vld [vmem:[%s947_s0 + $0x48] sm:$0xff]   ;;  %v781_v14 = vld [vmem:[%s947_s0 + $0x40] sm:$0xff]   ;;  %v790_v18 = vld [vmem:[%s862_s23 + $0x54] ss:$8 sps:$4 sm:$0xff]  }
  0x11   : > { %363 = vmatpush1.bf16.msra.mxu0 %v771_v2  ;;  %750 = vmatpush1.bf16.msra.mxu1 %v771_v2  ;;  %v792_v19 = vld [vmem:[%s862_s23 + $0x10] ss:$8 sps:$4 sm:$0xff]   ;;  %v794_v21 = vld [vmem:[%s862_s23 + $0x24] ss:$8 sps:$4 sm:$0xff]   ;;  %v798_v23 = vld [vmem:[%s862_s23 + $0x20] ss:$8 sps:$4 sm:$0xff]  }
  0x12   : > { %364 = vmatprep.subr.bf16.mxu0 %v814_v1  ;;  %739 = vmatprep.subr.bf16.mxu1 %v814_v1  ;;  %v793_v20 = vld [vmem:[%s862_s23 + $0x50] ss:$8 sps:$4 sm:$0xff]   ;;  %v796_v22 = vld [vmem:[%s862_s23 + $0x64] ss:$8 sps:$4 sm:$0xff]   ;;  %v799_v24 = vld [vmem:[%s862_s23 + $0x60] ss:$8 sps:$4 sm:$0xff]  }
  0x13   : > { %v800_v25 = vld [vmem:[%s862_s23 + $0x34] ss:$8 sps:$4 sm:$0xff]   ;;  %v804_v27 = vld [vmem:[%s862_s23 + $0x30] ss:$8 sps:$4 sm:$0xff]  }
  0x14   : > { %v802_v26 = vld [vmem:[%s862_s23 + $0x74] ss:$8 sps:$4 sm:$0xff]   ;;  %v805_v28 = vld [vmem:[%s862_s23 + $0x70] ss:$8 sps:$4 sm:$0xff]  }
  0x15   : > { %365 = vmatpush1.bf16.msra.mxu0 %v772_v3  ;;  %751 = vmatpush1.bf16.msra.mxu1 %v772_v3 }
  0x16   : > { %366 = vmatprep.subr.bf16.mxu0 %v814_v1  ;;  %740 = vmatprep.subr.bf16.mxu1 %v814_v1 }
  0x19   : > { %367 = vmatpush1.bf16.msra.mxu0 %v773_v4  ;;  %752 = vmatpush1.bf16.msra.mxu1 %v773_v4 }
  0x1a   : > { %368 = vmatprep.subr.bf16.mxu0 %v814_v1  ;;  %741 = vmatprep.subr.bf16.mxu1 %v814_v1 }
  0x1d   : > { %369 = vmatpush1.bf16.msra.mxu0 %v774_v6  ;;  %753 = vmatpush1.bf16.msra.mxu1 %v774_v6 }
  0x1e   : > { %370 = vmatprep.subr.bf16.mxu0 %v814_v1  ;;  %742 = vmatprep.subr.bf16.mxu1 %v814_v1 }
  0x21   : > { %371 = vmatpush1.bf16.msra.mxu0 %v775_v8  ;;  %754 = vmatpush1.bf16.msra.mxu1 %v775_v8 }
  0x22   : > { %372 = vmatprep.subr.bf16.mxu0 %v814_v1  ;;  %743 = vmatprep.subr.bf16.mxu1 %v814_v1 }
  0x25   : > { %373 = vmatpush1.bf16.msra.mxu0 %v776_v9  ;;  %755 = vmatpush1.bf16.msra.mxu1 %v776_v9 }
  0x26   : > { %374 = vmatprep.subr.bf16.mxu0 %v814_v1  ;;  %744 = vmatprep.subr.bf16.mxu1 %v814_v1 }
  0x29   : > { %375 = vmatpush1.bf16.msra.mxu0 %v777_v10  ;;  %756 = vmatpush1.bf16.msra.mxu1 %v777_v10 }
  0x2a   : > { %384 = vmatprep.subr.bf16.mxu0 %v814_v1  ;;  %745 = vmatprep.subr.bf16.mxu1 %v814_v1 }
  0x2d   : > { %385 = vmatpush2.bf16.msra.mxu0 %v778_v11  ;;  %757 = vmatpush2.bf16.msra.mxu1 %v778_v11 }
  0x2e   : > { %386 = vmatprep.subr.bf16.mxu0 %v814_v1  ;;  %746 = vmatprep.subr.bf16.mxu1 %v814_v1 }
  0x31   : > { %387 = vmatpush2.bf16.msra.mxu0 %v779_v12  ;;  %758 = vmatpush2.bf16.msra.mxu1 %v779_v12 }
  0x32   : > { %388 = vmatprep.subr.bf16.mxu0 %v814_v1  ;;  %747 = vmatprep.subr.bf16.mxu1 %v814_v1 }
  0x35   : > { %389 = vmatpush2.bf16.msra.mxu0 %v780_v13  ;;  %759 = vmatpush2.bf16.msra.mxu1 %v780_v13 }
  0x36   : > { %390 = vmatprep.subr.bf16.mxu0 %v814_v1  ;;  %748 = vmatprep.subr.bf16.mxu1 %v814_v1 }
  0x39   : > { %391 = vmatpush2.bf16.msra.mxu0 %v781_v14  ;;  %760 = vmatpush2.bf16.msra.mxu1 %v781_v14 }
  0x3c   : > { %393 = vmatmul.mubr.bf16.vlgmr.msra.gmra.mxu0 %v782_v15  ;;  %425 = vmatmul.mubr.bf16.vlgmr.msra.gmra.mxu1 %v785_v16 }
  0x3d   : > { %648 = vmatprep.mubr.msk.bf16.mxu0 %vm335_vm0, %v788_v17  ;;  %652 = vmatprep.mubr.msk.bf16.mxu1 %vm335_vm0, %v790_v18 }
  0x44   : > { %401 = vmatmul.mubr.bf16.gmra.mxu0 %v792_v19  ;;  %433 = vmatmul.mubr.bf16.gmra.mxu1 %v793_v20 }
  0x45   : > { %649 = vmatprep.mubr.msk.bf16.mxu0 %vm335_vm0, %v794_v21  ;;  %653 = vmatprep.mubr.msk.bf16.mxu1 %vm335_vm0, %v796_v22 }
  0x4c   : > { %409 = vmatmul.mubr.bf16.gmra.mxu0 %v798_v23  ;;  %441 = vmatmul.mubr.bf16.gmra.mxu1 %v799_v24 }
  0x4d   : > { %650 = vmatprep.mubr.msk.bf16.mxu0 %vm335_vm0, %v800_v25  ;;  %654 = vmatprep.mubr.msk.bf16.mxu1 %vm335_vm0, %v802_v26 }
  0x54   : > { %417 = vmatmul.mubr.bf16.gmra.mxu0 %v804_v27  ;;  %449 = vmatmul.mubr.bf16.gmra.mxu1 %v805_v28 }
  0xfc   : > { %v394_v29 = vpop.f32.mrf.mxu0  ;;  %v426_v30 = vpop.f32.mrf.mxu1 }
  0xfd   : > { %v457_v35 = vmax.f32 %v394_v29, 0.0  ;;  %v465_v36 = vmax.f32 %v426_v30, 0.0 }
  0xfe   : > { %v396_v31 = vpop.f32.mrf.mxu0  ;;  %v428_v32 = vpop.f32.mrf.mxu1 }
 0x100   : > { %v397_v33 = vpop.f32.mrf.mxu0  ;;  %v429_v34 = vpop.f32.mrf.mxu1 }
 0x101   : > { %v458_v37 = vmax.f32 %v397_v33, 0.0  ;;  %v466_v38 = vmax.f32 %v429_v34, 0.0 }
 0x102   : > { %v399_v39 = vpop.f32.mrf.mxu0  ;;  %v431_v40 = vpop.f32.mrf.mxu1 }
 0x103   : > { %v693_v41 = vpack.c.bf16 %v458_v37, %v457_v35  ;;  %v713_v42 = vpack.c.bf16 %v466_v38, %v465_v36 }
 0x104   : > { %v402_v43 = vpop.f32.mrf.mxu0  ;;  %v434_v44 = vpop.f32.mrf.mxu1 }
 0x105   : > { %694 = vst [vmem:[%s934_s17] sm:$0xff] %v693_v41   ;;  %733 = vst [vmem:[%s934_s17 + $0x20] sm:$0xff] %v713_v42   ;;  %v459_v49 = vmax.f32 %v402_v43, 0.0  ;;  %v467_v50 = vmax.f32 %v434_v44, 0.0 }
 0x106   : > { %v404_v45 = vpop.f32.mrf.mxu0  ;;  %v436_v46 = vpop.f32.mrf.mxu1 }
 0x108   : > { %v405_v47 = vpop.f32.mrf.mxu0  ;;  %v437_v48 = vpop.f32.mrf.mxu1 }
 0x109   : > { %v460_v51 = vmax.f32 %v405_v47, 0.0  ;;  %v468_v52 = vmax.f32 %v437_v48, 0.0 }
 0x10a   : > { %v407_v53 = vpop.f32.mrf.mxu0  ;;  %v439_v54 = vpop.f32.mrf.mxu1 }
 0x10b   : > { %v698_v55 = vpack.c.bf16 %v460_v51, %v459_v49  ;;  %v718_v56 = vpack.c.bf16 %v468_v52, %v467_v50 }
 0x10c   : > { %v410_v57 = vpop.f32.mrf.mxu0  ;;  %v442_v58 = vpop.f32.mrf.mxu1 }
 0x10d   : > { %730 = vst [vmem:[%s934_s17 + $0x8] sm:$0xff] %v698_v55   ;;  %734 = vst [vmem:[%s934_s17 + $0x28] sm:$0xff] %v718_v56   ;;  %v461_v63 = vmax.f32 %v410_v57, 0.0  ;;  %v469_v0 = vmax.f32 %v442_v58, 0.0 }
 0x10e   : > { %v412_v59 = vpop.f32.mrf.mxu0  ;;  %v444_v60 = vpop.f32.mrf.mxu1 }
 0x110   : > { %v413_v61 = vpop.f32.mrf.mxu0  ;;  %v445_v62 = vpop.f32.mrf.mxu1 }
 0x111   : > { %v462_v1 = vmax.f32 %v413_v61, 0.0  ;;  %v470_v2 = vmax.f32 %v445_v62, 0.0 }
 0x112   : > { %v415_v3 = vpop.f32.mrf.mxu0  ;;  %v447_v4 = vpop.f32.mrf.mxu1 }
 0x113   : > { %v703_v5 = vpack.c.bf16 %v462_v1, %v461_v63  ;;  %v723_v6 = vpack.c.bf16 %v470_v2, %v469_v0 }
 0x114   : > { %v418_v7 = vpop.f32.mrf.mxu0  ;;  %v450_v8 = vpop.f32.mrf.mxu1 }
 0x115   : > { %731 = vst [vmem:[%s934_s17 + $0x10] sm:$0xff] %v703_v5   ;;  %735 = vst [vmem:[%s934_s17 + $0x30] sm:$0xff] %v723_v6   ;;  %v463_v13 = vmax.f32 %v418_v7, 0.0  ;;  %v471_v14 = vmax.f32 %v450_v8, 0.0 }
 0x116   : > { %v420_v9 = vpop.f32.mrf.mxu0  ;;  %v452_v10 = vpop.f32.mrf.mxu1 }
 0x118   : > { %v421_v11 = vpop.f32.mrf.mxu0  ;;  %v453_v12 = vpop.f32.mrf.mxu1 }
 0x119   : > { %v464_v15 = vmax.f32 %v421_v11, 0.0  ;;  %v472_v16 = vmax.f32 %v453_v12, 0.0 }
 0x11a   : > { %v423_v17 = vpop.f32.mrf.mxu0  ;;  %v455_v18 = vpop.f32.mrf.mxu1 }
 0x11b   : > { %v708_v19 = vpack.c.bf16 %v464_v15, %v463_v13  ;;  %v728_v20 = vpack.c.bf16 %v472_v16, %v471_v14 }
 0x11d   : > { %732 = vst [vmem:[%s934_s17 + $0x18] sm:$0xff] %v708_v19   ;;  %736 = vst [vmem:[%s934_s17 + $0x38] sm:$0xff] %v728_v20  }
 0x11e PF: > { %s12_s9 = sadd.s32 1, %s812_s9  }
 0x11f   : > { %p9_p4 = scmp.ge.s32.totalorder %s12_s9, 4  }
 0x121   :  { %11 = sbr.rel (!%p9_p4) target bundleno = 1 (0x1), region = 58 }

</bundles_post_ra>
